<compile_context>
chip_gen: v6e
topology: v6e:2x2x1
jax: 0.10.0
libtpu: 0.0.40
codegen_flags: <defaults>
</compile_context>

<pallas_src>
import jax
import jax.numpy as jnp
from jax import lax
from jax.experimental import pallas as pl
from jax.experimental.pallas import tpu as pltpu


def _round_up(x, m):
    return (x + m - 1) // m * m


def _tpu_generation():
    """Best-effort TPU generation (5/6/7) from device_kind; 0 if unknown."""
    try:
        kind = jax.devices()[0].device_kind.lower()
    except Exception:
        return 0
    for g in (7, 6, 5):
        if f"v{g}" in kind:
            return g
    return 0


# ---------------------------------------------------------------------------
# Fused kernel: all GRU layers + fc + ReLU, one batch block per grid step.
# ---------------------------------------------------------------------------
def _make_fused_kernel(seq, bb, h_pad, n_layers, w_dtype):
    """Build the kernel for static (seq, batch_block, padded hidden, layers)."""
    n_in = 3 + 4 * n_layers  # x, [wih, whh, gbias, bhn] * L, fc_w, fc_b
    unroll = max(1, min(seq, 8))  # cap unroll: no instruction-memory blowup

    def kernel(*refs):
        x_ref = refs[0]                       # (seq*bb, in_pad0)
        fcw_ref = refs[n_in - 2]              # (1, h_pad) f32
        fcb_ref = refs[n_in - 1]              # (1, 1) f32
        o_ref = refs[n_in]                    # (bb, 1)
        gi_ref = refs[n_in + 1]               # (seq*bb, 3*h_pad) f32 gate pre-acts
        y_ref = refs[n_in + 2]                # (seq*bb, h_pad) inter-layer acts
        h_ref = refs[n_in + 3]                # (bb, h_pad) carried hidden state

        for layer in range(n_layers):
            wih_ref = refs[1 + 4 * layer]     # (in_pad_l, 3*h_pad) [r|z|n]
            whh_ref = refs[2 + 4 * layer]     # (h_pad, 3*h_pad)    [r|z|n]
            gbias_ref = refs[3 + 4 * layer]   # (1, 3*h_pad): bir+bhr | biz+bhz | bin
            bhn_ref = refs[4 + 4 * layer]     # (1, h_pad): b_hn
            last = layer == n_layers - 1

            # ---- input projection for ALL timesteps: ONE wide dot, off the
            #      serial path, one lane-dense store ----
            x2 = (x_ref[...] if layer == 0 else y_ref[...]).astype(w_dtype)
            gi_ref[...] = (jnp.dot(x2, wih_ref[...],
                                   preferred_element_type=jnp.float32)
                           + gbias_ref[...])

            # ---- serial recurrence: ONE fused h_prev @ [W_hr|W_hz|W_hn] ----
            h_ref[...] = jnp.zeros((bb, h_pad), jnp.float32)   # torch h0 = zeros

            def step(t, carry):
                row = pl.multiple_of(t * bb, bb)
                h_prev = h_ref[...]
                gh = jnp.dot(h_prev.astype(w_dtype), whh_ref[...],
                             preferred_element_type=jnp.float32)
                gi_t = gi_ref[pl.ds(row, bb), :]
                # static 128-aligned lane slices of the fused gate results
                r = jax.nn.sigmoid(gi_t[:, :h_pad] + gh[:, :h_pad])
                z = jax.nn.sigmoid(gi_t[:, h_pad:2 * h_pad]
                                   + gh[:, h_pad:2 * h_pad])
                n = jnp.tanh(gi_t[:, 2 * h_pad:]
                             + r * (gh[:, 2 * h_pad:] + bhn_ref[...]))
                h_new = n + z * (h_prev - n)      # == (1 - z) * n + z * h_prev
                h_ref[...] = h_new
                if not last:                      # last layer: only h_last needed
                    y_ref[pl.ds(row, bb), :] = h_new
                return carry

            lax.fori_loop(0, seq, step, 0, unroll=unroll)

        # ---- fc + ReLU on last-timestep hidden state (VPU reduce) ----
        h_last = h_ref[...]
        y = jnp.sum(h_last * fcw_ref[...], axis=-1, keepdims=True) + fcb_ref[...]
        o_ref[...] = jnp.maximum(y, 0.0)

    return kernel


# ---------------------------------------------------------------------------
# Wrapper
# ---------------------------------------------------------------------------
@jax.jit
def pm_model_forward(x, kparams):
    """x: (batch, seq, input_dim) — batch_first, matching the PyTorch module."""
    batch, seq, input_dim = x.shape
    layers = kparams["layers"]
    fc_w = kparams["fc_w"]
    fc_b = kparams["fc_b"]
    h_pad = fc_w.shape[1]
    n_layers = len(layers)
    w_dtype = layers[0]["wih"].dtype
    in_pad0 = layers[0]["wih"].shape[0]

    gen = _tpu_generation()

    # Batch blocking: split across two TensorCores ONLY on v7x, and only when
    # each block gets >= 8 real rows; single-TC chips (v5e/v6e) use one block.
    if gen >= 7 and batch >= 16:
        batch_pad = _round_up(batch, 16)
        n_blocks = 2
    else:
        batch_pad = _round_up(batch, 8)
        n_blocks = 1
    bb = batch_pad // n_blocks

    # kernel layout: (seq, batch, feature); pad batch (sublanes) and features.
    x_t = jnp.transpose(x, (1, 0, 2)).astype(jnp.float32)
    x_p = jnp.pad(x_t, ((0, 0), (0, batch_pad - batch), (0, in_pad0 - input_dim)))
    # (n_blocks, seq*bb, in_pad0): rows [t*bb, (t+1)*bb) of block i are timestep t.
    x_blk = jnp.transpose(x_p.reshape(seq, n_blocks, bb, in_pad0),
                          (1, 0, 2, 3)).reshape(n_blocks, seq * bb, in_pad0)

    inputs = [x_blk]
    in_specs = [pl.BlockSpec((None, seq * bb, in_pad0), lambda i: (i, 0, 0))]
    for lp in layers:
        inputs += [lp["wih"], lp["whh"], lp["gbias"], lp["bhn"]]
        in_specs += [
            pl.BlockSpec(lp["wih"].shape, lambda i: (0, 0)),
            pl.BlockSpec(lp["whh"].shape, lambda i: (0, 0)),
            pl.BlockSpec(lp["gbias"].shape, lambda i: (0, 0)),
            pl.BlockSpec(lp["bhn"].shape, lambda i: (0, 0)),
        ]
    inputs += [fc_w, fc_b]
    in_specs += [
        pl.BlockSpec(fc_w.shape, lambda i: (0, 0)),
        pl.BlockSpec(fc_b.shape, lambda i: (0, 0)),
    ]

    scratch_shapes = [
        pltpu.VMEM((seq * bb, 3 * h_pad), jnp.float32),   # fused gate pre-acts
        pltpu.VMEM((seq * bb, h_pad), jnp.float32),       # inter-layer activations
        pltpu.VMEM((bb, h_pad), jnp.float32),             # carried hidden state
    ]

    # Explicit VMEM budget: double-buffered inputs/outputs + scratch + headroom,
    # clamped to a per-generation ceiling (leave headroom on v7x's 64 MiB/TC,
    # allow large residency on v5e/v6e's 128 MiB).
    param_bytes = sum(int(a.size) * a.dtype.itemsize for a in inputs[1:])
    io_bytes = 4 * (seq * bb * in_pad0 + bb)
    scratch_bytes = 4 * (seq * bb * 4 * h_pad + bb * h_pad)
    cap = (48 << 20) if gen >= 7 else ((100 << 20) if gen in (5, 6) else (64 << 20))
    vmem_limit = int(min(max(2 * (param_bytes + io_bytes) + scratch_bytes + (4 << 20),
                             16 << 20), cap))

    kernel = _make_fused_kernel(seq, bb, h_pad, n_layers, w_dtype)
    out = pl.pallas_call(
        kernel,
        out_shape=jax.ShapeDtypeStruct((batch_pad, 1), jnp.float32),
        grid=(n_blocks,),
        in_specs=in_specs,
        out_specs=pl.BlockSpec((bb, 1), lambda i: (i, 0)),
        scratch_shapes=scratch_shapes,
        compiler_params=pltpu.CompilerParams(
            dimension_semantics=("parallel",),
            vmem_limit_bytes=vmem_limit,
        ),
    )(*inputs)
    return out[:batch]


# ---------------------------------------------------------------------------
# Parameters: PyTorch-layout init + one-time conversion to kernel layout
# ---------------------------------------------------------------------------
def init_params(key, input_dim, hidden_dim, n_layers):
    """PyTorch default init U(-1/sqrt(H), 1/sqrt(H)), torch tensor layouts."""
    bound = 1.0 / float(hidden_dim) ** 0.5

    def u(k, shape):
        return jax.random.uniform(k, shape, jnp.float32, -bound, bound)

    gru_params = []
    for layer in range(n_layers):
        in_dim = input_dim if layer == 0 else hidden_dim
        key, k1, k2, k3, k4 = jax.random.split(key, 5)
        gru_params.append({
            "w_ih": u(k1, (3 * hidden_dim, in_dim)),
            "w_hh": u(k2, (3 * hidden_dim, hidden_dim)),
            "b_ih": u(k3, (3 * hidden_dim,)),
            "b_hh": u(k4, (3 * hidden_dim,)),
        })
    key, k1, k2 = jax.random.split(key, 3)
    return {
        "gru": gru_params,
        "fc_w": u(k1, (1, hidden_dim)),
        "fc_b": u(k2, (1,)),
    }


def prepare_params(params, hidden_dim, weight_dtype=None):
    """One-time conversion of torch-layout params into the kernel layout.

    - combined-gate weights: W_ih -> (in_pad, 3*h_pad), W_hh -> (h_pad, 3*h_pad)
      with gate order r|z|n and each gate block padded to 128 lanes
    - biases folded into gbias = [b_ir+b_hr | b_iz+b_hz | b_in] plus separate b_hn
    - layer-0 input features padded to a sublane multiple of 8; padding stays zero
    - weights stored in bf16 on v6e/v7x (f32 accumulation in-kernel), f32 otherwise
    """
    H = hidden_dim
    h_pad = _round_up(H, 128)
    if weight_dtype is None:
        weight_dtype = jnp.bfloat16 if _tpu_generation() >= 6 else jnp.float32

    layers = []
    for layer, p in enumerate(params["gru"]):
        in_dim = p["w_ih"].shape[1]
        in_pad = _round_up(in_dim, 8) if layer == 0 else h_pad
        wih = p["w_ih"].reshape(3, H, in_dim).transpose(0, 2, 1)   # (3, in, H)
        whh = p["w_hh"].reshape(3, H, H).transpose(0, 2, 1)        # (3, H, H)
        wih = jnp.pad(wih, ((0, 0), (0, in_pad - in_dim), (0, h_pad - H)))
        whh = jnp.pad(whh, ((0, 0), (0, h_pad - H), (0, h_pad - H)))
        wih = jnp.concatenate([wih[0], wih[1], wih[2]], axis=-1)   # (in_pad, 3*h_pad)
        whh = jnp.concatenate([whh[0], whh[1], whh[2]], axis=-1)   # (h_pad, 3*h_pad)
        bih = p["b_ih"].reshape(3, H)
        bhh = p["b_hh"].reshape(3, H)
        gbias = jnp.stack([bih[0] + bhh[0], bih[1] + bhh[1], bih[2]], 0)  # (3, H)
        gbias = jnp.pad(gbias, ((0, 0), (0, h_pad - H))).reshape(1, 3 * h_pad)
        bhn = jnp.pad(bhh[2].reshape(1, H), ((0, 0), (0, h_pad - H)))
        layers.append({
            "wih": wih.astype(weight_dtype),
            "whh": whh.astype(weight_dtype),
            "gbias": gbias.astype(jnp.float32),
            "bhn": bhn.astype(jnp.float32),
        })
    return {
        "layers": layers,
        "fc_w": jnp.pad(params["fc_w"], ((0, 0), (0, h_pad - H))).astype(jnp.float32),
        "fc_b": params["fc_b"].reshape(1, 1).astype(jnp.float32),
    }


# ---------------------------------------------------------------------------
# Demo
# ---------------------------------------------------------------------------
if __name__ == "__main__":
    batch, seq, input_dim, hidden_dim, n_layers = 2, 8, 4, 32, 2

    key = jax.random.PRNGKey(0)
    key, kx = jax.random.split(key)
    x = jax.random.normal(kx, (batch, seq, input_dim), jnp.float32)

    params = init_params(key, input_dim, hidden_dim, n_layers)
    kparams = prepare_params(params, hidden_dim)

    out = pm_model_forward(x, kparams)
    jax.block_until_ready(out)

    assert out.shape == (batch, 1), out.shape
    print("KERNEL_OK")
</pallas_src>

<mosaic_0001>
module attributes {stable_mosaic.version = 11 : i64} {
  func.func @kernel(%arg0: i32, %arg1: memref<1x64x8xf32, #tpu.memory_space<vmem>>, %arg2: memref<8x384xf32, #tpu.memory_space<vmem>>, %arg3: memref<128x384xf32, #tpu.memory_space<vmem>>, %arg4: memref<1x384xf32, #tpu.memory_space<vmem>>, %arg5: memref<1x128xf32, #tpu.memory_space<vmem>>, %arg6: memref<128x384xf32, #tpu.memory_space<vmem>>, %arg7: memref<128x384xf32, #tpu.memory_space<vmem>>, %arg8: memref<1x384xf32, #tpu.memory_space<vmem>>, %arg9: memref<1x128xf32, #tpu.memory_space<vmem>>, %arg10: memref<1x128xf32, #tpu.memory_space<vmem>>, %arg11: memref<1x1xf32, #tpu.memory_space<vmem>>, %arg12: memref<8x1xf32, #tpu.memory_space<vmem>>, %arg13: memref<64x384xf32, #tpu.memory_space<vmem>>, %arg14: memref<64x128xf32, #tpu.memory_space<vmem>>, %arg15: memref<8x128xf32, #tpu.memory_space<vmem>>) attributes {dimension_semantics = [#tpu.dimension_semantics<parallel>], iteration_bounds = array<i64: 1>, scalar_prefetch = 0 : i64, scratch_operands = 3 : i64, tpu.core_type = #tpu.core_type<tc>, window_params = [{transform_indices = @transform_0, window_bounds = array<i64: 1, 64, 8>}, {pipeline_mode = #tpu.pipeline_mode<synchronous>, transform_indices = @transform_1, window_bounds = array<i64: 8, 384>}, {pipeline_mode = #tpu.pipeline_mode<synchronous>, transform_indices = @transform_2, window_bounds = array<i64: 128, 384>}, {pipeline_mode = #tpu.pipeline_mode<synchronous>, transform_indices = @transform_3, window_bounds = array<i64: 1, 384>}, {pipeline_mode = #tpu.pipeline_mode<synchronous>, transform_indices = @transform_4, window_bounds = array<i64: 1, 128>}, {pipeline_mode = #tpu.pipeline_mode<synchronous>, transform_indices = @transform_5, window_bounds = array<i64: 128, 384>}, {pipeline_mode = #tpu.pipeline_mode<synchronous>, transform_indices = @transform_6, window_bounds = array<i64: 128, 384>}, {pipeline_mode = #tpu.pipeline_mode<synchronous>, transform_indices = @transform_7, window_bounds = array<i64: 1, 384>}, {pipeline_mode = #tpu.pipeline_mode<synchronous>, transform_indices = @transform_8, window_bounds = array<i64: 1, 128>}, {pipeline_mode = #tpu.pipeline_mode<synchronous>, transform_indices = @transform_9, window_bounds = array<i64: 1, 128>}, {pipeline_mode = #tpu.pipeline_mode<synchronous>, transform_indices = @transform_10, window_bounds = array<i64: 1, 1>}, {transform_indices = @transform_11, window_bounds = array<i64: 8, 1>}]} {
    %c0 = arith.constant 0 : index
    %c0_0 = arith.constant 0 : index
    %c0_1 = arith.constant 0 : index
    %0 = vector.load %arg1[%c0, %c0_0, %c0_1] : memref<1x64x8xf32, #tpu.memory_space<vmem>>, vector<1x64x8xf32>
    %1 = vector.shape_cast %0 : vector<1x64x8xf32> to vector<64x8xf32>
    %c0_2 = arith.constant 0 : index
    %c0_3 = arith.constant 0 : index
    %2 = vector.load %arg2[%c0_2, %c0_3] : memref<8x384xf32, #tpu.memory_space<vmem>>, vector<8x384xf32>
    %cst = arith.constant dense<0.000000e+00> : vector<64x384xf32>
    %3 = tpu.matmul %1, %2, %cst {dimension_numbers = #tpu.dot_dimension_numbers<[1], [0], [0], [1], [0, 0, 1, 1], [], []>} : vector<64x8xf32>, vector<8x384xf32>, vector<64x384xf32> -> vector<64x384xf32>
    %c0_4 = arith.constant 0 : index
    %c0_5 = arith.constant 0 : index
    %4 = vector.load %arg4[%c0_4, %c0_5] : memref<1x384xf32, #tpu.memory_space<vmem>>, vector<1x384xf32>
    %5 = vector.broadcast %4 : vector<1x384xf32> to vector<64x384xf32>
    %6 = arith.addf %3, %5 : vector<64x384xf32>
    %c0_6 = arith.constant 0 : index
    %c0_7 = arith.constant 0 : index
    %7 = vector.load %arg13[%c0_6, %c0_7] : memref<64x384xf32, #tpu.memory_space<vmem>>, vector<64x384xf32>
    tpu.vector_store %arg13[%c0_6, %c0_7], %6 {strides = array<i32>} : memref<64x384xf32, #tpu.memory_space<vmem>>, vector<64x384xf32>,
    %cst_8 = arith.constant 0.000000e+00 : f32
    %8 = vector.broadcast %cst_8 : f32 to vector<8x128xf32>
    %c0_9 = arith.constant 0 : index
    %c0_10 = arith.constant 0 : index
    %9 = vector.load %arg15[%c0_9, %c0_10] : memref<8x128xf32, #tpu.memory_space<vmem>>, vector<8x128xf32>
    tpu.vector_store %arg15[%c0_9, %c0_10], %8 {strides = array<i32>} : memref<8x128xf32, #tpu.memory_space<vmem>>, vector<8x128xf32>,
    %c0_i32 = arith.constant 0 : i32
    %c8_i32 = arith.constant 8 : i32
    %10 = arith.muli %c0_i32, %c8_i32 : i32
    %11 = tpu.assume_multiple %10, 8 : i32
    %c0_11 = arith.constant 0 : index
    %c0_12 = arith.constant 0 : index
    %12 = vector.load %arg15[%c0_11, %c0_12] : memref<8x128xf32, #tpu.memory_space<vmem>>, vector<8x128xf32>
    %c0_13 = arith.constant 0 : index
    %c0_14 = arith.constant 0 : index
    %13 = vector.load %arg3[%c0_13, %c0_14] : memref<128x384xf32, #tpu.memory_space<vmem>>, vector<128x384xf32>
    %cst_15 = arith.constant dense<0.000000e+00> : vector<8x384xf32>
    %14 = tpu.matmul %12, %13, %cst_15 {dimension_numbers = #tpu.dot_dimension_numbers<[1], [0], [0], [1], [0, 0, 1, 1], [], []>} : vector<8x128xf32>, vector<128x384xf32>, vector<8x384xf32> -> vector<8x384xf32>
    %15 = arith.index_cast %11 : i32 to index
    %c0_16 = arith.constant 0 : index
    %16 = vector.load %arg13[%15, %c0_16] : memref<64x384xf32, #tpu.memory_space<vmem>>, vector<8x384xf32>
    %17 = vector.extract_strided_slice %16 {offsets = [0, 0], sizes = [8, 128], strides = [1, 1]} : vector<8x384xf32> to vector<8x128xf32>
    %18 = vector.extract_strided_slice %14 {offsets = [0, 0], sizes = [8, 128], strides = [1, 1]} : vector<8x384xf32> to vector<8x128xf32>
    %19 = arith.addf %17, %18 : vector<8x128xf32>
    %20 = arith.negf %19 : vector<8x128xf32>
    %21 = math.exp %20 : vector<8x128xf32>
    %cst_17 = arith.constant 1.000000e+00 : f32
    %22 = vector.broadcast %cst_17 : f32 to vector<8x128xf32>
    %23 = arith.addf %22, %21 : vector<8x128xf32>
    %24 = arith.divf %22, %23 : vector<8x128xf32>
    %25 = vector.extract_strided_slice %16 {offsets = [0, 128], sizes = [8, 128], strides = [1, 1]} : vector<8x384xf32> to vector<8x128xf32>
    %26 = vector.extract_strided_slice %14 {offsets = [0, 128], sizes = [8, 128], strides = [1, 1]} : vector<8x384xf32> to vector<8x128xf32>
    %27 = arith.addf %25, %26 : vector<8x128xf32>
    %28 = arith.negf %27 : vector<8x128xf32>
    %29 = math.exp %28 : vector<8x128xf32>
    %cst_18 = arith.constant 1.000000e+00 : f32
    %30 = vector.broadcast %cst_18 : f32 to vector<8x128xf32>
    %31 = arith.addf %30, %29 : vector<8x128xf32>
    %32 = arith.divf %30, %31 : vector<8x128xf32>
    %33 = vector.extract_strided_slice %16 {offsets = [0, 256], sizes = [8, 128], strides = [1, 1]} : vector<8x384xf32> to vector<8x128xf32>
    %34 = vector.extract_strided_slice %14 {offsets = [0, 256], sizes = [8, 128], strides = [1, 1]} : vector<8x384xf32> to vector<8x128xf32>
    %c0_19 = arith.constant 0 : index
    %c0_20 = arith.constant 0 : index
    %35 = vector.load %arg5[%c0_19, %c0_20] : memref<1x128xf32, #tpu.memory_space<vmem>>, vector<1x128xf32>
    %36 = vector.broadcast %35 : vector<1x128xf32> to vector<8x128xf32>
    %37 = arith.addf %34, %36 : vector<8x128xf32>
    %38 = arith.mulf %24, %37 : vector<8x128xf32>
    %39 = arith.addf %33, %38 : vector<8x128xf32>
    %40 = math.tanh %39 : vector<8x128xf32>
    %41 = arith.subf %12, %40 : vector<8x128xf32>
    %42 = arith.mulf %32, %41 : vector<8x128xf32>
    %43 = arith.addf %40, %42 : vector<8x128xf32>
    %c0_21 = arith.constant 0 : index
    %c0_22 = arith.constant 0 : index
    %44 = vector.load %arg15[%c0_21, %c0_22] : memref<8x128xf32, #tpu.memory_space<vmem>>, vector<8x128xf32>
    tpu.vector_store %arg15[%c0_21, %c0_22], %43 {strides = array<i32>} : memref<8x128xf32, #tpu.memory_space<vmem>>, vector<8x128xf32>,
    %45 = arith.index_cast %11 : i32 to index
    %c0_23 = arith.constant 0 : index
    %46 = vector.load %arg14[%45, %c0_23] : memref<64x128xf32, #tpu.memory_space<vmem>>, vector<8x128xf32>
    tpu.vector_store %arg14[%45, %c0_23], %43 {strides = array<i32>} : memref<64x128xf32, #tpu.memory_space<vmem>>, vector<8x128xf32>,
    %c1_i32 = arith.constant 1 : i32
    %c8_i32_24 = arith.constant 8 : i32
    %47 = arith.muli %c1_i32, %c8_i32_24 : i32
    %48 = tpu.assume_multiple %47, 8 : i32
    %c0_25 = arith.constant 0 : index
    %c0_26 = arith.constant 0 : index
    %49 = vector.load %arg15[%c0_25, %c0_26] : memref<8x128xf32, #tpu.memory_space<vmem>>, vector<8x128xf32>
    %c0_27 = arith.constant 0 : index
    %c0_28 = arith.constant 0 : index
    %50 = vector.load %arg3[%c0_27, %c0_28] : memref<128x384xf32, #tpu.memory_space<vmem>>, vector<128x384xf32>
    %cst_29 = arith.constant dense<0.000000e+00> : vector<8x384xf32>
    %51 = tpu.matmul %49, %50, %cst_29 {dimension_numbers = #tpu.dot_dimension_numbers<[1], [0], [0], [1], [0, 0, 1, 1], [], []>} : vector<8x128xf32>, vector<128x384xf32>, vector<8x384xf32> -> vector<8x384xf32>
    %52 = arith.index_cast %48 : i32 to index
    %c0_30 = arith.constant 0 : index
    %53 = vector.load %arg13[%52, %c0_30] : memref<64x384xf32, #tpu.memory_space<vmem>>, vector<8x384xf32>
    %54 = vector.extract_strided_slice %53 {offsets = [0, 0], sizes = [8, 128], strides = [1, 1]} : vector<8x384xf32> to vector<8x128xf32>
    %55 = vector.extract_strided_slice %51 {offsets = [0, 0], sizes = [8, 128], strides = [1, 1]} : vector<8x384xf32> to vector<8x128xf32>
    %56 = arith.addf %54, %55 : vector<8x128xf32>
    %57 = arith.negf %56 : vector<8x128xf32>
    %58 = math.exp %57 : vector<8x128xf32>
    %cst_31 = arith.constant 1.000000e+00 : f32
    %59 = vector.broadcast %cst_31 : f32 to vector<8x128xf32>
    %60 = arith.addf %59, %58 : vector<8x128xf32>
    %61 = arith.divf %59, %60 : vector<8x128xf32>
    %62 = vector.extract_strided_slice %53 {offsets = [0, 128], sizes = [8, 128], strides = [1, 1]} : vector<8x384xf32> to vector<8x128xf32>
    %63 = vector.extract_strided_slice %51 {offsets = [0, 128], sizes = [8, 128], strides = [1, 1]} : vector<8x384xf32> to vector<8x128xf32>
    %64 = arith.addf %62, %63 : vector<8x128xf32>
    %65 = arith.negf %64 : vector<8x128xf32>
    %66 = math.exp %65 : vector<8x128xf32>
    %cst_32 = arith.constant 1.000000e+00 : f32
    %67 = vector.broadcast %cst_32 : f32 to vector<8x128xf32>
    %68 = arith.addf %67, %66 : vector<8x128xf32>
    %69 = arith.divf %67, %68 : vector<8x128xf32>
    %70 = vector.extract_strided_slice %53 {offsets = [0, 256], sizes = [8, 128], strides = [1, 1]} : vector<8x384xf32> to vector<8x128xf32>
    %71 = vector.extract_strided_slice %51 {offsets = [0, 256], sizes = [8, 128], strides = [1, 1]} : vector<8x384xf32> to vector<8x128xf32>
    %c0_33 = arith.constant 0 : index
    %c0_34 = arith.constant 0 : index
    %72 = vector.load %arg5[%c0_33, %c0_34] : memref<1x128xf32, #tpu.memory_space<vmem>>, vector<1x128xf32>
    %73 = vector.broadcast %72 : vector<1x128xf32> to vector<8x128xf32>
    %74 = arith.addf %71, %73 : vector<8x128xf32>
    %75 = arith.mulf %61, %74 : vector<8x128xf32>
    %76 = arith.addf %70, %75 : vector<8x128xf32>
    %77 = math.tanh %76 : vector<8x128xf32>
    %78 = arith.subf %49, %77 : vector<8x128xf32>
    %79 = arith.mulf %69, %78 : vector<8x128xf32>
    %80 = arith.addf %77, %79 : vector<8x128xf32>
    %c0_35 = arith.constant 0 : index
    %c0_36 = arith.constant 0 : index
    %81 = vector.load %arg15[%c0_35, %c0_36] : memref<8x128xf32, #tpu.memory_space<vmem>>, vector<8x128xf32>
    tpu.vector_store %arg15[%c0_35, %c0_36], %80 {strides = array<i32>} : memref<8x128xf32, #tpu.memory_space<vmem>>, vector<8x128xf32>,
    %82 = arith.index_cast %48 : i32 to index
    %c0_37 = arith.constant 0 : index
    %83 = vector.load %arg14[%82, %c0_37] : memref<64x128xf32, #tpu.memory_space<vmem>>, vector<8x128xf32>
    tpu.vector_store %arg14[%82, %c0_37], %80 {strides = array<i32>} : memref<64x128xf32, #tpu.memory_space<vmem>>, vector<8x128xf32>,
    %c2_i32 = arith.constant 2 : i32
    %c8_i32_38 = arith.constant 8 : i32
    %84 = arith.muli %c2_i32, %c8_i32_38 : i32
    %85 = tpu.assume_multiple %84, 8 : i32
    %c0_39 = arith.constant 0 : index
    %c0_40 = arith.constant 0 : index
    %86 = vector.load %arg15[%c0_39, %c0_40] : memref<8x128xf32, #tpu.memory_space<vmem>>, vector<8x128xf32>
    %c0_41 = arith.constant 0 : index
    %c0_42 = arith.constant 0 : index
    %87 = vector.load %arg3[%c0_41, %c0_42] : memref<128x384xf32, #tpu.memory_space<vmem>>, vector<128x384xf32>
    %cst_43 = arith.constant dense<0.000000e+00> : vector<8x384xf32>
    %88 = tpu.matmul %86, %87, %cst_43 {dimension_numbers = #tpu.dot_dimension_numbers<[1], [0], [0], [1], [0, 0, 1, 1], [], []>} : vector<8x128xf32>, vector<128x384xf32>, vector<8x384xf32> -> vector<8x384xf32>
    %89 = arith.index_cast %85 : i32 to index
    %c0_44 = arith.constant 0 : index
    %90 = vector.load %arg13[%89, %c0_44] : memref<64x384xf32, #tpu.memory_space<vmem>>, vector<8x384xf32>
    %91 = vector.extract_strided_slice %90 {offsets = [0, 0], sizes = [8, 128], strides = [1, 1]} : vector<8x384xf32> to vector<8x128xf32>
    %92 = vector.extract_strided_slice %88 {offsets = [0, 0], sizes = [8, 128], strides = [1, 1]} : vector<8x384xf32> to vector<8x128xf32>
    %93 = arith.addf %91, %92 : vector<8x128xf32>
    %94 = arith.negf %93 : vector<8x128xf32>
    %95 = math.exp %94 : vector<8x128xf32>
    %cst_45 = arith.constant 1.000000e+00 : f32
    %96 = vector.broadcast %cst_45 : f32 to vector<8x128xf32>
    %97 = arith.addf %96, %95 : vector<8x128xf32>
    %98 = arith.divf %96, %97 : vector<8x128xf32>
    %99 = vector.extract_strided_slice %90 {offsets = [0, 128], sizes = [8, 128], strides = [1, 1]} : vector<8x384xf32> to vector<8x128xf32>
    %100 = vector.extract_strided_slice %88 {offsets = [0, 128], sizes = [8, 128], strides = [1, 1]} : vector<8x384xf32> to vector<8x128xf32>
    %101 = arith.addf %99, %100 : vector<8x128xf32>
    %102 = arith.negf %101 : vector<8x128xf32>
    %103 = math.exp %102 : vector<8x128xf32>
    %cst_46 = arith.constant 1.000000e+00 : f32
    %104 = vector.broadcast %cst_46 : f32 to vector<8x128xf32>
    %105 = arith.addf %104, %103 : vector<8x128xf32>
    %106 = arith.divf %104, %105 : vector<8x128xf32>
    %107 = vector.extract_strided_slice %90 {offsets = [0, 256], sizes = [8, 128], strides = [1, 1]} : vector<8x384xf32> to vector<8x128xf32>
    %108 = vector.extract_strided_slice %88 {offsets = [0, 256], sizes = [8, 128], strides = [1, 1]} : vector<8x384xf32> to vector<8x128xf32>
    %c0_47 = arith.constant 0 : index
    %c0_48 = arith.constant 0 : index
    %109 = vector.load %arg5[%c0_47, %c0_48] : memref<1x128xf32, #tpu.memory_space<vmem>>, vector<1x128xf32>
    %110 = vector.broadcast %109 : vector<1x128xf32> to vector<8x128xf32>
    %111 = arith.addf %108, %110 : vector<8x128xf32>
    %112 = arith.mulf %98, %111 : vector<8x128xf32>
    %113 = arith.addf %107, %112 : vector<8x128xf32>
    %114 = math.tanh %113 : vector<8x128xf32>
    %115 = arith.subf %86, %114 : vector<8x128xf32>
    %116 = arith.mulf %106, %115 : vector<8x128xf32>
    %117 = arith.addf %114, %116 : vector<8x128xf32>
    %c0_49 = arith.constant 0 : index
    %c0_50 = arith.constant 0 : index
    %118 = vector.load %arg15[%c0_49, %c0_50] : memref<8x128xf32, #tpu.memory_space<vmem>>, vector<8x128xf32>
    tpu.vector_store %arg15[%c0_49, %c0_50], %117 {strides = array<i32>} : memref<8x128xf32, #tpu.memory_space<vmem>>, vector<8x128xf32>,
    %119 = arith.index_cast %85 : i32 to index
    %c0_51 = arith.constant 0 : index
    %120 = vector.load %arg14[%119, %c0_51] : memref<64x128xf32, #tpu.memory_space<vmem>>, vector<8x128xf32>
    tpu.vector_store %arg14[%119, %c0_51], %117 {strides = array<i32>} : memref<64x128xf32, #tpu.memory_space<vmem>>, vector<8x128xf32>,
    %c3_i32 = arith.constant 3 : i32
    %c8_i32_52 = arith.constant 8 : i32
    %121 = arith.muli %c3_i32, %c8_i32_52 : i32
    %122 = tpu.assume_multiple %121, 8 : i32
    %c0_53 = arith.constant 0 : index
    %c0_54 = arith.constant 0 : index
    %123 = vector.load %arg15[%c0_53, %c0_54] : memref<8x128xf32, #tpu.memory_space<vmem>>, vector<8x128xf32>
    %c0_55 = arith.constant 0 : index
    %c0_56 = arith.constant 0 : index
    %124 = vector.load %arg3[%c0_55, %c0_56] : memref<128x384xf32, #tpu.memory_space<vmem>>, vector<128x384xf32>
    %cst_57 = arith.constant dense<0.000000e+00> : vector<8x384xf32>
    %125 = tpu.matmul %123, %124, %cst_57 {dimension_numbers = #tpu.dot_dimension_numbers<[1], [0], [0], [1], [0, 0, 1, 1], [], []>} : vector<8x128xf32>, vector<128x384xf32>, vector<8x384xf32> -> vector<8x384xf32>
    %126 = arith.index_cast %122 : i32 to index
    %c0_58 = arith.constant 0 : index
    %127 = vector.load %arg13[%126, %c0_58] : memref<64x384xf32, #tpu.memory_space<vmem>>, vector<8x384xf32>
    %128 = vector.extract_strided_slice %127 {offsets = [0, 0], sizes = [8, 128], strides = [1, 1]} : vector<8x384xf32> to vector<8x128xf32>
    %129 = vector.extract_strided_slice %125 {offsets = [0, 0], sizes = [8, 128], strides = [1, 1]} : vector<8x384xf32> to vector<8x128xf32>
    %130 = arith.addf %128, %129 : vector<8x128xf32>
    %131 = arith.negf %130 : vector<8x128xf32>
    %132 = math.exp %131 : vector<8x128xf32>
    %cst_59 = arith.constant 1.000000e+00 : f32
    %133 = vector.broadcast %cst_59 : f32 to vector<8x128xf32>
    %134 = arith.addf %133, %132 : vector<8x128xf32>
    %135 = arith.divf %133, %134 : vector<8x128xf32>
    %136 = vector.extract_strided_slice %127 {offsets = [0, 128], sizes = [8, 128], strides = [1, 1]} : vector<8x384xf32> to vector<8x128xf32>
    %137 = vector.extract_strided_slice %125 {offsets = [0, 128], sizes = [8, 128], strides = [1, 1]} : vector<8x384xf32> to vector<8x128xf32>
    %138 = arith.addf %136, %137 : vector<8x128xf32>
    %139 = arith.negf %138 : vector<8x128xf32>
    %140 = math.exp %139 : vector<8x128xf32>
    %cst_60 = arith.constant 1.000000e+00 : f32
    %141 = vector.broadcast %cst_60 : f32 to vector<8x128xf32>
    %142 = arith.addf %141, %140 : vector<8x128xf32>
    %143 = arith.divf %141, %142 : vector<8x128xf32>
    %144 = vector.extract_strided_slice %127 {offsets = [0, 256], sizes = [8, 128], strides = [1, 1]} : vector<8x384xf32> to vector<8x128xf32>
    %145 = vector.extract_strided_slice %125 {offsets = [0, 256], sizes = [8, 128], strides = [1, 1]} : vector<8x384xf32> to vector<8x128xf32>
    %c0_61 = arith.constant 0 : index
    %c0_62 = arith.constant 0 : index
    %146 = vector.load %arg5[%c0_61, %c0_62] : memref<1x128xf32, #tpu.memory_space<vmem>>, vector<1x128xf32>
    %147 = vector.broadcast %146 : vector<1x128xf32> to vector<8x128xf32>
    %148 = arith.addf %145, %147 : vector<8x128xf32>
    %149 = arith.mulf %135, %148 : vector<8x128xf32>
    %150 = arith.addf %144, %149 : vector<8x128xf32>
    %151 = math.tanh %150 : vector<8x128xf32>
    %152 = arith.subf %123, %151 : vector<8x128xf32>
    %153 = arith.mulf %143, %152 : vector<8x128xf32>
    %154 = arith.addf %151, %153 : vector<8x128xf32>
    %c0_63 = arith.constant 0 : index
    %c0_64 = arith.constant 0 : index
    %155 = vector.load %arg15[%c0_63, %c0_64] : memref<8x128xf32, #tpu.memory_space<vmem>>, vector<8x128xf32>
    tpu.vector_store %arg15[%c0_63, %c0_64], %154 {strides = array<i32>} : memref<8x128xf32, #tpu.memory_space<vmem>>, vector<8x128xf32>,
    %156 = arith.index_cast %122 : i32 to index
    %c0_65 = arith.constant 0 : index
    %157 = vector.load %arg14[%156, %c0_65] : memref<64x128xf32, #tpu.memory_space<vmem>>, vector<8x128xf32>
    tpu.vector_store %arg14[%156, %c0_65], %154 {strides = array<i32>} : memref<64x128xf32, #tpu.memory_space<vmem>>, vector<8x128xf32>,
    %c4_i32 = arith.constant 4 : i32
    %c8_i32_66 = arith.constant 8 : i32
    %158 = arith.muli %c4_i32, %c8_i32_66 : i32
    %159 = tpu.assume_multiple %158, 8 : i32
    %c0_67 = arith.constant 0 : index
    %c0_68 = arith.constant 0 : index
    %160 = vector.load %arg15[%c0_67, %c0_68] : memref<8x128xf32, #tpu.memory_space<vmem>>, vector<8x128xf32>
    %c0_69 = arith.constant 0 : index
    %c0_70 = arith.constant 0 : index
    %161 = vector.load %arg3[%c0_69, %c0_70] : memref<128x384xf32, #tpu.memory_space<vmem>>, vector<128x384xf32>
    %cst_71 = arith.constant dense<0.000000e+00> : vector<8x384xf32>
    %162 = tpu.matmul %160, %161, %cst_71 {dimension_numbers = #tpu.dot_dimension_numbers<[1], [0], [0], [1], [0, 0, 1, 1], [], []>} : vector<8x128xf32>, vector<128x384xf32>, vector<8x384xf32> -> vector<8x384xf32>
    %163 = arith.index_cast %159 : i32 to index
    %c0_72 = arith.constant 0 : index
    %164 = vector.load %arg13[%163, %c0_72] : memref<64x384xf32, #tpu.memory_space<vmem>>, vector<8x384xf32>
    %165 = vector.extract_strided_slice %164 {offsets = [0, 0], sizes = [8, 128], strides = [1, 1]} : vector<8x384xf32> to vector<8x128xf32>
    %166 = vector.extract_strided_slice %162 {offsets = [0, 0], sizes = [8, 128], strides = [1, 1]} : vector<8x384xf32> to vector<8x128xf32>
    %167 = arith.addf %165, %166 : vector<8x128xf32>
    %168 = arith.negf %167 : vector<8x128xf32>
    %169 = math.exp %168 : vector<8x128xf32>
    %cst_73 = arith.constant 1.000000e+00 : f32
    %170 = vector.broadcast %cst_73 : f32 to vector<8x128xf32>
    %171 = arith.addf %170, %169 : vector<8x128xf32>
    %172 = arith.divf %170, %171 : vector<8x128xf32>
    %173 = vector.extract_strided_slice %164 {offsets = [0, 128], sizes = [8, 128], strides = [1, 1]} : vector<8x384xf32> to vector<8x128xf32>
    %174 = vector.extract_strided_slice %162 {offsets = [0, 128], sizes = [8, 128], strides = [1, 1]} : vector<8x384xf32> to vector<8x128xf32>
    %175 = arith.addf %173, %174 : vector<8x128xf32>
    %176 = arith.negf %175 : vector<8x128xf32>
    %177 = math.exp %176 : vector<8x128xf32>
    %cst_74 = arith.constant 1.000000e+00 : f32
    %178 = vector.broadcast %cst_74 : f32 to vector<8x128xf32>
    %179 = arith.addf %178, %177 : vector<8x128xf32>
    %180 = arith.divf %178, %179 : vector<8x128xf32>
    %181 = vector.extract_strided_slice %164 {offsets = [0, 256], sizes = [8, 128], strides = [1, 1]} : vector<8x384xf32> to vector<8x128xf32>
    %182 = vector.extract_strided_slice %162 {offsets = [0, 256], sizes = [8, 128], strides = [1, 1]} : vector<8x384xf32> to vector<8x128xf32>
    %c0_75 = arith.constant 0 : index
    %c0_76 = arith.constant 0 : index
    %183 = vector.load %arg5[%c0_75, %c0_76] : memref<1x128xf32, #tpu.memory_space<vmem>>, vector<1x128xf32>
    %184 = vector.broadcast %183 : vector<1x128xf32> to vector<8x128xf32>
    %185 = arith.addf %182, %184 : vector<8x128xf32>
    %186 = arith.mulf %172, %185 : vector<8x128xf32>
    %187 = arith.addf %181, %186 : vector<8x128xf32>
    %188 = math.tanh %187 : vector<8x128xf32>
    %189 = arith.subf %160, %188 : vector<8x128xf32>
    %190 = arith.mulf %180, %189 : vector<8x128xf32>
    %191 = arith.addf %188, %190 : vector<8x128xf32>
    %c0_77 = arith.constant 0 : index
    %c0_78 = arith.constant 0 : index
    %192 = vector.load %arg15[%c0_77, %c0_78] : memref<8x128xf32, #tpu.memory_space<vmem>>, vector<8x128xf32>
    tpu.vector_store %arg15[%c0_77, %c0_78], %191 {strides = array<i32>} : memref<8x128xf32, #tpu.memory_space<vmem>>, vector<8x128xf32>,
    %193 = arith.index_cast %159 : i32 to index
    %c0_79 = arith.constant 0 : index
    %194 = vector.load %arg14[%193, %c0_79] : memref<64x128xf32, #tpu.memory_space<vmem>>, vector<8x128xf32>
    tpu.vector_store %arg14[%193, %c0_79], %191 {strides = array<i32>} : memref<64x128xf32, #tpu.memory_space<vmem>>, vector<8x128xf32>,
    %c5_i32 = arith.constant 5 : i32
    %c8_i32_80 = arith.constant 8 : i32
    %195 = arith.muli %c5_i32, %c8_i32_80 : i32
    %196 = tpu.assume_multiple %195, 8 : i32
    %c0_81 = arith.constant 0 : index
    %c0_82 = arith.constant 0 : index
    %197 = vector.load %arg15[%c0_81, %c0_82] : memref<8x128xf32, #tpu.memory_space<vmem>>, vector<8x128xf32>
    %c0_83 = arith.constant 0 : index
    %c0_84 = arith.constant 0 : index
    %198 = vector.load %arg3[%c0_83, %c0_84] : memref<128x384xf32, #tpu.memory_space<vmem>>, vector<128x384xf32>
    %cst_85 = arith.constant dense<0.000000e+00> : vector<8x384xf32>
    %199 = tpu.matmul %197, %198, %cst_85 {dimension_numbers = #tpu.dot_dimension_numbers<[1], [0], [0], [1], [0, 0, 1, 1], [], []>} : vector<8x128xf32>, vector<128x384xf32>, vector<8x384xf32> -> vector<8x384xf32>
    %200 = arith.index_cast %196 : i32 to index
    %c0_86 = arith.constant 0 : index
    %201 = vector.load %arg13[%200, %c0_86] : memref<64x384xf32, #tpu.memory_space<vmem>>, vector<8x384xf32>
    %202 = vector.extract_strided_slice %201 {offsets = [0, 0], sizes = [8, 128], strides = [1, 1]} : vector<8x384xf32> to vector<8x128xf32>
    %203 = vector.extract_strided_slice %199 {offsets = [0, 0], sizes = [8, 128], strides = [1, 1]} : vector<8x384xf32> to vector<8x128xf32>
    %204 = arith.addf %202, %203 : vector<8x128xf32>
    %205 = arith.negf %204 : vector<8x128xf32>
    %206 = math.exp %205 : vector<8x128xf32>
    %cst_87 = arith.constant 1.000000e+00 : f32
    %207 = vector.broadcast %cst_87 : f32 to vector<8x128xf32>
    %208 = arith.addf %207, %206 : vector<8x128xf32>
    %209 = arith.divf %207, %208 : vector<8x128xf32>
    %210 = vector.extract_strided_slice %201 {offsets = [0, 128], sizes = [8, 128], strides = [1, 1]} : vector<8x384xf32> to vector<8x128xf32>
    %211 = vector.extract_strided_slice %199 {offsets = [0, 128], sizes = [8, 128], strides = [1, 1]} : vector<8x384xf32> to vector<8x128xf32>
    %212 = arith.addf %210, %211 : vector<8x128xf32>
    %213 = arith.negf %212 : vector<8x128xf32>
    %214 = math.exp %213 : vector<8x128xf32>
    %cst_88 = arith.constant 1.000000e+00 : f32
    %215 = vector.broadcast %cst_88 : f32 to vector<8x128xf32>
    %216 = arith.addf %215, %214 : vector<8x128xf32>
    %217 = arith.divf %215, %216 : vector<8x128xf32>
    %218 = vector.extract_strided_slice %201 {offsets = [0, 256], sizes = [8, 128], strides = [1, 1]} : vector<8x384xf32> to vector<8x128xf32>
    %219 = vector.extract_strided_slice %199 {offsets = [0, 256], sizes = [8, 128], strides = [1, 1]} : vector<8x384xf32> to vector<8x128xf32>
    %c0_89 = arith.constant 0 : index
    %c0_90 = arith.constant 0 : index
    %220 = vector.load %arg5[%c0_89, %c0_90] : memref<1x128xf32, #tpu.memory_space<vmem>>, vector<1x128xf32>
    %221 = vector.broadcast %220 : vector<1x128xf32> to vector<8x128xf32>
    %222 = arith.addf %219, %221 : vector<8x128xf32>
    %223 = arith.mulf %209, %222 : vector<8x128xf32>
    %224 = arith.addf %218, %223 : vector<8x128xf32>
    %225 = math.tanh %224 : vector<8x128xf32>
    %226 = arith.subf %197, %225 : vector<8x128xf32>
    %227 = arith.mulf %217, %226 : vector<8x128xf32>
    %228 = arith.addf %225, %227 : vector<8x128xf32>
    %c0_91 = arith.constant 0 : index
    %c0_92 = arith.constant 0 : index
    %229 = vector.load %arg15[%c0_91, %c0_92] : memref<8x128xf32, #tpu.memory_space<vmem>>, vector<8x128xf32>
    tpu.vector_store %arg15[%c0_91, %c0_92], %228 {strides = array<i32>} : memref<8x128xf32, #tpu.memory_space<vmem>>, vector<8x128xf32>,
    %230 = arith.index_cast %196 : i32 to index
    %c0_93 = arith.constant 0 : index
    %231 = vector.load %arg14[%230, %c0_93] : memref<64x128xf32, #tpu.memory_space<vmem>>, vector<8x128xf32>
    tpu.vector_store %arg14[%230, %c0_93], %228 {strides = array<i32>} : memref<64x128xf32, #tpu.memory_space<vmem>>, vector<8x128xf32>,
    %c6_i32 = arith.constant 6 : i32
    %c8_i32_94 = arith.constant 8 : i32
    %232 = arith.muli %c6_i32, %c8_i32_94 : i32
    %233 = tpu.assume_multiple %232, 8 : i32
    %c0_95 = arith.constant 0 : index
    %c0_96 = arith.constant 0 : index
    %234 = vector.load %arg15[%c0_95, %c0_96] : memref<8x128xf32, #tpu.memory_space<vmem>>, vector<8x128xf32>
    %c0_97 = arith.constant 0 : index
    %c0_98 = arith.constant 0 : index
    %235 = vector.load %arg3[%c0_97, %c0_98] : memref<128x384xf32, #tpu.memory_space<vmem>>, vector<128x384xf32>
    %cst_99 = arith.constant dense<0.000000e+00> : vector<8x384xf32>
    %236 = tpu.matmul %234, %235, %cst_99 {dimension_numbers = #tpu.dot_dimension_numbers<[1], [0], [0], [1], [0, 0, 1, 1], [], []>} : vector<8x128xf32>, vector<128x384xf32>, vector<8x384xf32> -> vector<8x384xf32>
    %237 = arith.index_cast %233 : i32 to index
    %c0_100 = arith.constant 0 : index
    %238 = vector.load %arg13[%237, %c0_100] : memref<64x384xf32, #tpu.memory_space<vmem>>, vector<8x384xf32>
    %239 = vector.extract_strided_slice %238 {offsets = [0, 0], sizes = [8, 128], strides = [1, 1]} : vector<8x384xf32> to vector<8x128xf32>
    %240 = vector.extract_strided_slice %236 {offsets = [0, 0], sizes = [8, 128], strides = [1, 1]} : vector<8x384xf32> to vector<8x128xf32>
    %241 = arith.addf %239, %240 : vector<8x128xf32>
    %242 = arith.negf %241 : vector<8x128xf32>
    %243 = math.exp %242 : vector<8x128xf32>
    %cst_101 = arith.constant 1.000000e+00 : f32
    %244 = vector.broadcast %cst_101 : f32 to vector<8x128xf32>
    %245 = arith.addf %244, %243 : vector<8x128xf32>
    %246 = arith.divf %244, %245 : vector<8x128xf32>
    %247 = vector.extract_strided_slice %238 {offsets = [0, 128], sizes = [8, 128], strides = [1, 1]} : vector<8x384xf32> to vector<8x128xf32>
    %248 = vector.extract_strided_slice %236 {offsets = [0, 128], sizes = [8, 128], strides = [1, 1]} : vector<8x384xf32> to vector<8x128xf32>
    %249 = arith.addf %247, %248 : vector<8x128xf32>
    %250 = arith.negf %249 : vector<8x128xf32>
    %251 = math.exp %250 : vector<8x128xf32>
    %cst_102 = arith.constant 1.000000e+00 : f32
    %252 = vector.broadcast %cst_102 : f32 to vector<8x128xf32>
    %253 = arith.addf %252, %251 : vector<8x128xf32>
    %254 = arith.divf %252, %253 : vector<8x128xf32>
    %255 = vector.extract_strided_slice %238 {offsets = [0, 256], sizes = [8, 128], strides = [1, 1]} : vector<8x384xf32> to vector<8x128xf32>
    %256 = vector.extract_strided_slice %236 {offsets = [0, 256], sizes = [8, 128], strides = [1, 1]} : vector<8x384xf32> to vector<8x128xf32>
    %c0_103 = arith.constant 0 : index
    %c0_104 = arith.constant 0 : index
    %257 = vector.load %arg5[%c0_103, %c0_104] : memref<1x128xf32, #tpu.memory_space<vmem>>, vector<1x128xf32>
    %258 = vector.broadcast %257 : vector<1x128xf32> to vector<8x128xf32>
    %259 = arith.addf %256, %258 : vector<8x128xf32>
    %260 = arith.mulf %246, %259 : vector<8x128xf32>
    %261 = arith.addf %255, %260 : vector<8x128xf32>
    %262 = math.tanh %261 : vector<8x128xf32>
    %263 = arith.subf %234, %262 : vector<8x128xf32>
    %264 = arith.mulf %254, %263 : vector<8x128xf32>
    %265 = arith.addf %262, %264 : vector<8x128xf32>
    %c0_105 = arith.constant 0 : index
    %c0_106 = arith.constant 0 : index
    %266 = vector.load %arg15[%c0_105, %c0_106] : memref<8x128xf32, #tpu.memory_space<vmem>>, vector<8x128xf32>
    tpu.vector_store %arg15[%c0_105, %c0_106], %265 {strides = array<i32>} : memref<8x128xf32, #tpu.memory_space<vmem>>, vector<8x128xf32>,
    %267 = arith.index_cast %233 : i32 to index
    %c0_107 = arith.constant 0 : index
    %268 = vector.load %arg14[%267, %c0_107] : memref<64x128xf32, #tpu.memory_space<vmem>>, vector<8x128xf32>
    tpu.vector_store %arg14[%267, %c0_107], %265 {strides = array<i32>} : memref<64x128xf32, #tpu.memory_space<vmem>>, vector<8x128xf32>,
    %c7_i32 = arith.constant 7 : i32
    %c8_i32_108 = arith.constant 8 : i32
    %269 = arith.muli %c7_i32, %c8_i32_108 : i32
    %270 = tpu.assume_multiple %269, 8 : i32
    %c0_109 = arith.constant 0 : index
    %c0_110 = arith.constant 0 : index
    %271 = vector.load %arg15[%c0_109, %c0_110] : memref<8x128xf32, #tpu.memory_space<vmem>>, vector<8x128xf32>
    %c0_111 = arith.constant 0 : index
    %c0_112 = arith.constant 0 : index
    %272 = vector.load %arg3[%c0_111, %c0_112] : memref<128x384xf32, #tpu.memory_space<vmem>>, vector<128x384xf32>
    %cst_113 = arith.constant dense<0.000000e+00> : vector<8x384xf32>
    %273 = tpu.matmul %271, %272, %cst_113 {dimension_numbers = #tpu.dot_dimension_numbers<[1], [0], [0], [1], [0, 0, 1, 1], [], []>} : vector<8x128xf32>, vector<128x384xf32>, vector<8x384xf32> -> vector<8x384xf32>
    %274 = arith.index_cast %270 : i32 to index
    %c0_114 = arith.constant 0 : index
    %275 = vector.load %arg13[%274, %c0_114] : memref<64x384xf32, #tpu.memory_space<vmem>>, vector<8x384xf32>
    %276 = vector.extract_strided_slice %275 {offsets = [0, 0], sizes = [8, 128], strides = [1, 1]} : vector<8x384xf32> to vector<8x128xf32>
    %277 = vector.extract_strided_slice %273 {offsets = [0, 0], sizes = [8, 128], strides = [1, 1]} : vector<8x384xf32> to vector<8x128xf32>
    %278 = arith.addf %276, %277 : vector<8x128xf32>
    %279 = arith.negf %278 : vector<8x128xf32>
    %280 = math.exp %279 : vector<8x128xf32>
    %cst_115 = arith.constant 1.000000e+00 : f32
    %281 = vector.broadcast %cst_115 : f32 to vector<8x128xf32>
    %282 = arith.addf %281, %280 : vector<8x128xf32>
    %283 = arith.divf %281, %282 : vector<8x128xf32>
    %284 = vector.extract_strided_slice %275 {offsets = [0, 128], sizes = [8, 128], strides = [1, 1]} : vector<8x384xf32> to vector<8x128xf32>
    %285 = vector.extract_strided_slice %273 {offsets = [0, 128], sizes = [8, 128], strides = [1, 1]} : vector<8x384xf32> to vector<8x128xf32>
    %286 = arith.addf %284, %285 : vector<8x128xf32>
    %287 = arith.negf %286 : vector<8x128xf32>
    %288 = math.exp %287 : vector<8x128xf32>
    %cst_116 = arith.constant 1.000000e+00 : f32
    %289 = vector.broadcast %cst_116 : f32 to vector<8x128xf32>
    %290 = arith.addf %289, %288 : vector<8x128xf32>
    %291 = arith.divf %289, %290 : vector<8x128xf32>
    %292 = vector.extract_strided_slice %275 {offsets = [0, 256], sizes = [8, 128], strides = [1, 1]} : vector<8x384xf32> to vector<8x128xf32>
    %293 = vector.extract_strided_slice %273 {offsets = [0, 256], sizes = [8, 128], strides = [1, 1]} : vector<8x384xf32> to vector<8x128xf32>
    %c0_117 = arith.constant 0 : index
    %c0_118 = arith.constant 0 : index
    %294 = vector.load %arg5[%c0_117, %c0_118] : memref<1x128xf32, #tpu.memory_space<vmem>>, vector<1x128xf32>
    %295 = vector.broadcast %294 : vector<1x128xf32> to vector<8x128xf32>
    %296 = arith.addf %293, %295 : vector<8x128xf32>
    %297 = arith.mulf %283, %296 : vector<8x128xf32>
    %298 = arith.addf %292, %297 : vector<8x128xf32>
    %299 = math.tanh %298 : vector<8x128xf32>
    %300 = arith.subf %271, %299 : vector<8x128xf32>
    %301 = arith.mulf %291, %300 : vector<8x128xf32>
    %302 = arith.addf %299, %301 : vector<8x128xf32>
    %c0_119 = arith.constant 0 : index
    %c0_120 = arith.constant 0 : index
    %303 = vector.load %arg15[%c0_119, %c0_120] : memref<8x128xf32, #tpu.memory_space<vmem>>, vector<8x128xf32>
    tpu.vector_store %arg15[%c0_119, %c0_120], %302 {strides = array<i32>} : memref<8x128xf32, #tpu.memory_space<vmem>>, vector<8x128xf32>,
    %304 = arith.index_cast %270 : i32 to index
    %c0_121 = arith.constant 0 : index
    %305 = vector.load %arg14[%304, %c0_121] : memref<64x128xf32, #tpu.memory_space<vmem>>, vector<8x128xf32>
    tpu.vector_store %arg14[%304, %c0_121], %302 {strides = array<i32>} : memref<64x128xf32, #tpu.memory_space<vmem>>, vector<8x128xf32>,
    %c8_i32_122 = arith.constant 8 : i32
    %c0_123 = arith.constant 0 : index
    %c0_124 = arith.constant 0 : index
    %306 = vector.load %arg14[%c0_123, %c0_124] : memref<64x128xf32, #tpu.memory_space<vmem>>, vector<64x128xf32>
    %c0_125 = arith.constant 0 : index
    %c0_126 = arith.constant 0 : index
    %307 = vector.load %arg6[%c0_125, %c0_126] : memref<128x384xf32, #tpu.memory_space<vmem>>, vector<128x384xf32>
    %cst_127 = arith.constant dense<0.000000e+00> : vector<64x384xf32>
    %308 = tpu.matmul %306, %307, %cst_127 {dimension_numbers = #tpu.dot_dimension_numbers<[1], [0], [0], [1], [0, 0, 1, 1], [], []>} : vector<64x128xf32>, vector<128x384xf32>, vector<64x384xf32> -> vector<64x384xf32>
    %c0_128 = arith.constant 0 : index
    %c0_129 = arith.constant 0 : index
    %309 = vector.load %arg8[%c0_128, %c0_129] : memref<1x384xf32, #tpu.memory_space<vmem>>, vector<1x384xf32>
    %310 = vector.broadcast %309 : vector<1x384xf32> to vector<64x384xf32>
    %311 = arith.addf %308, %310 : vector<64x384xf32>
    %c0_130 = arith.constant 0 : index
    %c0_131 = arith.constant 0 : index
    %312 = vector.load %arg13[%c0_130, %c0_131] : memref<64x384xf32, #tpu.memory_space<vmem>>, vector<64x384xf32>
    tpu.vector_store %arg13[%c0_130, %c0_131], %311 {strides = array<i32>} : memref<64x384xf32, #tpu.memory_space<vmem>>, vector<64x384xf32>,
    %cst_132 = arith.constant 0.000000e+00 : f32
    %313 = vector.broadcast %cst_132 : f32 to vector<8x128xf32>
    %c0_133 = arith.constant 0 : index
    %c0_134 = arith.constant 0 : index
    %314 = vector.load %arg15[%c0_133, %c0_134] : memref<8x128xf32, #tpu.memory_space<vmem>>, vector<8x128xf32>
    tpu.vector_store %arg15[%c0_133, %c0_134], %313 {strides = array<i32>} : memref<8x128xf32, #tpu.memory_space<vmem>>, vector<8x128xf32>,
    %c0_i32_135 = arith.constant 0 : i32
    %c8_i32_136 = arith.constant 8 : i32
    %315 = arith.muli %c0_i32_135, %c8_i32_136 : i32
    %316 = tpu.assume_multiple %315, 8 : i32
    %c0_137 = arith.constant 0 : index
    %c0_138 = arith.constant 0 : index
    %317 = vector.load %arg15[%c0_137, %c0_138] : memref<8x128xf32, #tpu.memory_space<vmem>>, vector<8x128xf32>
    %c0_139 = arith.constant 0 : index
    %c0_140 = arith.constant 0 : index
    %318 = vector.load %arg7[%c0_139, %c0_140] : memref<128x384xf32, #tpu.memory_space<vmem>>, vector<128x384xf32>
    %cst_141 = arith.constant dense<0.000000e+00> : vector<8x384xf32>
    %319 = tpu.matmul %317, %318, %cst_141 {dimension_numbers = #tpu.dot_dimension_numbers<[1], [0], [0], [1], [0, 0, 1, 1], [], []>} : vector<8x128xf32>, vector<128x384xf32>, vector<8x384xf32> -> vector<8x384xf32>
    %320 = arith.index_cast %316 : i32 to index
    %c0_142 = arith.constant 0 : index
    %321 = vector.load %arg13[%320, %c0_142] : memref<64x384xf32, #tpu.memory_space<vmem>>, vector<8x384xf32>
    %322 = vector.extract_strided_slice %321 {offsets = [0, 0], sizes = [8, 128], strides = [1, 1]} : vector<8x384xf32> to vector<8x128xf32>
    %323 = vector.extract_strided_slice %319 {offsets = [0, 0], sizes = [8, 128], strides = [1, 1]} : vector<8x384xf32> to vector<8x128xf32>
    %324 = arith.addf %322, %323 : vector<8x128xf32>
    %325 = arith.negf %324 : vector<8x128xf32>
    %326 = math.exp %325 : vector<8x128xf32>
    %cst_143 = arith.constant 1.000000e+00 : f32
    %327 = vector.broadcast %cst_143 : f32 to vector<8x128xf32>
    %328 = arith.addf %327, %326 : vector<8x128xf32>
    %329 = arith.divf %327, %328 : vector<8x128xf32>
    %330 = vector.extract_strided_slice %321 {offsets = [0, 128], sizes = [8, 128], strides = [1, 1]} : vector<8x384xf32> to vector<8x128xf32>
    %331 = vector.extract_strided_slice %319 {offsets = [0, 128], sizes = [8, 128], strides = [1, 1]} : vector<8x384xf32> to vector<8x128xf32>
    %332 = arith.addf %330, %331 : vector<8x128xf32>
    %333 = arith.negf %332 : vector<8x128xf32>
    %334 = math.exp %333 : vector<8x128xf32>
    %cst_144 = arith.constant 1.000000e+00 : f32
    %335 = vector.broadcast %cst_144 : f32 to vector<8x128xf32>
    %336 = arith.addf %335, %334 : vector<8x128xf32>
    %337 = arith.divf %335, %336 : vector<8x128xf32>
    %338 = vector.extract_strided_slice %321 {offsets = [0, 256], sizes = [8, 128], strides = [1, 1]} : vector<8x384xf32> to vector<8x128xf32>
    %339 = vector.extract_strided_slice %319 {offsets = [0, 256], sizes = [8, 128], strides = [1, 1]} : vector<8x384xf32> to vector<8x128xf32>
    %c0_145 = arith.constant 0 : index
    %c0_146 = arith.constant 0 : index
    %340 = vector.load %arg9[%c0_145, %c0_146] : memref<1x128xf32, #tpu.memory_space<vmem>>, vector<1x128xf32>
    %341 = vector.broadcast %340 : vector<1x128xf32> to vector<8x128xf32>
    %342 = arith.addf %339, %341 : vector<8x128xf32>
    %343 = arith.mulf %329, %342 : vector<8x128xf32>
    %344 = arith.addf %338, %343 : vector<8x128xf32>
    %345 = math.tanh %344 : vector<8x128xf32>
    %346 = arith.subf %317, %345 : vector<8x128xf32>
    %347 = arith.mulf %337, %346 : vector<8x128xf32>
    %348 = arith.addf %345, %347 : vector<8x128xf32>
    %c0_147 = arith.constant 0 : index
    %c0_148 = arith.constant 0 : index
    %349 = vector.load %arg15[%c0_147, %c0_148] : memref<8x128xf32, #tpu.memory_space<vmem>>, vector<8x128xf32>
    tpu.vector_store %arg15[%c0_147, %c0_148], %348 {strides = array<i32>} : memref<8x128xf32, #tpu.memory_space<vmem>>, vector<8x128xf32>,
    %c1_i32_149 = arith.constant 1 : i32
    %c8_i32_150 = arith.constant 8 : i32
    %350 = arith.muli %c1_i32_149, %c8_i32_150 : i32
    %351 = tpu.assume_multiple %350, 8 : i32
    %c0_151 = arith.constant 0 : index
    %c0_152 = arith.constant 0 : index
    %352 = vector.load %arg15[%c0_151, %c0_152] : memref<8x128xf32, #tpu.memory_space<vmem>>, vector<8x128xf32>
    %c0_153 = arith.constant 0 : index
    %c0_154 = arith.constant 0 : index
    %353 = vector.load %arg7[%c0_153, %c0_154] : memref<128x384xf32, #tpu.memory_space<vmem>>, vector<128x384xf32>
    %cst_155 = arith.constant dense<0.000000e+00> : vector<8x384xf32>
    %354 = tpu.matmul %352, %353, %cst_155 {dimension_numbers = #tpu.dot_dimension_numbers<[1], [0], [0], [1], [0, 0, 1, 1], [], []>} : vector<8x128xf32>, vector<128x384xf32>, vector<8x384xf32> -> vector<8x384xf32>
    %355 = arith.index_cast %351 : i32 to index
    %c0_156 = arith.constant 0 : index
    %356 = vector.load %arg13[%355, %c0_156] : memref<64x384xf32, #tpu.memory_space<vmem>>, vector<8x384xf32>
    %357 = vector.extract_strided_slice %356 {offsets = [0, 0], sizes = [8, 128], strides = [1, 1]} : vector<8x384xf32> to vector<8x128xf32>
    %358 = vector.extract_strided_slice %354 {offsets = [0, 0], sizes = [8, 128], strides = [1, 1]} : vector<8x384xf32> to vector<8x128xf32>
    %359 = arith.addf %357, %358 : vector<8x128xf32>
    %360 = arith.negf %359 : vector<8x128xf32>
    %361 = math.exp %360 : vector<8x128xf32>
    %cst_157 = arith.constant 1.000000e+00 : f32
    %362 = vector.broadcast %cst_157 : f32 to vector<8x128xf32>
    %363 = arith.addf %362, %361 : vector<8x128xf32>
    %364 = arith.divf %362, %363 : vector<8x128xf32>
    %365 = vector.extract_strided_slice %356 {offsets = [0, 128], sizes = [8, 128], strides = [1, 1]} : vector<8x384xf32> to vector<8x128xf32>
    %366 = vector.extract_strided_slice %354 {offsets = [0, 128], sizes = [8, 128], strides = [1, 1]} : vector<8x384xf32> to vector<8x128xf32>
    %367 = arith.addf %365, %366 : vector<8x128xf32>
    %368 = arith.negf %367 : vector<8x128xf32>
    %369 = math.exp %368 : vector<8x128xf32>
    %cst_158 = arith.constant 1.000000e+00 : f32
    %370 = vector.broadcast %cst_158 : f32 to vector<8x128xf32>
    %371 = arith.addf %370, %369 : vector<8x128xf32>
    %372 = arith.divf %370, %371 : vector<8x128xf32>
    %373 = vector.extract_strided_slice %356 {offsets = [0, 256], sizes = [8, 128], strides = [1, 1]} : vector<8x384xf32> to vector<8x128xf32>
    %374 = vector.extract_strided_slice %354 {offsets = [0, 256], sizes = [8, 128], strides = [1, 1]} : vector<8x384xf32> to vector<8x128xf32>
    %c0_159 = arith.constant 0 : index
    %c0_160 = arith.constant 0 : index
    %375 = vector.load %arg9[%c0_159, %c0_160] : memref<1x128xf32, #tpu.memory_space<vmem>>, vector<1x128xf32>
    %376 = vector.broadcast %375 : vector<1x128xf32> to vector<8x128xf32>
    %377 = arith.addf %374, %376 : vector<8x128xf32>
    %378 = arith.mulf %364, %377 : vector<8x128xf32>
    %379 = arith.addf %373, %378 : vector<8x128xf32>
    %380 = math.tanh %379 : vector<8x128xf32>
    %381 = arith.subf %352, %380 : vector<8x128xf32>
    %382 = arith.mulf %372, %381 : vector<8x128xf32>
    %383 = arith.addf %380, %382 : vector<8x128xf32>
    %c0_161 = arith.constant 0 : index
    %c0_162 = arith.constant 0 : index
    %384 = vector.load %arg15[%c0_161, %c0_162] : memref<8x128xf32, #tpu.memory_space<vmem>>, vector<8x128xf32>
    tpu.vector_store %arg15[%c0_161, %c0_162], %383 {strides = array<i32>} : memref<8x128xf32, #tpu.memory_space<vmem>>, vector<8x128xf32>,
    %c2_i32_163 = arith.constant 2 : i32
    %c8_i32_164 = arith.constant 8 : i32
    %385 = arith.muli %c2_i32_163, %c8_i32_164 : i32
    %386 = tpu.assume_multiple %385, 8 : i32
    %c0_165 = arith.constant 0 : index
    %c0_166 = arith.constant 0 : index
    %387 = vector.load %arg15[%c0_165, %c0_166] : memref<8x128xf32, #tpu.memory_space<vmem>>, vector<8x128xf32>
    %c0_167 = arith.constant 0 : index
    %c0_168 = arith.constant 0 : index
    %388 = vector.load %arg7[%c0_167, %c0_168] : memref<128x384xf32, #tpu.memory_space<vmem>>, vector<128x384xf32>
    %cst_169 = arith.constant dense<0.000000e+00> : vector<8x384xf32>
    %389 = tpu.matmul %387, %388, %cst_169 {dimension_numbers = #tpu.dot_dimension_numbers<[1], [0], [0], [1], [0, 0, 1, 1], [], []>} : vector<8x128xf32>, vector<128x384xf32>, vector<8x384xf32> -> vector<8x384xf32>
    %390 = arith.index_cast %386 : i32 to index
    %c0_170 = arith.constant 0 : index
    %391 = vector.load %arg13[%390, %c0_170] : memref<64x384xf32, #tpu.memory_space<vmem>>, vector<8x384xf32>
    %392 = vector.extract_strided_slice %391 {offsets = [0, 0], sizes = [8, 128], strides = [1, 1]} : vector<8x384xf32> to vector<8x128xf32>
    %393 = vector.extract_strided_slice %389 {offsets = [0, 0], sizes = [8, 128], strides = [1, 1]} : vector<8x384xf32> to vector<8x128xf32>
    %394 = arith.addf %392, %393 : vector<8x128xf32>
    %395 = arith.negf %394 : vector<8x128xf32>
    %396 = math.exp %395 : vector<8x128xf32>
    %cst_171 = arith.constant 1.000000e+00 : f32
    %397 = vector.broadcast %cst_171 : f32 to vector<8x128xf32>
    %398 = arith.addf %397, %396 : vector<8x128xf32>
    %399 = arith.divf %397, %398 : vector<8x128xf32>
    %400 = vector.extract_strided_slice %391 {offsets = [0, 128], sizes = [8, 128], strides = [1, 1]} : vector<8x384xf32> to vector<8x128xf32>
    %401 = vector.extract_strided_slice %389 {offsets = [0, 128], sizes = [8, 128], strides = [1, 1]} : vector<8x384xf32> to vector<8x128xf32>
    %402 = arith.addf %400, %401 : vector<8x128xf32>
    %403 = arith.negf %402 : vector<8x128xf32>
    %404 = math.exp %403 : vector<8x128xf32>
    %cst_172 = arith.constant 1.000000e+00 : f32
    %405 = vector.broadcast %cst_172 : f32 to vector<8x128xf32>
    %406 = arith.addf %405, %404 : vector<8x128xf32>
    %407 = arith.divf %405, %406 : vector<8x128xf32>
    %408 = vector.extract_strided_slice %391 {offsets = [0, 256], sizes = [8, 128], strides = [1, 1]} : vector<8x384xf32> to vector<8x128xf32>
    %409 = vector.extract_strided_slice %389 {offsets = [0, 256], sizes = [8, 128], strides = [1, 1]} : vector<8x384xf32> to vector<8x128xf32>
    %c0_173 = arith.constant 0 : index
    %c0_174 = arith.constant 0 : index
    %410 = vector.load %arg9[%c0_173, %c0_174] : memref<1x128xf32, #tpu.memory_space<vmem>>, vector<1x128xf32>
    %411 = vector.broadcast %410 : vector<1x128xf32> to vector<8x128xf32>
    %412 = arith.addf %409, %411 : vector<8x128xf32>
    %413 = arith.mulf %399, %412 : vector<8x128xf32>
    %414 = arith.addf %408, %413 : vector<8x128xf32>
    %415 = math.tanh %414 : vector<8x128xf32>
    %416 = arith.subf %387, %415 : vector<8x128xf32>
    %417 = arith.mulf %407, %416 : vector<8x128xf32>
    %418 = arith.addf %415, %417 : vector<8x128xf32>
    %c0_175 = arith.constant 0 : index
    %c0_176 = arith.constant 0 : index
    %419 = vector.load %arg15[%c0_175, %c0_176] : memref<8x128xf32, #tpu.memory_space<vmem>>, vector<8x128xf32>
    tpu.vector_store %arg15[%c0_175, %c0_176], %418 {strides = array<i32>} : memref<8x128xf32, #tpu.memory_space<vmem>>, vector<8x128xf32>,
    %c3_i32_177 = arith.constant 3 : i32
    %c8_i32_178 = arith.constant 8 : i32
    %420 = arith.muli %c3_i32_177, %c8_i32_178 : i32
    %421 = tpu.assume_multiple %420, 8 : i32
    %c0_179 = arith.constant 0 : index
    %c0_180 = arith.constant 0 : index
    %422 = vector.load %arg15[%c0_179, %c0_180] : memref<8x128xf32, #tpu.memory_space<vmem>>, vector<8x128xf32>
    %c0_181 = arith.constant 0 : index
    %c0_182 = arith.constant 0 : index
    %423 = vector.load %arg7[%c0_181, %c0_182] : memref<128x384xf32, #tpu.memory_space<vmem>>, vector<128x384xf32>
    %cst_183 = arith.constant dense<0.000000e+00> : vector<8x384xf32>
    %424 = tpu.matmul %422, %423, %cst_183 {dimension_numbers = #tpu.dot_dimension_numbers<[1], [0], [0], [1], [0, 0, 1, 1], [], []>} : vector<8x128xf32>, vector<128x384xf32>, vector<8x384xf32> -> vector<8x384xf32>
    %425 = arith.index_cast %421 : i32 to index
    %c0_184 = arith.constant 0 : index
    %426 = vector.load %arg13[%425, %c0_184] : memref<64x384xf32, #tpu.memory_space<vmem>>, vector<8x384xf32>
    %427 = vector.extract_strided_slice %426 {offsets = [0, 0], sizes = [8, 128], strides = [1, 1]} : vector<8x384xf32> to vector<8x128xf32>
    %428 = vector.extract_strided_slice %424 {offsets = [0, 0], sizes = [8, 128], strides = [1, 1]} : vector<8x384xf32> to vector<8x128xf32>
    %429 = arith.addf %427, %428 : vector<8x128xf32>
    %430 = arith.negf %429 : vector<8x128xf32>
    %431 = math.exp %430 : vector<8x128xf32>
    %cst_185 = arith.constant 1.000000e+00 : f32
    %432 = vector.broadcast %cst_185 : f32 to vector<8x128xf32>
    %433 = arith.addf %432, %431 : vector<8x128xf32>
    %434 = arith.divf %432, %433 : vector<8x128xf32>
    %435 = vector.extract_strided_slice %426 {offsets = [0, 128], sizes = [8, 128], strides = [1, 1]} : vector<8x384xf32> to vector<8x128xf32>
    %436 = vector.extract_strided_slice %424 {offsets = [0, 128], sizes = [8, 128], strides = [1, 1]} : vector<8x384xf32> to vector<8x128xf32>
    %437 = arith.addf %435, %436 : vector<8x128xf32>
    %438 = arith.negf %437 : vector<8x128xf32>
    %439 = math.exp %438 : vector<8x128xf32>
    %cst_186 = arith.constant 1.000000e+00 : f32
    %440 = vector.broadcast %cst_186 : f32 to vector<8x128xf32>
    %441 = arith.addf %440, %439 : vector<8x128xf32>
    %442 = arith.divf %440, %441 : vector<8x128xf32>
    %443 = vector.extract_strided_slice %426 {offsets = [0, 256], sizes = [8, 128], strides = [1, 1]} : vector<8x384xf32> to vector<8x128xf32>
    %444 = vector.extract_strided_slice %424 {offsets = [0, 256], sizes = [8, 128], strides = [1, 1]} : vector<8x384xf32> to vector<8x128xf32>
    %c0_187 = arith.constant 0 : index
    %c0_188 = arith.constant 0 : index
    %445 = vector.load %arg9[%c0_187, %c0_188] : memref<1x128xf32, #tpu.memory_space<vmem>>, vector<1x128xf32>
    %446 = vector.broadcast %445 : vector<1x128xf32> to vector<8x128xf32>
    %447 = arith.addf %444, %446 : vector<8x128xf32>
    %448 = arith.mulf %434, %447 : vector<8x128xf32>
    %449 = arith.addf %443, %448 : vector<8x128xf32>
    %450 = math.tanh %449 : vector<8x128xf32>
    %451 = arith.subf %422, %450 : vector<8x128xf32>
    %452 = arith.mulf %442, %451 : vector<8x128xf32>
    %453 = arith.addf %450, %452 : vector<8x128xf32>
    %c0_189 = arith.constant 0 : index
    %c0_190 = arith.constant 0 : index
    %454 = vector.load %arg15[%c0_189, %c0_190] : memref<8x128xf32, #tpu.memory_space<vmem>>, vector<8x128xf32>
    tpu.vector_store %arg15[%c0_189, %c0_190], %453 {strides = array<i32>} : memref<8x128xf32, #tpu.memory_space<vmem>>, vector<8x128xf32>,
    %c4_i32_191 = arith.constant 4 : i32
    %c8_i32_192 = arith.constant 8 : i32
    %455 = arith.muli %c4_i32_191, %c8_i32_192 : i32
    %456 = tpu.assume_multiple %455, 8 : i32
    %c0_193 = arith.constant 0 : index
    %c0_194 = arith.constant 0 : index
    %457 = vector.load %arg15[%c0_193, %c0_194] : memref<8x128xf32, #tpu.memory_space<vmem>>, vector<8x128xf32>
    %c0_195 = arith.constant 0 : index
    %c0_196 = arith.constant 0 : index
    %458 = vector.load %arg7[%c0_195, %c0_196] : memref<128x384xf32, #tpu.memory_space<vmem>>, vector<128x384xf32>
    %cst_197 = arith.constant dense<0.000000e+00> : vector<8x384xf32>
    %459 = tpu.matmul %457, %458, %cst_197 {dimension_numbers = #tpu.dot_dimension_numbers<[1], [0], [0], [1], [0, 0, 1, 1], [], []>} : vector<8x128xf32>, vector<128x384xf32>, vector<8x384xf32> -> vector<8x384xf32>
    %460 = arith.index_cast %456 : i32 to index
    %c0_198 = arith.constant 0 : index
    %461 = vector.load %arg13[%460, %c0_198] : memref<64x384xf32, #tpu.memory_space<vmem>>, vector<8x384xf32>
    %462 = vector.extract_strided_slice %461 {offsets = [0, 0], sizes = [8, 128], strides = [1, 1]} : vector<8x384xf32> to vector<8x128xf32>
    %463 = vector.extract_strided_slice %459 {offsets = [0, 0], sizes = [8, 128], strides = [1, 1]} : vector<8x384xf32> to vector<8x128xf32>
    %464 = arith.addf %462, %463 : vector<8x128xf32>
    %465 = arith.negf %464 : vector<8x128xf32>
    %466 = math.exp %465 : vector<8x128xf32>
    %cst_199 = arith.constant 1.000000e+00 : f32
    %467 = vector.broadcast %cst_199 : f32 to vector<8x128xf32>
    %468 = arith.addf %467, %466 : vector<8x128xf32>
    %469 = arith.divf %467, %468 : vector<8x128xf32>
    %470 = vector.extract_strided_slice %461 {offsets = [0, 128], sizes = [8, 128], strides = [1, 1]} : vector<8x384xf32> to vector<8x128xf32>
    %471 = vector.extract_strided_slice %459 {offsets = [0, 128], sizes = [8, 128], strides = [1, 1]} : vector<8x384xf32> to vector<8x128xf32>
    %472 = arith.addf %470, %471 : vector<8x128xf32>
    %473 = arith.negf %472 : vector<8x128xf32>
    %474 = math.exp %473 : vector<8x128xf32>
    %cst_200 = arith.constant 1.000000e+00 : f32
    %475 = vector.broadcast %cst_200 : f32 to vector<8x128xf32>
    %476 = arith.addf %475, %474 : vector<8x128xf32>
    %477 = arith.divf %475, %476 : vector<8x128xf32>
    %478 = vector.extract_strided_slice %461 {offsets = [0, 256], sizes = [8, 128], strides = [1, 1]} : vector<8x384xf32> to vector<8x128xf32>
    %479 = vector.extract_strided_slice %459 {offsets = [0, 256], sizes = [8, 128], strides = [1, 1]} : vector<8x384xf32> to vector<8x128xf32>
    %c0_201 = arith.constant 0 : index
    %c0_202 = arith.constant 0 : index
    %480 = vector.load %arg9[%c0_201, %c0_202] : memref<1x128xf32, #tpu.memory_space<vmem>>, vector<1x128xf32>
    %481 = vector.broadcast %480 : vector<1x128xf32> to vector<8x128xf32>
    %482 = arith.addf %479, %481 : vector<8x128xf32>
    %483 = arith.mulf %469, %482 : vector<8x128xf32>
    %484 = arith.addf %478, %483 : vector<8x128xf32>
    %485 = math.tanh %484 : vector<8x128xf32>
    %486 = arith.subf %457, %485 : vector<8x128xf32>
    %487 = arith.mulf %477, %486 : vector<8x128xf32>
    %488 = arith.addf %485, %487 : vector<8x128xf32>
    %c0_203 = arith.constant 0 : index
    %c0_204 = arith.constant 0 : index
    %489 = vector.load %arg15[%c0_203, %c0_204] : memref<8x128xf32, #tpu.memory_space<vmem>>, vector<8x128xf32>
    tpu.vector_store %arg15[%c0_203, %c0_204], %488 {strides = array<i32>} : memref<8x128xf32, #tpu.memory_space<vmem>>, vector<8x128xf32>,
    %c5_i32_205 = arith.constant 5 : i32
    %c8_i32_206 = arith.constant 8 : i32
    %490 = arith.muli %c5_i32_205, %c8_i32_206 : i32
    %491 = tpu.assume_multiple %490, 8 : i32
    %c0_207 = arith.constant 0 : index
    %c0_208 = arith.constant 0 : index
    %492 = vector.load %arg15[%c0_207, %c0_208] : memref<8x128xf32, #tpu.memory_space<vmem>>, vector<8x128xf32>
    %c0_209 = arith.constant 0 : index
    %c0_210 = arith.constant 0 : index
    %493 = vector.load %arg7[%c0_209, %c0_210] : memref<128x384xf32, #tpu.memory_space<vmem>>, vector<128x384xf32>
    %cst_211 = arith.constant dense<0.000000e+00> : vector<8x384xf32>
    %494 = tpu.matmul %492, %493, %cst_211 {dimension_numbers = #tpu.dot_dimension_numbers<[1], [0], [0], [1], [0, 0, 1, 1], [], []>} : vector<8x128xf32>, vector<128x384xf32>, vector<8x384xf32> -> vector<8x384xf32>
    %495 = arith.index_cast %491 : i32 to index
    %c0_212 = arith.constant 0 : index
    %496 = vector.load %arg13[%495, %c0_212] : memref<64x384xf32, #tpu.memory_space<vmem>>, vector<8x384xf32>
    %497 = vector.extract_strided_slice %496 {offsets = [0, 0], sizes = [8, 128], strides = [1, 1]} : vector<8x384xf32> to vector<8x128xf32>
    %498 = vector.extract_strided_slice %494 {offsets = [0, 0], sizes = [8, 128], strides = [1, 1]} : vector<8x384xf32> to vector<8x128xf32>
    %499 = arith.addf %497, %498 : vector<8x128xf32>
    %500 = arith.negf %499 : vector<8x128xf32>
    %501 = math.exp %500 : vector<8x128xf32>
    %cst_213 = arith.constant 1.000000e+00 : f32
    %502 = vector.broadcast %cst_213 : f32 to vector<8x128xf32>
    %503 = arith.addf %502, %501 : vector<8x128xf32>
    %504 = arith.divf %502, %503 : vector<8x128xf32>
    %505 = vector.extract_strided_slice %496 {offsets = [0, 128], sizes = [8, 128], strides = [1, 1]} : vector<8x384xf32> to vector<8x128xf32>
    %506 = vector.extract_strided_slice %494 {offsets = [0, 128], sizes = [8, 128], strides = [1, 1]} : vector<8x384xf32> to vector<8x128xf32>
    %507 = arith.addf %505, %506 : vector<8x128xf32>
    %508 = arith.negf %507 : vector<8x128xf32>
    %509 = math.exp %508 : vector<8x128xf32>
    %cst_214 = arith.constant 1.000000e+00 : f32
    %510 = vector.broadcast %cst_214 : f32 to vector<8x128xf32>
    %511 = arith.addf %510, %509 : vector<8x128xf32>
    %512 = arith.divf %510, %511 : vector<8x128xf32>
    %513 = vector.extract_strided_slice %496 {offsets = [0, 256], sizes = [8, 128], strides = [1, 1]} : vector<8x384xf32> to vector<8x128xf32>
    %514 = vector.extract_strided_slice %494 {offsets = [0, 256], sizes = [8, 128], strides = [1, 1]} : vector<8x384xf32> to vector<8x128xf32>
    %c0_215 = arith.constant 0 : index
    %c0_216 = arith.constant 0 : index
    %515 = vector.load %arg9[%c0_215, %c0_216] : memref<1x128xf32, #tpu.memory_space<vmem>>, vector<1x128xf32>
    %516 = vector.broadcast %515 : vector<1x128xf32> to vector<8x128xf32>
    %517 = arith.addf %514, %516 : vector<8x128xf32>
    %518 = arith.mulf %504, %517 : vector<8x128xf32>
    %519 = arith.addf %513, %518 : vector<8x128xf32>
    %520 = math.tanh %519 : vector<8x128xf32>
    %521 = arith.subf %492, %520 : vector<8x128xf32>
    %522 = arith.mulf %512, %521 : vector<8x128xf32>
    %523 = arith.addf %520, %522 : vector<8x128xf32>
    %c0_217 = arith.constant 0 : index
    %c0_218 = arith.constant 0 : index
    %524 = vector.load %arg15[%c0_217, %c0_218] : memref<8x128xf32, #tpu.memory_space<vmem>>, vector<8x128xf32>
    tpu.vector_store %arg15[%c0_217, %c0_218], %523 {strides = array<i32>} : memref<8x128xf32, #tpu.memory_space<vmem>>, vector<8x128xf32>,
    %c6_i32_219 = arith.constant 6 : i32
    %c8_i32_220 = arith.constant 8 : i32
    %525 = arith.muli %c6_i32_219, %c8_i32_220 : i32
    %526 = tpu.assume_multiple %525, 8 : i32
    %c0_221 = arith.constant 0 : index
    %c0_222 = arith.constant 0 : index
    %527 = vector.load %arg15[%c0_221, %c0_222] : memref<8x128xf32, #tpu.memory_space<vmem>>, vector<8x128xf32>
    %c0_223 = arith.constant 0 : index
    %c0_224 = arith.constant 0 : index
    %528 = vector.load %arg7[%c0_223, %c0_224] : memref<128x384xf32, #tpu.memory_space<vmem>>, vector<128x384xf32>
    %cst_225 = arith.constant dense<0.000000e+00> : vector<8x384xf32>
    %529 = tpu.matmul %527, %528, %cst_225 {dimension_numbers = #tpu.dot_dimension_numbers<[1], [0], [0], [1], [0, 0, 1, 1], [], []>} : vector<8x128xf32>, vector<128x384xf32>, vector<8x384xf32> -> vector<8x384xf32>
    %530 = arith.index_cast %526 : i32 to index
    %c0_226 = arith.constant 0 : index
    %531 = vector.load %arg13[%530, %c0_226] : memref<64x384xf32, #tpu.memory_space<vmem>>, vector<8x384xf32>
    %532 = vector.extract_strided_slice %531 {offsets = [0, 0], sizes = [8, 128], strides = [1, 1]} : vector<8x384xf32> to vector<8x128xf32>
    %533 = vector.extract_strided_slice %529 {offsets = [0, 0], sizes = [8, 128], strides = [1, 1]} : vector<8x384xf32> to vector<8x128xf32>
    %534 = arith.addf %532, %533 : vector<8x128xf32>
    %535 = arith.negf %534 : vector<8x128xf32>
    %536 = math.exp %535 : vector<8x128xf32>
    %cst_227 = arith.constant 1.000000e+00 : f32
    %537 = vector.broadcast %cst_227 : f32 to vector<8x128xf32>
    %538 = arith.addf %537, %536 : vector<8x128xf32>
    %539 = arith.divf %537, %538 : vector<8x128xf32>
    %540 = vector.extract_strided_slice %531 {offsets = [0, 128], sizes = [8, 128], strides = [1, 1]} : vector<8x384xf32> to vector<8x128xf32>
    %541 = vector.extract_strided_slice %529 {offsets = [0, 128], sizes = [8, 128], strides = [1, 1]} : vector<8x384xf32> to vector<8x128xf32>
    %542 = arith.addf %540, %541 : vector<8x128xf32>
    %543 = arith.negf %542 : vector<8x128xf32>
    %544 = math.exp %543 : vector<8x128xf32>
    %cst_228 = arith.constant 1.000000e+00 : f32
    %545 = vector.broadcast %cst_228 : f32 to vector<8x128xf32>
    %546 = arith.addf %545, %544 : vector<8x128xf32>
    %547 = arith.divf %545, %546 : vector<8x128xf32>
    %548 = vector.extract_strided_slice %531 {offsets = [0, 256], sizes = [8, 128], strides = [1, 1]} : vector<8x384xf32> to vector<8x128xf32>
    %549 = vector.extract_strided_slice %529 {offsets = [0, 256], sizes = [8, 128], strides = [1, 1]} : vector<8x384xf32> to vector<8x128xf32>
    %c0_229 = arith.constant 0 : index
    %c0_230 = arith.constant 0 : index
    %550 = vector.load %arg9[%c0_229, %c0_230] : memref<1x128xf32, #tpu.memory_space<vmem>>, vector<1x128xf32>
    %551 = vector.broadcast %550 : vector<1x128xf32> to vector<8x128xf32>
    %552 = arith.addf %549, %551 : vector<8x128xf32>
    %553 = arith.mulf %539, %552 : vector<8x128xf32>
    %554 = arith.addf %548, %553 : vector<8x128xf32>
    %555 = math.tanh %554 : vector<8x128xf32>
    %556 = arith.subf %527, %555 : vector<8x128xf32>
    %557 = arith.mulf %547, %556 : vector<8x128xf32>
    %558 = arith.addf %555, %557 : vector<8x128xf32>
    %c0_231 = arith.constant 0 : index
    %c0_232 = arith.constant 0 : index
    %559 = vector.load %arg15[%c0_231, %c0_232] : memref<8x128xf32, #tpu.memory_space<vmem>>, vector<8x128xf32>
    tpu.vector_store %arg15[%c0_231, %c0_232], %558 {strides = array<i32>} : memref<8x128xf32, #tpu.memory_space<vmem>>, vector<8x128xf32>,
    %c7_i32_233 = arith.constant 7 : i32
    %c8_i32_234 = arith.constant 8 : i32
    %560 = arith.muli %c7_i32_233, %c8_i32_234 : i32
    %561 = tpu.assume_multiple %560, 8 : i32
    %c0_235 = arith.constant 0 : index
    %c0_236 = arith.constant 0 : index
    %562 = vector.load %arg15[%c0_235, %c0_236] : memref<8x128xf32, #tpu.memory_space<vmem>>, vector<8x128xf32>
    %c0_237 = arith.constant 0 : index
    %c0_238 = arith.constant 0 : index
    %563 = vector.load %arg7[%c0_237, %c0_238] : memref<128x384xf32, #tpu.memory_space<vmem>>, vector<128x384xf32>
    %cst_239 = arith.constant dense<0.000000e+00> : vector<8x384xf32>
    %564 = tpu.matmul %562, %563, %cst_239 {dimension_numbers = #tpu.dot_dimension_numbers<[1], [0], [0], [1], [0, 0, 1, 1], [], []>} : vector<8x128xf32>, vector<128x384xf32>, vector<8x384xf32> -> vector<8x384xf32>
    %565 = arith.index_cast %561 : i32 to index
    %c0_240 = arith.constant 0 : index
    %566 = vector.load %arg13[%565, %c0_240] : memref<64x384xf32, #tpu.memory_space<vmem>>, vector<8x384xf32>
    %567 = vector.extract_strided_slice %566 {offsets = [0, 0], sizes = [8, 128], strides = [1, 1]} : vector<8x384xf32> to vector<8x128xf32>
    %568 = vector.extract_strided_slice %564 {offsets = [0, 0], sizes = [8, 128], strides = [1, 1]} : vector<8x384xf32> to vector<8x128xf32>
    %569 = arith.addf %567, %568 : vector<8x128xf32>
    %570 = arith.negf %569 : vector<8x128xf32>
    %571 = math.exp %570 : vector<8x128xf32>
    %cst_241 = arith.constant 1.000000e+00 : f32
    %572 = vector.broadcast %cst_241 : f32 to vector<8x128xf32>
    %573 = arith.addf %572, %571 : vector<8x128xf32>
    %574 = arith.divf %572, %573 : vector<8x128xf32>
    %575 = vector.extract_strided_slice %566 {offsets = [0, 128], sizes = [8, 128], strides = [1, 1]} : vector<8x384xf32> to vector<8x128xf32>
    %576 = vector.extract_strided_slice %564 {offsets = [0, 128], sizes = [8, 128], strides = [1, 1]} : vector<8x384xf32> to vector<8x128xf32>
    %577 = arith.addf %575, %576 : vector<8x128xf32>
    %578 = arith.negf %577 : vector<8x128xf32>
    %579 = math.exp %578 : vector<8x128xf32>
    %cst_242 = arith.constant 1.000000e+00 : f32
    %580 = vector.broadcast %cst_242 : f32 to vector<8x128xf32>
    %581 = arith.addf %580, %579 : vector<8x128xf32>
    %582 = arith.divf %580, %581 : vector<8x128xf32>
    %583 = vector.extract_strided_slice %566 {offsets = [0, 256], sizes = [8, 128], strides = [1, 1]} : vector<8x384xf32> to vector<8x128xf32>
    %584 = vector.extract_strided_slice %564 {offsets = [0, 256], sizes = [8, 128], strides = [1, 1]} : vector<8x384xf32> to vector<8x128xf32>
    %c0_243 = arith.constant 0 : index
    %c0_244 = arith.constant 0 : index
    %585 = vector.load %arg9[%c0_243, %c0_244] : memref<1x128xf32, #tpu.memory_space<vmem>>, vector<1x128xf32>
    %586 = vector.broadcast %585 : vector<1x128xf32> to vector<8x128xf32>
    %587 = arith.addf %584, %586 : vector<8x128xf32>
    %588 = arith.mulf %574, %587 : vector<8x128xf32>
    %589 = arith.addf %583, %588 : vector<8x128xf32>
    %590 = math.tanh %589 : vector<8x128xf32>
    %591 = arith.subf %562, %590 : vector<8x128xf32>
    %592 = arith.mulf %582, %591 : vector<8x128xf32>
    %593 = arith.addf %590, %592 : vector<8x128xf32>
    %c0_245 = arith.constant 0 : index
    %c0_246 = arith.constant 0 : index
    %594 = vector.load %arg15[%c0_245, %c0_246] : memref<8x128xf32, #tpu.memory_space<vmem>>, vector<8x128xf32>
    tpu.vector_store %arg15[%c0_245, %c0_246], %593 {strides = array<i32>} : memref<8x128xf32, #tpu.memory_space<vmem>>, vector<8x128xf32>,
    %c8_i32_247 = arith.constant 8 : i32
    %c0_248 = arith.constant 0 : index
    %c0_249 = arith.constant 0 : index
    %595 = vector.load %arg15[%c0_248, %c0_249] : memref<8x128xf32, #tpu.memory_space<vmem>>, vector<8x128xf32>
    %c0_250 = arith.constant 0 : index
    %c0_251 = arith.constant 0 : index
    %596 = vector.load %arg10[%c0_250, %c0_251] : memref<1x128xf32, #tpu.memory_space<vmem>>, vector<1x128xf32>
    %597 = vector.broadcast %596 : vector<1x128xf32> to vector<8x128xf32>
    %598 = arith.mulf %595, %597 : vector<8x128xf32>
    %cst_252 = arith.constant dense<0.000000e+00> : vector<8xf32>
    %599 = vector.multi_reduction <add>, %598, %cst_252 [1] : vector<8x128xf32> to vector<8xf32>
    %600 = vector.shape_cast %599 : vector<8xf32> to vector<8x1xf32>
    %c0_253 = arith.constant 0 : index
    %c0_254 = arith.constant 0 : index
    %601 = vector.load %arg11[%c0_253, %c0_254] : memref<1x1xf32, #tpu.memory_space<vmem>>, vector<1x1xf32>
    %602 = vector.broadcast %601 : vector<1x1xf32> to vector<8x1xf32>
    %603 = arith.addf %600, %602 : vector<8x1xf32>
    %cst_255 = arith.constant 0.000000e+00 : f32
    %604 = vector.broadcast %cst_255 : f32 to vector<8x1xf32>
    %605 = arith.maximumf %603, %604 : vector<8x1xf32>
    %c0_256 = arith.constant 0 : index
    %c0_257 = arith.constant 0 : index
    %606 = vector.load %arg12[%c0_256, %c0_257] : memref<8x1xf32, #tpu.memory_space<vmem>>, vector<8x1xf32>
    tpu.vector_store %arg12[%c0_256, %c0_257], %605 {strides = array<i32>} : memref<8x1xf32, #tpu.memory_space<vmem>>, vector<8x1xf32>,
    return
  }
  func.func @transform_0(%arg0: i32) -> (i32, i32, i32) {
    %c0_i32 = arith.constant 0 : i32
    %c0_i32_0 = arith.constant 0 : i32
    %c0_i32_1 = arith.constant 0 : i32
    return %arg0, %c0_i32, %c0_i32_0 : i32, i32, i32
  }
  func.func @transform_1(%arg0: i32) -> (i32, i32) {
    %c0_i32 = arith.constant 0 : i32
    %c0_i32_0 = arith.constant 0 : i32
    %c0_i32_1 = arith.constant 0 : i32
    return %c0_i32, %c0_i32_0 : i32, i32
  }
  func.func @transform_2(%arg0: i32) -> (i32, i32) {
    %c0_i32 = arith.constant 0 : i32
    %c0_i32_0 = arith.constant 0 : i32
    %c0_i32_1 = arith.constant 0 : i32
    return %c0_i32, %c0_i32_0 : i32, i32
  }
  func.func @transform_3(%arg0: i32) -> (i32, i32) {
    %c0_i32 = arith.constant 0 : i32
    %c0_i32_0 = arith.constant 0 : i32
    %c0_i32_1 = arith.constant 0 : i32
    return %c0_i32, %c0_i32_0 : i32, i32
  }
  func.func @transform_4(%arg0: i32) -> (i32, i32) {
    %c0_i32 = arith.constant 0 : i32
    %c0_i32_0 = arith.constant 0 : i32
    %c0_i32_1 = arith.constant 0 : i32
    return %c0_i32, %c0_i32_0 : i32, i32
  }
  func.func @transform_5(%arg0: i32) -> (i32, i32) {
    %c0_i32 = arith.constant 0 : i32
    %c0_i32_0 = arith.constant 0 : i32
    %c0_i32_1 = arith.constant 0 : i32
    return %c0_i32, %c0_i32_0 : i32, i32
  }
  func.func @transform_6(%arg0: i32) -> (i32, i32) {
    %c0_i32 = arith.constant 0 : i32
    %c0_i32_0 = arith.constant 0 : i32
    %c0_i32_1 = arith.constant 0 : i32
    return %c0_i32, %c0_i32_0 : i32, i32
  }
  func.func @transform_7(%arg0: i32) -> (i32, i32) {
    %c0_i32 = arith.constant 0 : i32
    %c0_i32_0 = arith.constant 0 : i32
    %c0_i32_1 = arith.constant 0 : i32
    return %c0_i32, %c0_i32_0 : i32, i32
  }
  func.func @transform_8(%arg0: i32) -> (i32, i32) {
    %c0_i32 = arith.constant 0 : i32
    %c0_i32_0 = arith.constant 0 : i32
    %c0_i32_1 = arith.constant 0 : i32
    return %c0_i32, %c0_i32_0 : i32, i32
  }
  func.func @transform_9(%arg0: i32) -> (i32, i32) {
    %c0_i32 = arith.constant 0 : i32
    %c0_i32_0 = arith.constant 0 : i32
    %c0_i32_1 = arith.constant 0 : i32
    return %c0_i32, %c0_i32_0 : i32, i32
  }
  func.func @transform_10(%arg0: i32) -> (i32, i32) {
    %c0_i32 = arith.constant 0 : i32
    %c0_i32_0 = arith.constant 0 : i32
    %c0_i32_1 = arith.constant 0 : i32
    return %c0_i32, %c0_i32_0 : i32, i32
  }
  func.func @transform_11(%arg0: i32) -> (i32, i32) {
    %c0_i32 = arith.constant 0 : i32
    %c0_i32_0 = arith.constant 0 : i32
    return %arg0, %c0_i32 : i32, i32
  }
}

</mosaic_0001>

<bundles_post_ra>
// kernel: pm_model_forward.1
= control target key start
LH: loop header
LB: loop body
LE: loop exit
PB: predicated region body
PF: predicated region fallthrough
CT: control target
= control target key end

     0   :  { %s7443_s0 = inlined_call_operand.vmem [shape: f32[1,64,8], index: 0, kind: input, shape index: {}]   ;;  %s7444_s1 = inlined_call_operand.vmem [shape: f32[8,384], index: 1, kind: input, shape index: {}]   ;;  %s7445_s2 = inlined_call_operand.hbm [shape: f32[128,384], index: 2, kind: input, shape index: {}]   ;;  %s7446_s3 = inlined_call_operand.vmem [shape: f32[1,384], index: 3, kind: input, shape index: {}]   ;;  %s7447_s4 = inlined_call_operand.vmem [shape: f32[1,128], index: 4, kind: input, shape index: {}]   ;;  %s7448_s5 = inlined_call_operand.hbm [shape: f32[128,384], index: 5, kind: input, shape index: {}]   ;;  %s7449_s6 = inlined_call_operand.hbm [shape: f32[128,384], index: 6, kind: input, shape index: {}]   ;;  %s7450_s7 = inlined_call_operand.vmem [shape: f32[1,384], index: 7, kind: input, shape index: {}]   ;;  %s7451_s8 = inlined_call_operand.vmem [shape: f32[1,128], index: 8, kind: input, shape index: {}]   ;;  %s7452_s9 = inlined_call_operand.vmem [shape: f32[1,128], index: 9, kind: input, shape index: {}]   ;;  %s7453_s10 = inlined_call_operand.<no memory space> [shape: f32[1,1], index: 10, kind: input, shape index: {}]   ;;  %s7454_s11 = inlined_call_operand.vmem [shape: f32[8,1], index: 11, kind: output, shape index: {}]  }
   0x1   :  { %v16_v0 = vstv %s7453_s10 }
   0x2   :  { %17 = vst [vmem:[#allocation5] sm:$0x1] %v16_v0 }
   0x3   :  { %18 = vsyncpa [#allocation7], 0 }
   0x4   :  { %19 = vsyncpa [#allocation9], 0  ;;  %s5539_s19 = smov [#allocation8]   ;;  %s5540_s21 = smov [#allocation6]  }
   0x5   :  { %s45_s20 = sshll.u32 %s5539_s19, 4  ;;  %s29_s22 = sshll.u32 %s5540_s21, 4  ;;  %s46_s20 = int_to_ptr.vmem [resolvable:$true] %s45_s20  ;;  %s30_s22 = int_to_ptr.vmem [resolvable:$true] %s29_s22 }
   0x6   :  { %s5483_s23 = scalar_lea.vmem %s46_s20, 6144  ;;  %p5488_p1 = scmp.lt.s32.totalorder %s46_s20, %s46_s20 }
   0x7   :  { %p5484_p0 = scmp.ne.s32.totalorder %s46_s20, %s5483_s23  ;;  %p5489_p2 = scmp.lt.s32.totalorder %s5483_s23, %s5483_s23 }
   0x9   :  { %p5490_p3 = por %p5489_p2, %p5488_p1 }
   0xb   :  { %p5491_p4 = pnand %p5490_p3, %p5484_p0 }
   0xd   :  { %5494 = shalt.err (!%p5491_p4)
}
   0xe   :  { %s5541_s24 = smov 384   ;;  %s5542_s25 = smov 24  }
   0xf   :  { %51 = dma.hbm_to_vmem [thread:$0]  %s7448_s5, 6144, %s46_s20, [#allocation9], %s5541_s24, %s5541_s24, %s5542_s25  }
  0x10   :  { %s5503_s27 = scalar_lea.vmem %s30_s22, 6144  ;;  %p5508_p6 = scmp.lt.s32.totalorder %s30_s22, %s30_s22 }
  0x11   :  { %p5504_p5 = scmp.ne.s32.totalorder %s30_s22, %s5503_s27  ;;  %p5509_p7 = scmp.lt.s32.totalorder %s5503_s27, %s5503_s27 }
  0x13   :  { %p5510_p8 = por %p5509_p7, %p5508_p6 }
  0x15   :  { %p5511_p9 = pnand %p5510_p8, %p5504_p5 }
  0x17   :  { %5514 = shalt.err (!%p5511_p9)
}
  0x18   :  { %35 = dma.hbm_to_vmem [thread:$0]  %s7445_s2, 6144, %s30_s22, [#allocation7], %s5541_s24, %s5541_s24, %s5542_s25  }
  0x19   :  { %s5543_s30 = smov [#allocation10]  }
  0x1a   :  { %s57_s12 = sshll.u32 %s5543_s30, 4  ;;  %s58_s12 = int_to_ptr.vmem [resolvable:$true] %s57_s12 }
  0x1b   :  { %s5523_s13 = scalar_lea.vmem %s58_s12, 6144  ;;  %p5528_p11 = scmp.lt.s32.totalorder %s58_s12, %s58_s12 }
  0x1c   :  { %p5524_p10 = scmp.ne.s32.totalorder %s58_s12, %s5523_s13  ;;  %p5529_p12 = scmp.lt.s32.totalorder %s5523_s13, %s5523_s13 }
  0x1e   :  { %p5530_p13 = por %p5529_p12, %p5528_p11 }
  0x20   :  { %p5531_p0 = pnand %p5530_p13, %p5524_p10 }
  0x22   :  { %5534 = shalt.err (!%p5531_p0)
}
  0x23   :  { %63 = dma.hbm_to_vmem [thread:$0]  %s7449_s6, 6144, %s58_s12, [#allocation9], %s5541_s24, %s5541_s24, %s5542_s25  }
  0x24   :  { %5535 = dma.done.wait [#allocation7], 6144  }
  0x25   :  { %5536 = vsyncadd [#allocation7], 4294961152 }
  0x26   :  { %5537 = dma.done.wait [#allocation9], 12288  }
  0x27   :  { %5538 = vsyncadd [#allocation9], 4294955008  ;;  %v7455_v1 = vmov 0.0   ;;  %v90_v2 = vld [vmem:[%s7444_s1 + $0x8] sm:$0xff]  ;;  %v89_v3 = vld [vmem:[%s7444_s1] sm:$0xff]  ;;  %vm109_vm0 = vcmask 64512   ;;  %v94_v61 = vlaneseq }
  0x28   :  { %198 = vmatprep.mubr.f32.mxu0 %v7455_v1  ;;  %v81_v4 = vld [vmem:[%s7443_s0] sm:$0xff]  ;;  %164 = vmatprep.subr.mxu0 %v90_v2  ;;  %v5628_v5 = vld [vmem:[#allocation6 + $0x170] sm:$0xff]  ;;  %v5630_v6 = vld [vmem:[#allocation6 + $0x168] sm:$0xff]  ;;  %vm5545_vm1 = vmmov 0   ;;  %vm4304_vm2 = vcmask 7168  }
  0x29   :  { %7512 = vst [vmem:[#allocation13_spill] sm:$0xff] %v5628_v5  ;;  %4692 = vmatprep.mubr.msk.f32.mxu1 %vm109_vm0, %v81_v4  ;;  %165 = vmatpush1.msra.mxu0 %v89_v3  ;;  %v5633_v7 = vld [vmem:[#allocation6 + $0x158] sm:$0xff]  ;;  %v5637_v8 = vld [vmem:[#allocation6 + $0x150] sm:$0xff]  ;;  %v82_v9 = vld [vmem:[%s7443_s0 + $0x8] sm:$0xff]  ;;  %v5925_v62 = vshrl.u32 %v94_v61, 7 }
  0x2a   :  { %4319 = vmatmul.mubr.msk.f32.vlgmr.msra.gmra.mxu0 %vm109_vm0, %v81_v4  ;;  %426 = vmatprep.subr.mxu0 %v5628_v5  ;;  %v5644_v10 = vld [vmem:[#allocation6 + $0x140] sm:$0xff]  ;;  %v5647_v11 = vld [vmem:[#allocation6 + $0x138] sm:$0xff]  ;;  %v5650_v12 = vld [vmem:[#allocation6 + $0x128] sm:$0xff] }
  0x2b   :  { %427 = vmatpush1.msra.mxu0 %v5630_v6  ;;  %204 = vmatprep.mubr.f32.mxu0 %v7455_v1  ;;  %v5654_v13 = vld [vmem:[#allocation6 + $0x120] sm:$0xff]  ;;  %v5661_v14 = vld [vmem:[%s7443_s0 + $0x10] sm:$0xff]  ;;  %v5669_v17 = vld [vmem:[#allocation6 + $0xf8] sm:$0xff]  ;;  %7517 = vst [vmem:[#allocation18_spill] sm:$0xff] %v5925_v62  ;;  %v7461_v63 = vsub.s32 0, %v5925_v62  ;;  %v7463_v3 = vsub.s32 1, %v5925_v62 }
  0x2c   :  { %428 = vmatprep.subr.mxu0 %v5633_v7  ;;  %v5663_v15 = vld [vmem:[#allocation6 + $0x110] sm:$0xff]  ;;  %v5666_v16 = vld [vmem:[#allocation6 + $0x108] sm:$0xff]  ;;  %v5683_v20 = vld [vmem:[#allocation6 + $0xe0] sm:$0xff] }
  0x2d   :  { %429 = vmatpush1.msra.mxu0 %v5637_v8  ;;  %v5674_v18 = vld [vmem:[#allocation6 + $0xf0] sm:$0xff]  ;;  %v5686_v21 = vld [vmem:[#allocation6 + $0xd8] sm:$0xff]  ;;  %v5692_v23 = vld [vmem:[#allocation6 + $0xc8] sm:$0xff] }
  0x2e   :  { %4320 = vmatmul.mubr.msk.f32.gmra.mxu0 %vm109_vm0, %v82_v9  ;;  %430 = vmatprep.subr.mxu0 %v5644_v10  ;;  %v5681_v19 = vld [vmem:[%s7443_s0 + $0x18] sm:$0xff]  ;;  %v91_v22 = vld [vmem:[%s7444_s1 + $0x10] sm:$0xff]  ;;  %v5697_v24 = vld [vmem:[#allocation6 + $0xc0] sm:$0xff] }
  0x2f   :  { %431 = vmatpush1.msra.mxu0 %v5647_v11  ;;  %210 = vmatprep.mubr.f32.mxu0 %v7455_v1  ;;  %v5704_v25 = vld [vmem:[%s7443_s0 + $0x20] sm:$0xff]  ;;  %v5706_v26 = vld [vmem:[#allocation6 + $0xb0] sm:$0xff]  ;;  %v5709_v27 = vld [vmem:[#allocation6 + $0xa8] sm:$0xff] }
  0x30   :  { %432 = vmatprep.subr.mxu0 %v5650_v12  ;;  %4690 = vmatprep.subr.mxu1 %v91_v22  ;;  %v5712_v28 = vld [vmem:[#allocation6 + $0x98] sm:$0xff]  ;;  %v5718_v29 = vld [vmem:[#allocation6 + $0x90] sm:$0xff]  ;;  %v5727_v31 = vld [vmem:[%s7443_s0 + $0x28] sm:$0xff] }
  0x31   :  { %433 = vmatpush1.msra.mxu0 %v5654_v13  ;;  %4691 = vmatpush3.msra.mxu1 %v91_v22  ;;  %v5720_v30 = vld [vmem:[#allocation6 + $0x178] sm:$0xff]  ;;  %v5729_v32 = vld [vmem:[#allocation6 + $0x80] sm:$0xff]  ;;  %v5736_v34 = vld [vmem:[#allocation6 + $0x68] sm:$0xff] }
  0x32   :  { %4321 = vmatmul.mubr.msk.f32.gmra.mxu0 %vm109_vm0, %v5661_v14  ;;  %434 = vmatprep.subr.mxu0 %v5663_v15  ;;  %v5732_v33 = vld [vmem:[#allocation6 + $0x78] sm:$0xff]  ;;  %v5742_v35 = vld [vmem:[#allocation6 + $0x60] sm:$0xff]  ;;  %v87_v37 = vld [vmem:[%s7443_s0 + $0x30] sm:$0xff] }
  0x33   :  { %435 = vmatpush1.msra.mxu0 %v5666_v16  ;;  %216 = vmatprep.mubr.f32.mxu0 %v7455_v1  ;;  %v5744_v36 = vld [vmem:[#allocation6 + $0x160] sm:$0xff]  ;;  %v5751_v38 = vld [vmem:[#allocation6 + $0x50] sm:$0xff]  ;;  %v5754_v39 = vld [vmem:[#allocation6 + $0x48] sm:$0xff] }
  0x34   :  { %436 = vmatprep.subr.mxu0 %v5669_v17  ;;  %4704 = vmatprep.subr.mxu1 %v7455_v1  ;;  %v5758_v40 = vld [vmem:[#allocation6 + $0x38] sm:$0xff]  ;;  %v5763_v41 = vld [vmem:[#allocation6 + $0x30] sm:$0xff]  ;;  %v5765_v42 = vld [vmem:[#allocation6 + $0x148] sm:$0xff] }
  0x35   :  { %437 = vmatpush1.msra.mxu0 %v5674_v18  ;;  %4693 = vmatmul.mubr.msk.f32.vlgmr.msra.gmra.mxu1 %vm109_vm0, %v82_v9  ;;  %v88_v43 = vld [vmem:[%s7443_s0 + $0x38] sm:$0xff]  ;;  %v5772_v44 = vld [vmem:[#allocation6 + $0x20] sm:$0xff]  ;;  %v5779_v46 = vld [vmem:[#allocation6 + $0x8] sm:$0xff] }
  0x36   :  { %4322 = vmatmul.mubr.msk.f32.gmra.mxu0 %vm109_vm0, %v5681_v19  ;;  %438 = vmatprep.subr.mxu0 %v5683_v20  ;;  %v5775_v45 = vld [vmem:[#allocation6 + $0x18] sm:$0xff]  ;;  %7513 = vst [vmem:[#allocation14_spill] sm:$0xff] %v5779_v46  ;;  %v5784_v47 = vld [vmem:[#allocation6] sm:$0xff]  ;;  %v5786_v48 = vld [vmem:[#allocation6 + $0x130] sm:$0xff] }
  0x37   :  { %439 = vmatpush1.msra.mxu0 %v5686_v21  ;;  %222 = vmatprep.mubr.f32.mxu0 %v7455_v1  ;;  %7514 = vst [vmem:[#allocation15_spill] sm:$0xff] %v5784_v47  ;;  %v5792_v49 = vld [vmem:[#allocation6 + $0x118] sm:$0xff]  ;;  %v5798_v50 = vld [vmem:[#allocation6 + $0x100] sm:$0xff]  ;;  %v5804_v51 = vld [vmem:[#allocation6 + $0xe8] sm:$0xff] }
  0x38   :  { %440 = vmatprep.subr.mxu0 %v5692_v23  ;;  %4705 = vmatpush3.msra.mxu1 %v5720_v30  ;;  %v5812_v52 = vld [vmem:[#allocation6 + $0xd0] sm:$0xff]  ;;  %v5818_v53 = vld [vmem:[#allocation6 + $0xb8] sm:$0xff]  ;;  %v5825_v54 = vld [vmem:[#allocation6 + $0xa0] sm:$0xff] }
  0x39   :  { %441 = vmatpush1.msra.mxu0 %v5697_v24  ;;  %4706 = vmatprep.subr.mxu1 %v7455_v1  ;;  %v5831_v55 = vld [vmem:[#allocation6 + $0x88] sm:$0xff]  ;;  %v5838_v56 = vld [vmem:[#allocation6 + $0x70] sm:$0xff]  ;;  %v5844_v57 = vld [vmem:[#allocation6 + $0x58] sm:$0xff] }
  0x3a   :  { %4323 = vmatmul.mubr.msk.f32.gmra.mxu0 %vm109_vm0, %v5704_v25  ;;  %442 = vmatprep.subr.mxu0 %v5706_v26  ;;  %v5850_v58 = vld [vmem:[#allocation6 + $0x40] sm:$0xff]  ;;  %v5856_v59 = vld [vmem:[#allocation6 + $0x28] sm:$0xff]  ;;  %v5862_v60 = vld [vmem:[#allocation6 + $0x10] sm:$0xff] }
  0x3b   :  { %443 = vmatpush1.msra.mxu0 %v5709_v27  ;;  %228 = vmatprep.mubr.f32.mxu0 %v7455_v1  ;;  %7515 = vst [vmem:[#allocation16_spill] sm:$0xff] %v5856_v59  ;;  %7516 = vst [vmem:[#allocation17_spill] sm:$0xff] %v5862_v60  ;;  %v92_v0 = vld [vmem:[%s7446_s3] sm:$0x7] }
  0x3c   :  { %444 = vmatprep.subr.mxu0 %v5712_v28  ;;  %4707 = vmatpush3.msra.mxu1 %v5744_v36  ;;  %v97_v9 = vrot.slane %v92_v0, %v7461_v63 }
  0x3d   :  { %445 = vmatpush1.msra.mxu0 %v5718_v29  ;;  %4708 = vmatprep.subr.mxu1 %v7455_v1 }
  0x3e   :  { %4324 = vmatmul.mubr.msk.f32.gmra.mxu0 %vm109_vm0, %v5727_v31  ;;  %446 = vmatprep.subr.mxu0 %v5729_v32 }
  0x3f   :  { %447 = vmatpush1.msra.mxu0 %v5732_v33  ;;  %234 = vmatprep.mubr.f32.mxu0 %v7455_v1 }
  0x40   :  { %448 = vmatprep.subr.mxu0 %v5736_v34  ;;  %4709 = vmatpush3.msra.mxu1 %v5765_v42 }
  0x41   :  { %449 = vmatpush1.msra.mxu0 %v5742_v35  ;;  %4710 = vmatprep.subr.mxu1 %v7455_v1 }
  0x42   :  { %4325 = vmatmul.mubr.msk.f32.gmra.mxu0 %vm109_vm0, %v87_v37  ;;  %450 = vmatprep.subr.mxu0 %v5751_v38 }
  0x43   :  { %451 = vmatpush1.msra.mxu0 %v5754_v39  ;;  %240 = vmatprep.mubr.f32.mxu0 %v7455_v1 }
  0x44   :  { %452 = vmatprep.subr.mxu0 %v5758_v40  ;;  %4711 = vmatpush3.msra.mxu1 %v5786_v48 }
  0x45   :  { %453 = vmatpush1.msra.mxu0 %v5763_v41  ;;  %4712 = vmatprep.subr.mxu1 %v7455_v1 }
  0x46   :  { %4326 = vmatmul.mubr.msk.f32.gmra.mxu0 %vm109_vm0, %v88_v43  ;;  %454 = vmatprep.subr.mxu0 %v5772_v44 }
  0x47   :  { %455 = vmatpush1.msra.mxu0 %v5775_v45  ;;  %490 = vmatprep.mubr.f32.mxu0 %v7455_v1 }
  0x48   :  { %456 = vmatprep.subr.mxu0 %v5779_v46  ;;  %4713 = vmatpush3.msra.mxu1 %v5792_v49 }
  0x49   :  { %457 = vmatpush1.msra.mxu0 %v5784_v47  ;;  %4695 = vmatprep.mubr.msk.f32.mxu1 %vm109_vm0, %v5661_v14 }
  0x4a   :  { %491 = vmatmul.mubr.f32.vlgmr.msra.gmra.mxu0 %v7455_v1  ;;  %4714 = vmatprep.subr.mxu1 %v7455_v1 }
  0x4b   :  { %4696 = vmatmul.mubr.msk.f32.gmra.mxu1 %vm109_vm0, %v5681_v19  ;;  %652 = vmatprep.subr.mxu0 %v5628_v5  ;;  %v101_v19 = vrot.slane %v92_v0, %v7463_v3 }
  0x4c   :  { %4715 = vmatpush3.msra.mxu1 %v5798_v50  ;;  %4698 = vmatprep.mubr.msk.f32.mxu1 %vm109_vm0, %v5704_v25 }
  0x4d   :  { %4716 = vmatprep.subr.mxu1 %v7455_v1  ;;  %653 = vmatpush1.msra.mxu0 %v5630_v6 }
  0x4e   :  { %4717 = vmatpush3.msra.mxu1 %v5804_v51  ;;  %654 = vmatprep.subr.mxu0 %v5633_v7 }
  0x4f   :  { %4718 = vmatprep.subr.mxu1 %v7455_v1  ;;  %4699 = vmatmul.mubr.msk.f32.gmra.mxu1 %vm109_vm0, %v5727_v31 }
  0x50   :  { %4719 = vmatpush3.msra.mxu1 %v5812_v52  ;;  %4701 = vmatprep.mubr.msk.f32.mxu1 %vm109_vm0, %v87_v37 }
  0x51   :  { %4720 = vmatprep.subr.mxu1 %v7455_v1  ;;  %655 = vmatpush1.msra.mxu0 %v5637_v8 }
  0x52   :  { %4721 = vmatpush3.msra.mxu1 %v5818_v53  ;;  %656 = vmatprep.subr.mxu0 %v5644_v10 }
  0x53   :  { %4722 = vmatprep.subr.mxu1 %v7455_v1  ;;  %4702 = vmatmul.mubr.msk.f32.gmra.mxu1 %vm109_vm0, %v88_v43 }
  0x54   :  { %4723 = vmatpush3.msra.mxu1 %v5825_v54  ;;  %4736 = vmatprep.mubr.msk.f32.mxu1 %vm5545_vm1, %v7455_v1 }
  0x55   :  { %4724 = vmatprep.subr.mxu1 %v7455_v1  ;;  %657 = vmatpush1.msra.mxu0 %v5647_v11 }
  0x56   :  { %4725 = vmatpush3.msra.mxu1 %v5831_v55  ;;  %658 = vmatprep.subr.mxu0 %v5650_v12 }
  0x57   :  { %4726 = vmatprep.subr.mxu1 %v7455_v1  ;;  %659 = vmatpush1.msra.mxu0 %v5654_v13 }
  0x58   :  { %4727 = vmatpush3.msra.mxu1 %v5838_v56  ;;  %660 = vmatprep.subr.mxu0 %v5663_v15 }
  0x59   :  { %4728 = vmatprep.subr.mxu1 %v7455_v1  ;;  %661 = vmatpush1.msra.mxu0 %v5666_v16 }
  0x5a   :  { %4729 = vmatpush3.msra.mxu1 %v5844_v57  ;;  %662 = vmatprep.subr.mxu0 %v5669_v17 }
  0x5b   :  { %4730 = vmatprep.subr.mxu1 %v7455_v1  ;;  %663 = vmatpush1.msra.mxu0 %v5674_v18 }
  0x5c   :  { %4731 = vmatpush3.msra.mxu1 %v5850_v58  ;;  %664 = vmatprep.subr.mxu0 %v5683_v20 }
  0x5d   :  { %4732 = vmatprep.subr.mxu1 %v7455_v1  ;;  %665 = vmatpush1.msra.mxu0 %v5686_v21 }
  0x5e   :  { %4733 = vmatpush3.msra.mxu1 %v5856_v59  ;;  %666 = vmatprep.subr.mxu0 %v5692_v23 }
  0x5f   :  { %4734 = vmatprep.subr.mxu1 %v7455_v1  ;;  %667 = vmatpush1.msra.mxu0 %v5697_v24 }
  0x60   :  { %4735 = vmatpush3.msra.mxu1 %v5862_v60  ;;  %668 = vmatprep.subr.mxu0 %v5706_v26 }
  0x61   :  { %4737 = vmatmul.mubr.f32.vlgmr.msra.gmra.mxu1 %v7455_v1  ;;  %4739 = vmatprep.subr.mxu1 %v7455_v1 }
  0x62   :  { %4740 = vmatpush3.msra.mxu1 %v5720_v30  ;;  %669 = vmatpush1.msra.mxu0 %v5709_v27 }
  0x63   :  { %4741 = vmatprep.subr.mxu1 %v7455_v1  ;;  %670 = vmatprep.subr.mxu0 %v5712_v28 }
  0x64   :  { %4742 = vmatpush3.msra.mxu1 %v5744_v36  ;;  %671 = vmatpush1.msra.mxu0 %v5718_v29 }
  0x65   :  { %4743 = vmatprep.subr.mxu1 %v7455_v1  ;;  %672 = vmatprep.subr.mxu0 %v5729_v32 }
  0x66   :  { %4744 = vmatpush3.msra.mxu1 %v5765_v42  ;;  %673 = vmatpush1.msra.mxu0 %v5732_v33 }
  0x67   :  { %4745 = vmatprep.subr.mxu1 %v7455_v1  ;;  %674 = vmatprep.subr.mxu0 %v5736_v34 }
  0x68   :  { %4746 = vmatpush3.msra.mxu1 %v5786_v48  ;;  %675 = vmatpush1.msra.mxu0 %v5742_v35 }
  0x69   :  { %4747 = vmatprep.subr.mxu1 %v7455_v1  ;;  %676 = vmatprep.subr.mxu0 %v5751_v38 }
  0x6a   :  { %4748 = vmatpush3.msra.mxu1 %v5792_v49  ;;  %677 = vmatpush1.msra.mxu0 %v5754_v39 }
  0x6b   :  { %4749 = vmatprep.subr.mxu1 %v7455_v1  ;;  %678 = vmatprep.subr.mxu0 %v5758_v40 }
  0x6c   :  { %4750 = vmatpush3.msra.mxu1 %v5798_v50  ;;  %679 = vmatpush1.msra.mxu0 %v5763_v41 }
  0x6d   :  { %4751 = vmatprep.subr.mxu1 %v7455_v1  ;;  %680 = vmatprep.subr.mxu0 %v5772_v44 }
  0x6e   :  { %4752 = vmatpush3.msra.mxu1 %v5804_v51  ;;  %681 = vmatpush1.msra.mxu0 %v5775_v45 }
  0x6f   :  { %4753 = vmatprep.subr.mxu1 %v7455_v1  ;;  %682 = vmatprep.subr.mxu0 %v5779_v46 }
  0x70   :  { %4754 = vmatpush3.msra.mxu1 %v5812_v52  ;;  %683 = vmatpush1.msra.mxu0 %v5784_v47 }
  0x71   :  { %4755 = vmatprep.subr.mxu1 %v7455_v1  ;;  %716 = vmatprep.mubr.f32.mxu0 %v7455_v1 }
  0x72   :  { %4756 = vmatpush3.msra.mxu1 %v5818_v53  ;;  %4771 = vmatprep.mubr.msk.f32.mxu1 %vm5545_vm1, %v7455_v1 }
  0x73   :  { %4757 = vmatprep.subr.mxu1 %v7455_v1  ;;  %879 = vmatprep.subr.mxu0 %v5628_v5  ;;  %v7466_v5 = vsub.s32 2, %v5925_v62 }
  0x74   :  { %4758 = vmatpush3.msra.mxu1 %v5825_v54 }
  0x75   :  { %4759 = vmatprep.subr.mxu1 %v7455_v1 }
  0x76   :  { %4760 = vmatpush3.msra.mxu1 %v5831_v55 }
  0x77   :  { %4761 = vmatprep.subr.mxu1 %v7455_v1 }
  0x78   :  { %4762 = vmatpush3.msra.mxu1 %v5838_v56 }
  0x79   :  { %4763 = vmatprep.subr.mxu1 %v7455_v1 }
  0x7a   :  { %4764 = vmatpush3.msra.mxu1 %v5844_v57 }
  0x7b   :  { %4765 = vmatprep.subr.mxu1 %v7455_v1 }
  0x7c   :  { %4766 = vmatpush3.msra.mxu1 %v5850_v58 }
  0x7d   :  { %4767 = vmatprep.subr.mxu1 %v7455_v1 }
  0x7e   :  { %4768 = vmatpush3.msra.mxu1 %v5856_v59 }
  0x7f   :  { %4769 = vmatprep.subr.mxu1 %v7455_v1 }
  0x80   :  { %4770 = vmatpush3.msra.mxu1 %v5862_v60 }
  0x81   :  { %4774 = vmatprep.subr.mxu1 %v7455_v1 }
  0xea   :  { %v200_v2 = vpop.f32.mrf.mxu0 }
  0xec   :  { %v202_v4 = vpop.f32.mrf.mxu0 }
  0xee   :  { %v206_v14 = vpop.f32.mrf.mxu0 }
  0xef   :  { %v5936_v22 = vadd.f32 %v206_v14, %v97_v9  ;;  %v105_v14 = vrot.slane %v92_v0, %v7466_v5 }
  0xf0   :  { %v208_v25 = vpop.f32.mrf.mxu0 }
  0xf1   :  { %7518 = vst [vmem:[#allocation19_spill] sm:$0xff] %v5936_v22  ;;  %v5938_v31 = vadd.f32 %v208_v25, %v101_v19 }
  0xf2   :  { %v212_v37 = vpop.f32.mrf.mxu0 }
  0xf3   :  { %7519 = vst [vmem:[#allocation20_spill] sm:$0xff] %v5938_v31  ;;  %v5940_v43 = vadd.f32 %v212_v37, %v97_v9 }
  0xf4   :  { %v214_v61 = vpop.f32.mrf.mxu0 }
  0xf5   :  { %7520 = vst [vmem:[#allocation21_spill] sm:$0xff] %v5940_v43  ;;  %v5942_v1 = vadd.f32 %v214_v61, %v101_v19  ;;  %v4694_v37 = vpop.f32.mrf.mxu1 }
  0xf6   :  { %v218_v60 = vpop.f32.mrf.mxu0  ;;  %v5955_v61 = vadd.f32 %v4694_v37, %v105_v14 }
  0xf7   :  { %7521 = vst [vmem:[#allocation22_spill] sm:$0xff] %v5942_v1  ;;  %v5945_v47 = vadd.f32 %v218_v60, %v97_v9 }
  0xf8   :  { %v220_v63 = vpop.f32.mrf.mxu0  ;;  %7526 = vst [vmem:[#allocation27_spill] sm:$0xff] %v5955_v61  ;;  %v313_v61 = vpop.f32.mrf.mxu1 }
  0xf9   :  { %7522 = vst [vmem:[#allocation23_spill] sm:$0xff] %v5945_v47  ;;  %v5947_v46 = vadd.f32 %v220_v63, %v101_v19 }
  0xfa   :  { %v224_v3 = vpop.f32.mrf.mxu0 }
  0xfb   :  { %7523 = vst [vmem:[#allocation24_spill] sm:$0xff] %v5947_v46  ;;  %v5951_v25 = vadd.f32 %v224_v3, %v97_v9 }
  0xfc   :  { %v226_v31 = vpop.f32.mrf.mxu0 }
  0xfd   :  { %7524 = vst [vmem:[#allocation25_spill] sm:$0xff] %v5951_v25  ;;  %v5953_v43 = vadd.f32 %v226_v31, %v101_v19  ;;  %v201_v31 = vadd.f32 %v200_v2, %v97_v9  ;;  %v203_v2 = vadd.f32 %v202_v4, %v101_v19 }
  0xfe   :  { %v230_v1 = vpop.f32.mrf.mxu0 }
  0xff   :  { %7525 = vst [vmem:[#allocation26_spill] sm:$0xff] %v5953_v43  ;;  %v5957_v22 = vadd.f32 %v230_v1, %v97_v9 }
 0x100   :  { %v232_v60 = vpop.f32.mrf.mxu0 }
 0x101   :  { %7527 = vst [vmem:[#allocation28_spill] sm:$0xff] %v5957_v22  ;;  %v5959_v47 = vadd.f32 %v232_v60, %v101_v19 }
 0x102   :  { %v236_v63 = vpop.f32.mrf.mxu0 }
 0x103   :  { %7528 = vst [vmem:[#allocation29_spill] sm:$0xff] %v5959_v47  ;;  %v5961_v46 = vadd.f32 %v236_v63, %v97_v9 }
 0x104   :  { %v238_v62 = vpop.f32.mrf.mxu0 }
 0x105   :  { %7529 = vst [vmem:[#allocation30_spill] sm:$0xff] %v5961_v46  ;;  %v5963_v0 = vadd.f32 %v238_v62, %v101_v19 }
 0x106   :  { %v242_v3 = vpop.f32.mrf.mxu0 }
 0x107   :  { %7530 = vst [vmem:[#allocation31_spill] sm:$0xff] %v5963_v0  ;;  %v5965_v5 = vadd.f32 %v242_v3, %v97_v9 }
 0x108   :  { %v244_v25 = vpop.f32.mrf.mxu0 }
 0x109   :  { %7531 = vst [vmem:[#allocation32_spill] sm:$0xff] %v5965_v5  ;;  %v5967_v43 = vadd.f32 %v244_v25, %v101_v19 }
 0x10a   :  { %v492_v37 = vpop.f32.mrf.mxu0 }
 0x10b   :  { %7532 = vst [vmem:[#allocation33_spill] sm:$0xff] %v5967_v43  ;;  %v573_v1 = vadd.f32 %v492_v37, %v201_v31  ;;  %v4697_v22 = vpop.f32.mrf.mxu1 }
 0x10c   :  { %v5969_v60 = vadd.f32 %v4697_v22, %v105_v14  ;;  %v494_v5 = vpop.f32.mrf.mxu0 }
 0x10d   :  { %v4335_v59 = vmul.f32 -1.442695, %v573_v1  ;;  %v323_v47 = vpop.f32.mrf.mxu1  ;;  %v580_v31 = vadd.f32 %v494_v5, %v203_v2  ;;  %v314_v5 = vadd.f32 %v313_v61, %v105_v14 }
 0x10e   :  { %v5971_v63 = vadd.f32 %v323_v47, %v105_v14 }
 0x10f   :  { %5315 = vpow2.f32 %v4335_v59  ;;  %v4700_v62 = vpop.f32.mrf.mxu1  ;;  %v4336_v22 = vmul.f32 -1.442695, %v580_v31 }
 0x110   :  { %v5973_v0 = vadd.f32 %v4700_v62, %v105_v14 }
 0x111   :  { %v333_v3 = vpop.f32.mrf.mxu1  ;;  %5317 = vpow2.f32 %v4336_v22 }
 0x112   :  { %7533 = vst [vmem:[#allocation34_spill] sm:$0xff] %v5973_v0  ;;  %v5975_v46 = vadd.f32 %v333_v3, %v105_v14  ;;  %v5984_v3 = vld [vmem:[%s7447_s4] ss:$0 sm:$0xff] }
 0x113   :  { %v4703_v9 = vpop.f32.mrf.mxu1 }
 0x114   :  { %7534 = vst [vmem:[#allocation35_spill] sm:$0xff] %v5975_v46  ;;  %v5977_v25 = vadd.f32 %v4703_v9, %v105_v14 }
 0x115   :  { %v343_v37 = vpop.f32.mrf.mxu1 }
 0x116   :  { %7535 = vst [vmem:[#allocation36_spill] sm:$0xff] %v5977_v25  ;;  %v5979_v1 = vadd.f32 %v343_v37, %v105_v14  ;;  %v7538_v14 = vmov 0.0  }
 0x118   :  { %7536 = vst [vmem:[#allocation37_spill] sm:$0xff] %v5979_v1 }
 0x11c   :  { %v5316_v43 = vpop.eup %5315 }
 0x11d   :  { %v577_v59 = vadd.f32 1.0, %v5316_v43 }
 0x11e   :  { %v5318_v19 = vpop.eup %5317 }
 0x11f   :  { %5319 = vrcp.f32 %v577_v59  ;;  %v584_v37 = vadd.f32 1.0, %v5318_v19 }
 0x121   :  { %v563_v47 = vpop.f32.mrf.mxu1 }
 0x122   :  { %v594_v4 = vadd.f32 %v5984_v3, %v563_v47 }
 0x123   :  { %v4738_v62 = vpop.f32.mrf.mxu1 }
 0x12c   :  { %v5320_v9 = vpop.eup %5319 }
 0x12d   :  { %v595_v2 = vmul.f32 %v5320_v9, %v594_v4  ;;  %v7546_v9 = vld [vmem:[#allocation27_spill] sm:$0xff] }
 0x12f   :  { %v596_v25 = vadd.f32 %v595_v2, %v314_v5 }
 0x131   :  { %5321 = vtanh.f32 %v596_v25 }
 0x132   :  { %5323 = vrcp.f32 %v584_v37 }
 0x13e   :  { %v5322_v43 = vpop.eup %5321 }
 0x13f   :  { %v598_v31 = vsub.f32 0.0, %v5322_v43  ;;  %v5324_v22 = vpop.eup %5323 }
 0x141   :  { %v599_v59 = vmul.f32 %v5324_v22, %v598_v31 }
 0x143   :  { %v5987_v62 = vadd.f32 %v5322_v43, %v599_v59 }
 0x145   :  { %7537 = vst [vmem:[#allocation38_spill] sm:$0xff] %v5987_v62  ;;  %717 = vmatmul.mubr.f32.vlgmr.msra.gmra.mxu0 %v5987_v62  ;;  %4772 = vmatmul.mubr.f32.vlgmr.msra.gmra.mxu1 %v5987_v62 }
 0x146   :  { %880 = vmatpush1.msra.mxu0 %v5630_v6  ;;  %4775 = vmatpush3.msra.mxu1 %v5720_v30 }
 0x147   :  { %881 = vmatprep.subr.mxu0 %v5633_v7  ;;  %4776 = vmatprep.subr.mxu1 %v7538_v14 }
 0x148   :  { %882 = vmatpush1.msra.mxu0 %v5637_v8  ;;  %4777 = vmatpush3.msra.mxu1 %v5744_v36 }
 0x149   :  { %883 = vmatprep.subr.mxu0 %v5644_v10  ;;  %4778 = vmatprep.subr.mxu1 %v7538_v14 }
 0x14a   :  { %884 = vmatpush1.msra.mxu0 %v5647_v11  ;;  %4779 = vmatpush3.msra.mxu1 %v5765_v42 }
 0x14b   :  { %885 = vmatprep.subr.mxu0 %v5650_v12  ;;  %4780 = vmatprep.subr.mxu1 %v7538_v14 }
 0x14c   :  { %886 = vmatpush1.msra.mxu0 %v5654_v13  ;;  %4781 = vmatpush3.msra.mxu1 %v5786_v48 }
 0x14d   :  { %887 = vmatprep.subr.mxu0 %v5663_v15  ;;  %4782 = vmatprep.subr.mxu1 %v7538_v14 }
 0x14e   :  { %888 = vmatpush1.msra.mxu0 %v5666_v16  ;;  %4783 = vmatpush3.msra.mxu1 %v5792_v49 }
 0x14f   :  { %889 = vmatprep.subr.mxu0 %v5669_v17  ;;  %4784 = vmatprep.subr.mxu1 %v7538_v14 }
 0x150   :  { %890 = vmatpush1.msra.mxu0 %v5674_v18  ;;  %4785 = vmatpush3.msra.mxu1 %v5798_v50 }
 0x151   :  { %891 = vmatprep.subr.mxu0 %v5683_v20  ;;  %4786 = vmatprep.subr.mxu1 %v7538_v14 }
 0x152   :  { %892 = vmatpush1.msra.mxu0 %v5686_v21  ;;  %4787 = vmatpush3.msra.mxu1 %v5804_v51 }
 0x153   :  { %893 = vmatprep.subr.mxu0 %v5692_v23  ;;  %4788 = vmatprep.subr.mxu1 %v7538_v14  ;;  %v7539_v23 = vld [vmem:[#allocation16_spill] sm:$0xff] }
 0x154   :  { %894 = vmatpush1.msra.mxu0 %v5697_v24  ;;  %4789 = vmatpush3.msra.mxu1 %v5812_v52  ;;  %v7540_v24 = vld [vmem:[#allocation14_spill] sm:$0xff] }
 0x155   :  { %895 = vmatprep.subr.mxu0 %v5706_v26  ;;  %4790 = vmatprep.subr.mxu1 %v7538_v14  ;;  %v7541_v26 = vld [vmem:[#allocation15_spill] sm:$0xff] }
 0x156   :  { %896 = vmatpush1.msra.mxu0 %v5709_v27  ;;  %4791 = vmatpush3.msra.mxu1 %v5818_v53  ;;  %v7542_v27 = vld [vmem:[#allocation17_spill] sm:$0xff] }
 0x157   :  { %897 = vmatprep.subr.mxu0 %v5712_v28  ;;  %4792 = vmatprep.subr.mxu1 %v7538_v14  ;;  %v7543_v28 = vld [vmem:[#allocation13_spill] sm:$0xff] }
 0x158   :  { %898 = vmatpush1.msra.mxu0 %v5718_v29  ;;  %4793 = vmatpush3.msra.mxu1 %v5825_v54 }
 0x159   :  { %899 = vmatprep.subr.mxu0 %v5729_v32  ;;  %4794 = vmatprep.subr.mxu1 %v7538_v14 }
 0x15a   :  { %900 = vmatpush1.msra.mxu0 %v5732_v33  ;;  %4795 = vmatpush3.msra.mxu1 %v5831_v55  ;;  %v7544_v33 = vld [vmem:[#allocation19_spill] sm:$0xff] }
 0x15b   :  { %901 = vmatprep.subr.mxu0 %v5736_v34  ;;  %4796 = vmatprep.subr.mxu1 %v7538_v14 }
 0x15c   :  { %902 = vmatpush1.msra.mxu0 %v5742_v35  ;;  %4797 = vmatpush3.msra.mxu1 %v5838_v56 }
 0x15d   :  { %903 = vmatprep.subr.mxu0 %v5751_v38  ;;  %4798 = vmatprep.subr.mxu1 %v7538_v14 }
 0x15e   :  { %904 = vmatpush1.msra.mxu0 %v5754_v39  ;;  %4799 = vmatpush3.msra.mxu1 %v5844_v57 }
 0x15f   :  { %905 = vmatprep.subr.mxu0 %v5758_v40  ;;  %4800 = vmatprep.subr.mxu1 %v7538_v14  ;;  %v7545_v40 = vld [vmem:[#allocation20_spill] sm:$0xff] }
 0x160   :  { %906 = vmatpush1.msra.mxu0 %v5763_v41  ;;  %4801 = vmatpush3.msra.mxu1 %v5850_v58 }
 0x161   :  { %907 = vmatprep.subr.mxu0 %v5772_v44  ;;  %4802 = vmatprep.subr.mxu1 %v7538_v14 }
 0x162   :  { %908 = vmatpush1.msra.mxu0 %v5775_v45  ;;  %4803 = vmatpush3.msra.mxu1 %v7539_v23 }
 0x163   :  { %909 = vmatprep.subr.mxu0 %v7540_v24  ;;  %4804 = vmatprep.subr.mxu1 %v7538_v14 }
 0x164   :  { %910 = vmatpush1.msra.mxu0 %v7541_v26  ;;  %943 = vmatprep.mubr.f32.mxu0 %v7538_v14 }
 0x165   :  { %4805 = vmatpush3.msra.mxu1 %v7542_v27  ;;  %4806 = vmatprep.mubr.msk.f32.mxu1 %vm5545_vm1, %v7538_v14 }
 0x166   :  { %1106 = vmatprep.subr.mxu0 %v7543_v28  ;;  %4809 = vmatprep.subr.mxu1 %v7538_v14 }
 0x205   :  { %v718_v29 = vpop.f32.mrf.mxu0  ;;  %v789_v32 = vpop.f32.mrf.mxu1 }
 0x206   :  { %v799_v34 = vadd.f32 %v718_v29, %v7544_v33  ;;  %v820_v47 = vadd.f32 %v5984_v3, %v789_v32 }
 0x207   :  { %v4773_v35 = vpop.f32.mrf.mxu1  ;;  %v720_v39 = vpop.f32.mrf.mxu0 }
 0x208   :  { %v4338_v38 = vmul.f32 -1.442695, %v799_v34  ;;  %v806_v41 = vadd.f32 %v720_v39, %v7545_v40 }
 0x20a   :  { %5325 = vpow2.f32 %v4338_v38  ;;  %v4339_v44 = vmul.f32 -1.442695, %v806_v41 }
 0x20c   :  { %5327 = vpow2.f32 %v4339_v44  ;;  %v6184_v44 = vld [vmem:[#allocation6 + $0x168] sm:$0xff] }
 0x217   :  { %v5326_v45 = vpop.eup %5325 }
 0x218   :  { %v803_v61 = vadd.f32 1.0, %v5326_v45  ;;  %v6186_v45 = vld [vmem:[#allocation6 + $0x178] sm:$0xff] }
 0x219   :  { %v5328_v25 = vpop.eup %5327 }
 0x21a   :  { %5329 = vrcp.f32 %v803_v61  ;;  %v810_v2 = vadd.f32 1.0, %v5328_v25  ;;  %v6190_v61 = vld [vmem:[#allocation6 + $0x158] sm:$0xff]  ;;  %v6194_v25 = vld [vmem:[#allocation6 + $0x150] sm:$0xff] }
 0x227   :  { %v5330_v4 = vpop.eup %5329 }
 0x228   :  { %v821_v19 = vmul.f32 %v5330_v4, %v820_v47  ;;  %v6196_v47 = vld [vmem:[#allocation6 + $0x160] sm:$0xff] }
 0x229   :  { %v6200_v4 = vld [vmem:[#allocation6 + $0x140] sm:$0xff] }
 0x22a   :  { %v822_v5 = vadd.f32 %v821_v19, %v7546_v9  ;;  %v6204_v19 = vld [vmem:[#allocation6 + $0x138] sm:$0xff]  ;;  %v6206_v9 = vld [vmem:[#allocation6 + $0x148] sm:$0xff] }
 0x22c   :  { %5331 = vtanh.f32 %v822_v5  ;;  %v6210_v5 = vld [vmem:[#allocation6 + $0x128] sm:$0xff] }
 0x22d   :  { %5333 = vrcp.f32 %v810_v2  ;;  %v6214_v2 = vld [vmem:[#allocation6 + $0x120] sm:$0xff] }
 0x239   :  { %v5332_v37 = vpop.eup %5331 }
 0x23a   :  { %v824_v43 = vsub.f32 %v5987_v62, %v5332_v37  ;;  %v5334_v31 = vpop.eup %5333 }
 0x23c   :  { %v825_v22 = vmul.f32 %v5334_v31, %v824_v43  ;;  %v6220_v43 = vld [vmem:[#allocation6 + $0x110] sm:$0xff]  ;;  %v6224_v31 = vld [vmem:[#allocation6 + $0x108] sm:$0xff] }
 0x23e   :  { %v6063_v59 = vadd.f32 %v5332_v37, %v825_v22  ;;  %v6216_v37 = vld [vmem:[#allocation6 + $0x130] sm:$0xff]  ;;  %v6226_v22 = vld [vmem:[#allocation6 + $0x118] sm:$0xff] }
 0x240   :  { %7547 = vst [vmem:[#allocation16_spill] sm:$0xff] %v6063_v59  ;;  %944 = vmatmul.mubr.f32.vlgmr.msra.gmra.mxu0 %v6063_v59  ;;  %4807 = vmatmul.mubr.f32.vlgmr.msra.gmra.mxu1 %v6063_v59 }
 0x241   :  { %1107 = vmatpush1.msra.mxu0 %v5630_v6  ;;  %4810 = vmatpush3.msra.mxu1 %v5720_v30  ;;  %v6115_v6 = vld [vmem:[#allocation6 + $0xc8] sm:$0xff]  ;;  %v6152_v30 = vld [vmem:[#allocation6 + $0x30] sm:$0xff] }
 0x242   :  { %1108 = vmatprep.subr.mxu0 %v5633_v7  ;;  %4811 = vmatprep.subr.mxu1 %v7538_v14  ;;  %v6117_v7 = vld [vmem:[#allocation6 + $0xc0] sm:$0xff] }
 0x243   :  { %1109 = vmatpush1.msra.mxu0 %v5637_v8  ;;  %4812 = vmatpush3.msra.mxu1 %v5744_v36  ;;  %v6119_v8 = vld [vmem:[#allocation6 + $0xb0] sm:$0xff]  ;;  %v6155_v36 = vld [vmem:[#allocation6 + $0x20] sm:$0xff] }
 0x244   :  { %1110 = vmatprep.subr.mxu0 %v5644_v10  ;;  %4813 = vmatprep.subr.mxu1 %v7538_v14  ;;  %v6122_v10 = vld [vmem:[#allocation6 + $0xa8] sm:$0xff] }
 0x245   :  { %1111 = vmatpush1.msra.mxu0 %v5647_v11  ;;  %4814 = vmatpush3.msra.mxu1 %v5765_v42  ;;  %v6125_v11 = vld [vmem:[#allocation6 + $0x98] sm:$0xff] }
 0x246   :  { %1112 = vmatprep.subr.mxu0 %v5650_v12  ;;  %4815 = vmatprep.subr.mxu1 %v7538_v14  ;;  %v6128_v12 = vld [vmem:[#allocation6 + $0x90] sm:$0xff]  ;;  %v6158_v42 = vld [vmem:[#allocation6 + $0x18] sm:$0xff] }
 0x247   :  { %1113 = vmatpush1.msra.mxu0 %v5654_v13  ;;  %4816 = vmatpush3.msra.mxu1 %v5786_v48  ;;  %v6131_v13 = vld [vmem:[#allocation6 + $0x80] sm:$0xff]  ;;  %7548 = vst [vmem:[#allocation14_spill] sm:$0xff] %v6158_v42  ;;  %v6161_v48 = vld [vmem:[#allocation6 + $0x8] sm:$0xff] }
 0x248   :  { %1114 = vmatprep.subr.mxu0 %v5663_v15  ;;  %4817 = vmatprep.subr.mxu1 %v7538_v14  ;;  %v6134_v15 = vld [vmem:[#allocation6 + $0x78] sm:$0xff]  ;;  %7549 = vst [vmem:[#allocation15_spill] sm:$0xff] %v6161_v48 }
 0x249   :  { %1115 = vmatpush1.msra.mxu0 %v5666_v16  ;;  %4818 = vmatpush3.msra.mxu1 %v5792_v49  ;;  %v6137_v16 = vld [vmem:[#allocation6 + $0x68] sm:$0xff]  ;;  %v6164_v49 = vld [vmem:[#allocation6] sm:$0xff] }
 0x24a   :  { %1116 = vmatprep.subr.mxu0 %v5669_v17  ;;  %4819 = vmatprep.subr.mxu1 %v7538_v14  ;;  %v6140_v17 = vld [vmem:[#allocation6 + $0x60] sm:$0xff]  ;;  %7550 = vst [vmem:[#allocation17_spill] sm:$0xff] %v6164_v49 }
 0x24b   :  { %1117 = vmatpush1.msra.mxu0 %v5674_v18  ;;  %4820 = vmatpush3.msra.mxu1 %v5798_v50  ;;  %v6143_v18 = vld [vmem:[#allocation6 + $0x50] sm:$0xff] }
 0x24c   :  { %1118 = vmatprep.subr.mxu0 %v5683_v20  ;;  %4821 = vmatprep.subr.mxu1 %v7538_v14  ;;  %v6146_v20 = vld [vmem:[#allocation6 + $0x48] sm:$0xff] }
 0x24d   :  { %1119 = vmatpush1.msra.mxu0 %v5686_v21  ;;  %4822 = vmatpush3.msra.mxu1 %v5804_v51  ;;  %v6149_v21 = vld [vmem:[#allocation6 + $0x38] sm:$0xff] }
 0x24e   :  { %4823 = vmatprep.subr.mxu1 %v7538_v14  ;;  %1170 = vmatprep.mubr.f32.mxu0 %v7538_v14 }
 0x24f   :  { %4824 = vmatpush3.msra.mxu1 %v5812_v52  ;;  %4841 = vmatprep.mubr.msk.f32.mxu1 %vm5545_vm1, %v7538_v14  ;;  %v7551_v52 = vld [vmem:[#allocation21_spill] sm:$0xff] }
 0x250   :  { %4825 = vmatprep.subr.mxu1 %v7538_v14  ;;  %1120 = vmatprep.subr.mxu0 %v6115_v6 }
 0x251   :  { %4826 = vmatpush3.msra.mxu1 %v5818_v53  ;;  %1121 = vmatpush1.msra.mxu0 %v6117_v7 }
 0x252   :  { %4827 = vmatprep.subr.mxu1 %v7538_v14  ;;  %1122 = vmatprep.subr.mxu0 %v6119_v8 }
 0x253   :  { %4828 = vmatpush3.msra.mxu1 %v5825_v54  ;;  %1123 = vmatpush1.msra.mxu0 %v6122_v10 }
 0x254   :  { %4829 = vmatprep.subr.mxu1 %v7538_v14  ;;  %1124 = vmatprep.subr.mxu0 %v6125_v11 }
 0x255   :  { %4830 = vmatpush3.msra.mxu1 %v5831_v55  ;;  %1125 = vmatpush1.msra.mxu0 %v6128_v12 }
 0x256   :  { %4831 = vmatprep.subr.mxu1 %v7538_v14  ;;  %1126 = vmatprep.subr.mxu0 %v6131_v13 }
 0x257   :  { %4832 = vmatpush3.msra.mxu1 %v5838_v56  ;;  %1127 = vmatpush1.msra.mxu0 %v6134_v15 }
 0x258   :  { %4833 = vmatprep.subr.mxu1 %v7538_v14  ;;  %1128 = vmatprep.subr.mxu0 %v6137_v16 }
 0x259   :  { %4834 = vmatpush3.msra.mxu1 %v5844_v57  ;;  %1129 = vmatpush1.msra.mxu0 %v6140_v17  ;;  %v7552_v57 = vld [vmem:[#allocation22_spill] sm:$0xff] }
 0x25a   :  { %4835 = vmatprep.subr.mxu1 %v7538_v14  ;;  %1130 = vmatprep.subr.mxu0 %v6143_v18 }
 0x25b   :  { %4836 = vmatpush3.msra.mxu1 %v5850_v58  ;;  %1131 = vmatpush1.msra.mxu0 %v6146_v20 }
 0x25c   :  { %4837 = vmatprep.subr.mxu1 %v7538_v14  ;;  %1132 = vmatprep.subr.mxu0 %v6149_v21 }
 0x25d   :  { %4838 = vmatpush3.msra.mxu1 %v7539_v23  ;;  %1133 = vmatpush1.msra.mxu0 %v6152_v30 }
 0x25e   :  { %4839 = vmatprep.subr.mxu1 %v7538_v14  ;;  %1134 = vmatprep.subr.mxu0 %v6155_v36 }
 0x25f   :  { %4840 = vmatpush3.msra.mxu1 %v7542_v27  ;;  %1135 = vmatpush1.msra.mxu0 %v6158_v42 }
 0x260   :  { %4844 = vmatprep.subr.mxu1 %v7538_v14  ;;  %1136 = vmatprep.subr.mxu0 %v6161_v48 }
 0x261   :  { %1137 = vmatpush1.msra.mxu0 %v6164_v49 }
 0x300   :  { %v945_v50 = vpop.f32.mrf.mxu0  ;;  %v1016_v51 = vpop.f32.mrf.mxu1 }
 0x301   :  { %v1026_v53 = vadd.f32 %v945_v50, %v7551_v52  ;;  %v1047_v28 = vadd.f32 %v5984_v3, %v1016_v51  ;;  %v6230_v50 = vld [vmem:[#allocation6 + $0xf8] sm:$0xff]  ;;  %v6234_v51 = vld [vmem:[#allocation6 + $0xf0] sm:$0xff]  ;;  %v6236_v52 = vld [vmem:[#allocation6 + $0x100] sm:$0xff] }
 0x302   :  { %v4808_v54 = vpop.f32.mrf.mxu1  ;;  %v947_v56 = vpop.f32.mrf.mxu0 }
 0x303   :  { %v4341_v55 = vmul.f32 -1.442695, %v1026_v53  ;;  %v1033_v58 = vadd.f32 %v947_v56, %v7552_v57  ;;  %v6240_v53 = vld [vmem:[#allocation6 + $0xe0] sm:$0xff]  ;;  %v6244_v54 = vld [vmem:[#allocation6 + $0xd8] sm:$0xff]  ;;  %v6248_v56 = vld [vmem:[#allocation6 + $0xd0] sm:$0xff] }
 0x304   :  { %v6254_v57 = vld [vmem:[#allocation6 + $0xb8] sm:$0xff] }
 0x305   :  { %5335 = vpow2.f32 %v4341_v55  ;;  %v4342_v23 = vmul.f32 -1.442695, %v1033_v58  ;;  %v6246_v55 = vld [vmem:[#allocation6 + $0xe8] sm:$0xff]  ;;  %v6260_v58 = vld [vmem:[#allocation6 + $0xa0] sm:$0xff] }
 0x307   :  { %5337 = vpow2.f32 %v4342_v23  ;;  %v6266_v23 = vld [vmem:[#allocation6 + $0x88] sm:$0xff] }
 0x312   :  { %v5336_v24 = vpop.eup %5335 }
 0x313   :  { %v1030_v26 = vadd.f32 1.0, %v5336_v24  ;;  %v6272_v24 = vld [vmem:[#allocation6 + $0x70] sm:$0xff] }
 0x314   :  { %v5338_v27 = vpop.eup %5337 }
 0x315   :  { %5339 = vrcp.f32 %v1030_v26  ;;  %v1037_v34 = vadd.f32 1.0, %v5338_v27  ;;  %v6278_v26 = vld [vmem:[#allocation6 + $0x58] sm:$0xff]  ;;  %v6284_v27 = vld [vmem:[#allocation6 + $0x40] sm:$0xff] }
 0x322   :  { %v5340_v29 = vpop.eup %5339 }
 0x323   :  { %v1048_v32 = vmul.f32 %v5340_v29, %v1047_v28  ;;  %v6290_v28 = vld [vmem:[#allocation6 + $0x28] sm:$0xff]  ;;  %v6296_v29 = vld [vmem:[#allocation6 + $0x10] sm:$0xff] }
 0x324   :  { %7555 = vst [vmem:[#allocation20_spill] sm:$0xff] %v6290_v28  ;;  %7556 = vst [vmem:[#allocation27_spill] sm:$0xff] %v6296_v29 }
 0x325   :  { %v1049_v33 = vadd.f32 %v1048_v32, %v5971_v63  ;;  %v6181_v63 = vld [vmem:[#allocation6 + $0x170] sm:$0xff] }
 0x326   :  { %7554 = vst [vmem:[#allocation19_spill] sm:$0xff] %v6181_v63  ;;  %1333 = vmatprep.subr.mxu0 %v6181_v63 }
 0x327   :  { %5341 = vtanh.f32 %v1049_v33 }
 0x328   :  { %5343 = vrcp.f32 %v1037_v34  ;;  %v7557_v34 = vld [vmem:[#allocation23_spill] sm:$0xff] }
 0x334   :  { %v5342_v35 = vpop.eup %5341 }
 0x335   :  { %v1051_v38 = vsub.f32 %v6063_v59, %v5342_v35  ;;  %v5344_v39 = vpop.eup %5343  ;;  %v7558_v59 = vld [vmem:[#allocation24_spill] sm:$0xff] }
 0x337   :  { %v1052_v40 = vmul.f32 %v5344_v39, %v1051_v38 }
 0x339   :  { %v6174_v41 = vadd.f32 %v5342_v35, %v1052_v40 }
 0x33b   :  { %7553 = vst [vmem:[#allocation13_spill] sm:$0xff] %v6174_v41  ;;  %1171 = vmatmul.mubr.f32.vlgmr.msra.gmra.mxu0 %v6174_v41  ;;  %4842 = vmatmul.mubr.f32.vlgmr.msra.gmra.mxu1 %v6174_v41 }
 0x33c   :  { %1397 = vmatprep.mubr.f32.mxu0 %v7538_v14  ;;  %4876 = vmatprep.mubr.msk.f32.mxu1 %vm5545_vm1, %v7538_v14 }
 0x33d   :  { %1334 = vmatpush1.msra.mxu0 %v6184_v44  ;;  %4845 = vmatpush3.msra.mxu1 %v6186_v45 }
 0x33e   :  { %1335 = vmatprep.subr.mxu0 %v6190_v61  ;;  %4846 = vmatprep.subr.mxu1 %v7538_v14 }
 0x33f   :  { %1336 = vmatpush1.msra.mxu0 %v6194_v25  ;;  %4847 = vmatpush3.msra.mxu1 %v6196_v47 }
 0x340   :  { %1337 = vmatprep.subr.mxu0 %v6200_v4  ;;  %4848 = vmatprep.subr.mxu1 %v7538_v14 }
 0x341   :  { %1338 = vmatpush1.msra.mxu0 %v6204_v19  ;;  %4849 = vmatpush3.msra.mxu1 %v6206_v9 }
 0x342   :  { %1339 = vmatprep.subr.mxu0 %v6210_v5  ;;  %4850 = vmatprep.subr.mxu1 %v7538_v14 }
 0x343   :  { %1340 = vmatpush1.msra.mxu0 %v6214_v2  ;;  %4851 = vmatpush3.msra.mxu1 %v6216_v37 }
 0x344   :  { %1341 = vmatprep.subr.mxu0 %v6220_v43  ;;  %4852 = vmatprep.subr.mxu1 %v7538_v14 }
 0x345   :  { %1342 = vmatpush1.msra.mxu0 %v6224_v31  ;;  %4853 = vmatpush3.msra.mxu1 %v6226_v22 }
 0x346   :  { %1343 = vmatprep.subr.mxu0 %v6230_v50  ;;  %4854 = vmatprep.subr.mxu1 %v7538_v14 }
 0x347   :  { %1344 = vmatpush1.msra.mxu0 %v6234_v51  ;;  %4855 = vmatpush3.msra.mxu1 %v6236_v52 }
 0x348   :  { %1345 = vmatprep.subr.mxu0 %v6240_v53  ;;  %4856 = vmatprep.subr.mxu1 %v7538_v14 }
 0x349   :  { %1346 = vmatpush1.msra.mxu0 %v6244_v54  ;;  %4857 = vmatpush3.msra.mxu1 %v6246_v55 }
 0x34a   :  { %1347 = vmatprep.subr.mxu0 %v6115_v6  ;;  %4858 = vmatprep.subr.mxu1 %v7538_v14 }
 0x34b   :  { %1348 = vmatpush1.msra.mxu0 %v6117_v7  ;;  %4859 = vmatpush3.msra.mxu1 %v6248_v56 }
 0x34c   :  { %1349 = vmatprep.subr.mxu0 %v6119_v8  ;;  %4860 = vmatprep.subr.mxu1 %v7538_v14 }
 0x34d   :  { %1350 = vmatpush1.msra.mxu0 %v6122_v10  ;;  %4861 = vmatpush3.msra.mxu1 %v6254_v57 }
 0x34e   :  { %1351 = vmatprep.subr.mxu0 %v6125_v11  ;;  %4862 = vmatprep.subr.mxu1 %v7538_v14 }
 0x34f   :  { %1352 = vmatpush1.msra.mxu0 %v6128_v12  ;;  %4863 = vmatpush3.msra.mxu1 %v6260_v58 }
 0x350   :  { %1353 = vmatprep.subr.mxu0 %v6131_v13  ;;  %4864 = vmatprep.subr.mxu1 %v7538_v14 }
 0x351   :  { %1354 = vmatpush1.msra.mxu0 %v6134_v15  ;;  %4865 = vmatpush3.msra.mxu1 %v6266_v23 }
 0x352   :  { %1355 = vmatprep.subr.mxu0 %v6137_v16  ;;  %4866 = vmatprep.subr.mxu1 %v7538_v14 }
 0x353   :  { %1356 = vmatpush1.msra.mxu0 %v6140_v17  ;;  %4867 = vmatpush3.msra.mxu1 %v6272_v24 }
 0x354   :  { %1357 = vmatprep.subr.mxu0 %v6143_v18  ;;  %4868 = vmatprep.subr.mxu1 %v7538_v14 }
 0x355   :  { %1358 = vmatpush1.msra.mxu0 %v6146_v20  ;;  %4869 = vmatpush3.msra.mxu1 %v6278_v26 }
 0x356   :  { %1359 = vmatprep.subr.mxu0 %v6149_v21  ;;  %4870 = vmatprep.subr.mxu1 %v7538_v14 }
 0x357   :  { %1360 = vmatpush1.msra.mxu0 %v6152_v30  ;;  %4871 = vmatpush3.msra.mxu1 %v6284_v27 }
 0x358   :  { %1361 = vmatprep.subr.mxu0 %v6155_v36  ;;  %4872 = vmatprep.subr.mxu1 %v7538_v14 }
 0x359   :  { %1362 = vmatpush1.msra.mxu0 %v6158_v42  ;;  %4873 = vmatpush3.msra.mxu1 %v6290_v28 }
 0x35a   :  { %1363 = vmatprep.subr.mxu0 %v6161_v48  ;;  %4874 = vmatprep.subr.mxu1 %v7538_v14 }
 0x35b   :  { %1364 = vmatpush1.msra.mxu0 %v6164_v49  ;;  %4875 = vmatpush3.msra.mxu1 %v6296_v29 }
 0x35c   :  { %1560 = vmatprep.subr.mxu0 %v6181_v63  ;;  %4879 = vmatprep.subr.mxu1 %v7538_v14 }
 0x3fb   :  { %v1172_v32 = vpop.f32.mrf.mxu0  ;;  %v1243_v33 = vpop.f32.mrf.mxu1 }
 0x3fc   :  { %v1253_v35 = vadd.f32 %v1172_v32, %v7557_v34  ;;  %v1274_v63 = vadd.f32 %v5984_v3, %v1243_v33  ;;  %v7563_v3 = vld [vmem:[#allocation27_spill] sm:$0xff] }
 0x3fd   :  { %v4843_v38 = vpop.f32.mrf.mxu1  ;;  %v1174_v40 = vpop.f32.mrf.mxu0 }
 0x3fe   :  { %v4344_v39 = vmul.f32 -1.442695, %v1253_v35  ;;  %v1260_v62 = vadd.f32 %v1174_v40, %v7558_v59 }
 0x400   :  { %5345 = vpow2.f32 %v4344_v39  ;;  %v4345_v1 = vmul.f32 -1.442695, %v1260_v62  ;;  %v7566_v39 = vld [vmem:[#allocation26_spill] sm:$0xff] }
 0x402   :  { %5347 = vpow2.f32 %v4345_v1  ;;  %v7562_v1 = vld [vmem:[#allocation17_spill] sm:$0xff] }
 0x40d   :  { %v5346_v0 = vpop.eup %5345 }
 0x40e   :  { %v1257_v46 = vadd.f32 1.0, %v5346_v0  ;;  %v7560_v0 = vld [vmem:[#allocation20_spill] sm:$0xff] }
 0x40f   :  { %v5348_v29 = vpop.eup %5347 }
 0x410   :  { %5349 = vrcp.f32 %v1257_v46  ;;  %v1264_v42 = vadd.f32 1.0, %v5348_v29  ;;  %v7559_v46 = vld [vmem:[#allocation14_spill] sm:$0xff] }
 0x41d   :  { %v5350_v49 = vpop.eup %5349 }
 0x41e   :  { %v1275_v48 = vmul.f32 %v5350_v49, %v1274_v63  ;;  %v7565_v63 = vld [vmem:[#allocation25_spill] sm:$0xff] }
 0x420   :  { %v1276_v28 = vadd.f32 %v1275_v48, %v5969_v60  ;;  %v7561_v60 = vld [vmem:[#allocation15_spill] sm:$0xff] }
 0x422   :  { %5351 = vtanh.f32 %v1276_v28 }
 0x423   :  { %5353 = vrcp.f32 %v1264_v42  ;;  %v7564_v42 = vld [vmem:[#allocation19_spill] sm:$0xff] }
 0x42f   :  { %v5352_v32 = vpop.eup %5351 }
 0x430   :  { %v1278_v34 = vsub.f32 %v6174_v41, %v5352_v32  ;;  %v5354_v35 = vpop.eup %5353 }
 0x432   :  { %v1279_v59 = vmul.f32 %v5354_v35, %v1278_v34 }
 0x434   :  { %v6311_v62 = vadd.f32 %v5352_v32, %v1279_v59  ;;  %v6387_v59 = vld [vmem:[%s7447_s4] ss:$0 sm:$0xff] }
 0x436   :  { %1398 = vmatmul.mubr.f32.vlgmr.msra.gmra.mxu0 %v6311_v62  ;;  %4877 = vmatmul.mubr.f32.vlgmr.msra.gmra.mxu1 %v6311_v62 }
 0x437   :  { %1561 = vmatpush1.msra.mxu0 %v6184_v44  ;;  %4880 = vmatpush3.msra.mxu1 %v6186_v45 }
 0x438   :  { %1562 = vmatprep.subr.mxu0 %v6190_v61  ;;  %4881 = vmatprep.subr.mxu1 %v7538_v14 }
 0x439   :  { %1563 = vmatpush1.msra.mxu0 %v6194_v25  ;;  %4882 = vmatpush3.msra.mxu1 %v6196_v47 }
 0x43a   :  { %1564 = vmatprep.subr.mxu0 %v6200_v4  ;;  %4883 = vmatprep.subr.mxu1 %v7538_v14 }
 0x43b   :  { %1565 = vmatpush1.msra.mxu0 %v6204_v19  ;;  %4884 = vmatpush3.msra.mxu1 %v6206_v9 }
 0x43c   :  { %1566 = vmatprep.subr.mxu0 %v6210_v5  ;;  %4885 = vmatprep.subr.mxu1 %v7538_v14 }
 0x43d   :  { %1567 = vmatpush1.msra.mxu0 %v6214_v2  ;;  %4886 = vmatpush3.msra.mxu1 %v6216_v37 }
 0x43e   :  { %1568 = vmatprep.subr.mxu0 %v6220_v43  ;;  %4887 = vmatprep.subr.mxu1 %v7538_v14 }
 0x43f   :  { %1569 = vmatpush1.msra.mxu0 %v6224_v31  ;;  %4888 = vmatpush3.msra.mxu1 %v6226_v22 }
 0x440   :  { %1570 = vmatprep.subr.mxu0 %v6230_v50  ;;  %4889 = vmatprep.subr.mxu1 %v7538_v14 }
 0x441   :  { %1571 = vmatpush1.msra.mxu0 %v6234_v51  ;;  %4890 = vmatpush3.msra.mxu1 %v6236_v52 }
 0x442   :  { %1572 = vmatprep.subr.mxu0 %v6240_v53  ;;  %4891 = vmatprep.subr.mxu1 %v7538_v14 }
 0x443   :  { %1573 = vmatpush1.msra.mxu0 %v6244_v54  ;;  %4892 = vmatpush3.msra.mxu1 %v6246_v55 }
 0x444   :  { %1574 = vmatprep.subr.mxu0 %v6115_v6  ;;  %4893 = vmatprep.subr.mxu1 %v7538_v14 }
 0x445   :  { %1575 = vmatpush1.msra.mxu0 %v6117_v7  ;;  %4894 = vmatpush3.msra.mxu1 %v6248_v56 }
 0x446   :  { %1576 = vmatprep.subr.mxu0 %v6119_v8  ;;  %4895 = vmatprep.subr.mxu1 %v7538_v14 }
 0x447   :  { %1577 = vmatpush1.msra.mxu0 %v6122_v10  ;;  %4896 = vmatpush3.msra.mxu1 %v6254_v57 }
 0x448   :  { %1578 = vmatprep.subr.mxu0 %v6125_v11  ;;  %4897 = vmatprep.subr.mxu1 %v7538_v14 }
 0x449   :  { %1579 = vmatpush1.msra.mxu0 %v6128_v12  ;;  %4898 = vmatpush3.msra.mxu1 %v6260_v58 }
 0x44a   :  { %1580 = vmatprep.subr.mxu0 %v6131_v13  ;;  %4899 = vmatprep.subr.mxu1 %v7538_v14 }
 0x44b   :  { %1581 = vmatpush1.msra.mxu0 %v6134_v15  ;;  %4900 = vmatpush3.msra.mxu1 %v6266_v23 }
 0x44c   :  { %1582 = vmatprep.subr.mxu0 %v6137_v16  ;;  %4901 = vmatprep.subr.mxu1 %v7538_v14 }
 0x44d   :  { %1583 = vmatpush1.msra.mxu0 %v6140_v17  ;;  %4902 = vmatpush3.msra.mxu1 %v6272_v24 }
 0x44e   :  { %1584 = vmatprep.subr.mxu0 %v6143_v18  ;;  %4903 = vmatprep.subr.mxu1 %v7538_v14 }
 0x44f   :  { %1585 = vmatpush1.msra.mxu0 %v6146_v20  ;;  %4904 = vmatpush3.msra.mxu1 %v6278_v26 }
 0x450   :  { %1586 = vmatprep.subr.mxu0 %v6149_v21  ;;  %4905 = vmatprep.subr.mxu1 %v7538_v14 }
 0x451   :  { %1587 = vmatpush1.msra.mxu0 %v6152_v30  ;;  %4906 = vmatpush3.msra.mxu1 %v6284_v27 }
 0x452   :  { %1588 = vmatprep.subr.mxu0 %v6155_v36  ;;  %4907 = vmatprep.subr.mxu1 %v7538_v14 }
 0x453   :  { %1589 = vmatpush1.msra.mxu0 %v7559_v46  ;;  %4908 = vmatpush3.msra.mxu1 %v7560_v0 }
 0x454   :  { %1590 = vmatprep.subr.mxu0 %v7561_v60  ;;  %4909 = vmatprep.subr.mxu1 %v7538_v14 }
 0x455   :  { %1591 = vmatpush1.msra.mxu0 %v7562_v1  ;;  %1624 = vmatprep.mubr.f32.mxu0 %v7538_v14 }
 0x456   :  { %4910 = vmatpush3.msra.mxu1 %v7563_v3  ;;  %4911 = vmatprep.mubr.msk.f32.mxu1 %vm5545_vm1, %v7538_v14 }
 0x457   :  { %1787 = vmatprep.subr.mxu0 %v7564_v42  ;;  %4914 = vmatprep.subr.mxu1 %v7538_v14 }
 0x4f6   :  { %v1399_v48 = vpop.f32.mrf.mxu0  ;;  %v1470_v49 = vpop.f32.mrf.mxu1 }
 0x4f7   :  { %v1480_v28 = vadd.f32 %v1399_v48, %v7565_v63  ;;  %v1501_v42 = vadd.f32 %v6387_v59, %v1470_v49 }
 0x4f8   :  { %v4878_v29 = vpop.f32.mrf.mxu1  ;;  %v1401_v38 = vpop.f32.mrf.mxu0 }
 0x4f9   :  { %v4347_v33 = vmul.f32 -1.442695, %v1480_v28  ;;  %v1487_v40 = vadd.f32 %v1401_v38, %v7566_v39  ;;  %v7567_v28 = vld [vmem:[#allocation35_spill] sm:$0xff] }
 0x4fb   :  { %5355 = vpow2.f32 %v4347_v33  ;;  %v4348_v32 = vmul.f32 -1.442695, %v1487_v40 }
 0x4fd   :  { %5357 = vpow2.f32 %v4348_v32 }
 0x508   :  { %v5356_v34 = vpop.eup %5355 }
 0x509   :  { %v1484_v35 = vadd.f32 1.0, %v5356_v34 }
 0x50a   :  { %v5358_v41 = vpop.eup %5357 }
 0x50b   :  { %5359 = vrcp.f32 %v1484_v35  ;;  %v1491_v33 = vadd.f32 1.0, %v5358_v41 }
 0x518   :  { %v5360_v48 = vpop.eup %5359 }
 0x519   :  { %v1502_v63 = vmul.f32 %v5360_v48, %v1501_v42 }
 0x51b   :  { %v1503_v29 = vadd.f32 %v1502_v63, %v7567_v28 }
 0x51d   :  { %5361 = vtanh.f32 %v1503_v29 }
 0x51e   :  { %5363 = vrcp.f32 %v1491_v33 }
 0x52a   :  { %v5362_v38 = vpop.eup %5361 }
 0x52b   :  { %v1505_v39 = vsub.f32 %v6311_v62, %v5362_v38  ;;  %v5364_v40 = vpop.eup %5363 }
 0x52d   :  { %v1506_v32 = vmul.f32 %v5364_v40, %v1505_v39 }
 0x52f   :  { %v6392_v34 = vadd.f32 %v5362_v38, %v1506_v32 }
 0x531   :  { %1625 = vmatmul.mubr.f32.vlgmr.msra.gmra.mxu0 %v6392_v34  ;;  %4912 = vmatmul.mubr.f32.vlgmr.msra.gmra.mxu1 %v6392_v34 }
 0x532   :  { %1788 = vmatpush1.msra.mxu0 %v6184_v44  ;;  %4915 = vmatpush3.msra.mxu1 %v6186_v45 }
 0x533   :  { %1789 = vmatprep.subr.mxu0 %v6190_v61  ;;  %4916 = vmatprep.subr.mxu1 %v7538_v14 }
 0x534   :  { %1790 = vmatpush1.msra.mxu0 %v6194_v25  ;;  %4917 = vmatpush3.msra.mxu1 %v6196_v47 }
 0x535   :  { %1791 = vmatprep.subr.mxu0 %v6200_v4  ;;  %4918 = vmatprep.subr.mxu1 %v7538_v14 }
 0x536   :  { %1792 = vmatpush1.msra.mxu0 %v6204_v19  ;;  %4919 = vmatpush3.msra.mxu1 %v6206_v9 }
 0x537   :  { %1793 = vmatprep.subr.mxu0 %v6210_v5  ;;  %4920 = vmatprep.subr.mxu1 %v7538_v14 }
 0x538   :  { %1794 = vmatpush1.msra.mxu0 %v6214_v2  ;;  %4921 = vmatpush3.msra.mxu1 %v6216_v37 }
 0x539   :  { %1795 = vmatprep.subr.mxu0 %v6220_v43  ;;  %4922 = vmatprep.subr.mxu1 %v7538_v14 }
 0x53a   :  { %1796 = vmatpush1.msra.mxu0 %v6224_v31  ;;  %4923 = vmatpush3.msra.mxu1 %v6226_v22 }
 0x53b   :  { %1797 = vmatprep.subr.mxu0 %v6230_v50  ;;  %4924 = vmatprep.subr.mxu1 %v7538_v14 }
 0x53c   :  { %1798 = vmatpush1.msra.mxu0 %v6234_v51  ;;  %4925 = vmatpush3.msra.mxu1 %v6236_v52 }
 0x53d   :  { %1799 = vmatprep.subr.mxu0 %v6240_v53  ;;  %4926 = vmatprep.subr.mxu1 %v7538_v14 }
 0x53e   :  { %1800 = vmatpush1.msra.mxu0 %v6244_v54  ;;  %4927 = vmatpush3.msra.mxu1 %v6246_v55 }
 0x53f   :  { %1801 = vmatprep.subr.mxu0 %v6115_v6  ;;  %4928 = vmatprep.subr.mxu1 %v7538_v14  ;;  %v7568_v6 = vld [vmem:[#allocation19_spill] sm:$0xff] }
 0x540   :  { %1802 = vmatpush1.msra.mxu0 %v6117_v7  ;;  %4929 = vmatpush3.msra.mxu1 %v6248_v56 }
 0x541   :  { %1803 = vmatprep.subr.mxu0 %v6119_v8  ;;  %4930 = vmatprep.subr.mxu1 %v7538_v14 }
 0x542   :  { %1804 = vmatpush1.msra.mxu0 %v6122_v10  ;;  %4931 = vmatpush3.msra.mxu1 %v6254_v57  ;;  %v7569_v10 = vld [vmem:[#allocation28_spill] sm:$0xff] }
 0x543   :  { %1805 = vmatprep.subr.mxu0 %v6125_v11  ;;  %4932 = vmatprep.subr.mxu1 %v7538_v14 }
 0x544   :  { %1806 = vmatpush1.msra.mxu0 %v6128_v12  ;;  %4933 = vmatpush3.msra.mxu1 %v6260_v58 }
 0x545   :  { %1807 = vmatprep.subr.mxu0 %v6131_v13  ;;  %4934 = vmatprep.subr.mxu1 %v7538_v14 }
 0x546   :  { %1808 = vmatpush1.msra.mxu0 %v6134_v15  ;;  %4935 = vmatpush3.msra.mxu1 %v6266_v23 }
 0x547   :  { %1809 = vmatprep.subr.mxu0 %v6137_v16  ;;  %4936 = vmatprep.subr.mxu1 %v7538_v14  ;;  %v7570_v16 = vld [vmem:[#allocation29_spill] sm:$0xff] }
 0x548   :  { %1810 = vmatpush1.msra.mxu0 %v6140_v17  ;;  %4937 = vmatpush3.msra.mxu1 %v6272_v24 }
 0x549   :  { %1811 = vmatprep.subr.mxu0 %v6143_v18  ;;  %4938 = vmatprep.subr.mxu1 %v7538_v14 }
 0x54a   :  { %1812 = vmatpush1.msra.mxu0 %v6146_v20  ;;  %4939 = vmatpush3.msra.mxu1 %v6278_v26 }
 0x54b   :  { %1813 = vmatprep.subr.mxu0 %v6149_v21  ;;  %4940 = vmatprep.subr.mxu1 %v7538_v14 }
 0x54c   :  { %1814 = vmatpush1.msra.mxu0 %v6152_v30  ;;  %4941 = vmatpush3.msra.mxu1 %v6284_v27 }
 0x54d   :  { %1815 = vmatprep.subr.mxu0 %v6155_v36  ;;  %4942 = vmatprep.subr.mxu1 %v7538_v14 }
 0x54e   :  { %1816 = vmatpush1.msra.mxu0 %v7559_v46  ;;  %4943 = vmatpush3.msra.mxu1 %v7560_v0 }
 0x54f   :  { %1817 = vmatprep.subr.mxu0 %v7561_v60  ;;  %4944 = vmatprep.subr.mxu1 %v7538_v14  ;;  %v7571_v60 = vld [vmem:[#allocation34_spill] sm:$0xff] }
 0x550   :  { %1818 = vmatpush1.msra.mxu0 %v7562_v1  ;;  %1851 = vmatprep.mubr.f32.mxu0 %v7538_v14 }
 0x551   :  { %4945 = vmatpush3.msra.mxu1 %v7563_v3  ;;  %4946 = vmatprep.mubr.msk.f32.mxu1 %vm5545_vm1, %v7538_v14 }
 0x552   :  { %2014 = vmatprep.subr.mxu0 %v7568_v6  ;;  %4949 = vmatprep.subr.mxu1 %v7538_v14 }
 0x5f1   :  { %v1626_v7 = vpop.f32.mrf.mxu0  ;;  %v1697_v8 = vpop.f32.mrf.mxu1 }
 0x5f2   :  { %v1707_v11 = vadd.f32 %v1626_v7, %v7569_v10  ;;  %v1728_v36 = vadd.f32 %v6387_v59, %v1697_v8  ;;  %v7574_v7 = vld [vmem:[#allocation37_spill] sm:$0xff] }
 0x5f3   :  { %v4913_v12 = vpop.f32.mrf.mxu1  ;;  %v1628_v15 = vpop.f32.mrf.mxu0 }
 0x5f4   :  { %v4350_v13 = vmul.f32 -1.442695, %v1707_v11  ;;  %v1714_v17 = vadd.f32 %v1628_v15, %v7570_v16 }
 0x5f6   :  { %5365 = vpow2.f32 %v4350_v13  ;;  %v4351_v18 = vmul.f32 -1.442695, %v1714_v17  ;;  %v2245_v17 = vld [vmem:[#allocation8 + $0x168] sm:$0xff] }
 0x5f8   :  { %5367 = vpow2.f32 %v4351_v18  ;;  %v2243_v18 = vld [vmem:[#allocation8 + $0x158] sm:$0xff] }
 0x603   :  { %v5366_v20 = vpop.eup %5365 }
 0x604   :  { %v1711_v21 = vadd.f32 1.0, %v5366_v20  ;;  %v2244_v20 = vld [vmem:[#allocation8 + $0x160] sm:$0xff] }
 0x605   :  { %v5368_v30 = vpop.eup %5367 }
 0x606   :  { %5369 = vrcp.f32 %v1711_v21  ;;  %v1718_v42 = vadd.f32 1.0, %v5368_v30  ;;  %v2240_v21 = vld [vmem:[#allocation8 + $0x140] sm:$0xff]  ;;  %v2241_v30 = vld [vmem:[#allocation8 + $0x148] sm:$0xff] }
 0x613   :  { %v5370_v41 = vpop.eup %5369 }
 0x614   :  { %v1729_v46 = vmul.f32 %v5370_v41, %v1728_v36  ;;  %v2239_v36 = vld [vmem:[#allocation8 + $0x138] sm:$0xff]  ;;  %v7575_v41 = vld [vmem:[#allocation38_spill] sm:$0xff] }
 0x616   :  { %v1730_v1 = vadd.f32 %v1729_v46, %v7571_v60  ;;  %v2237_v46 = vld [vmem:[#allocation8 + $0x128] sm:$0xff]  ;;  %v2238_v60 = vld [vmem:[#allocation8 + $0x130] sm:$0xff] }
 0x618   :  { %5371 = vtanh.f32 %v1730_v1  ;;  %v2236_v1 = vld [vmem:[#allocation8 + $0x120] sm:$0xff] }
 0x619   :  { %5373 = vrcp.f32 %v1718_v42  ;;  %v2234_v42 = vld [vmem:[#allocation8 + $0x110] sm:$0xff] }
 0x625   :  { %v5372_v49 = vpop.eup %5371 }
 0x626   :  { %v1732_v35 = vsub.f32 %v6392_v34, %v5372_v49  ;;  %v5374_v48 = vpop.eup %5373 }
 0x628   :  { %v1733_v63 = vmul.f32 %v5374_v48, %v1732_v35  ;;  %v2233_v35 = vld [vmem:[#allocation8 + $0x108] sm:$0xff]  ;;  %v2231_v48 = vld [vmem:[#allocation8 + $0xf8] sm:$0xff] }
 0x62a   :  { %v6468_v28 = vadd.f32 %v5372_v49, %v1733_v63  ;;  %v2235_v49 = vld [vmem:[#allocation8 + $0x118] sm:$0xff]  ;;  %v2232_v63 = vld [vmem:[#allocation8 + $0x100] sm:$0xff] }
 0x62c   :  { %1852 = vmatmul.mubr.f32.vlgmr.msra.gmra.mxu0 %v6468_v28  ;;  %4947 = vmatmul.mubr.f32.vlgmr.msra.gmra.mxu1 %v6468_v28 }
 0x62d   :  { %2015 = vmatpush1.msra.mxu0 %v6184_v44  ;;  %4950 = vmatpush3.msra.mxu1 %v6186_v45  ;;  %v1991_v44 = vld [vmem:[#allocation6 + $0xc8] sm:$0xff]  ;;  %v1990_v45 = vld [vmem:[#allocation6 + $0xc0] sm:$0xff] }
 0x62e   :  { %2016 = vmatprep.subr.mxu0 %v6190_v61  ;;  %4951 = vmatprep.subr.mxu1 %v7538_v14  ;;  %v1988_v61 = vld [vmem:[#allocation6 + $0xb0] sm:$0xff] }
 0x62f   :  { %2017 = vmatpush1.msra.mxu0 %v6194_v25  ;;  %4952 = vmatpush3.msra.mxu1 %v6196_v47  ;;  %v1987_v25 = vld [vmem:[#allocation6 + $0xa8] sm:$0xff]  ;;  %v1985_v47 = vld [vmem:[#allocation6 + $0x98] sm:$0xff] }
 0x630   :  { %2018 = vmatprep.subr.mxu0 %v6200_v4  ;;  %4953 = vmatprep.subr.mxu1 %v7538_v14  ;;  %v1984_v4 = vld [vmem:[#allocation6 + $0x90] sm:$0xff] }
 0x631   :  { %2019 = vmatpush1.msra.mxu0 %v6204_v19  ;;  %4954 = vmatpush3.msra.mxu1 %v6206_v9  ;;  %v1982_v19 = vld [vmem:[#allocation6 + $0x80] sm:$0xff]  ;;  %v1981_v9 = vld [vmem:[#allocation6 + $0x78] sm:$0xff] }
 0x632   :  { %2020 = vmatprep.subr.mxu0 %v6210_v5  ;;  %4955 = vmatprep.subr.mxu1 %v7538_v14  ;;  %v1979_v5 = vld [vmem:[#allocation6 + $0x68] sm:$0xff] }
 0x633   :  { %2021 = vmatpush1.msra.mxu0 %v6214_v2  ;;  %4956 = vmatpush3.msra.mxu1 %v6216_v37  ;;  %v2247_v2 = vld [vmem:[#allocation8 + $0x178] sm:$0xff]  ;;  %v1978_v37 = vld [vmem:[#allocation6 + $0x60] sm:$0xff] }
 0x634   :  { %2022 = vmatprep.subr.mxu0 %v6220_v43  ;;  %4957 = vmatprep.subr.mxu1 %v7538_v14  ;;  %v1976_v43 = vld [vmem:[#allocation6 + $0x50] sm:$0xff] }
 0x635   :  { %2023 = vmatpush1.msra.mxu0 %v6224_v31  ;;  %4958 = vmatpush3.msra.mxu1 %v6226_v22  ;;  %v1975_v31 = vld [vmem:[#allocation6 + $0x48] sm:$0xff]  ;;  %v1973_v22 = vld [vmem:[#allocation6 + $0x38] sm:$0xff] }
 0x636   :  { %2024 = vmatprep.subr.mxu0 %v6230_v50  ;;  %4959 = vmatprep.subr.mxu1 %v7538_v14  ;;  %v1972_v50 = vld [vmem:[#allocation6 + $0x30] sm:$0xff] }
 0x637   :  { %2025 = vmatpush1.msra.mxu0 %v6234_v51  ;;  %4960 = vmatpush3.msra.mxu1 %v6236_v52  ;;  %v1970_v51 = vld [vmem:[#allocation6 + $0x20] sm:$0xff]  ;;  %v1969_v52 = vld [vmem:[#allocation6 + $0x18] sm:$0xff] }
 0x638   :  { %2026 = vmatprep.subr.mxu0 %v6240_v53  ;;  %4961 = vmatprep.subr.mxu1 %v7538_v14  ;;  %v1967_v53 = vld [vmem:[#allocation6 + $0x8] sm:$0xff] }
 0x639   :  { %2027 = vmatpush1.msra.mxu0 %v6244_v54  ;;  %4962 = vmatpush3.msra.mxu1 %v6246_v55  ;;  %v1966_v54 = vld [vmem:[#allocation6] sm:$0xff]  ;;  %v2246_v55 = vld [vmem:[#allocation8 + $0x170] sm:$0xff] }
 0x63a   :  { %4963 = vmatprep.subr.mxu1 %v7538_v14  ;;  %2078 = vmatprep.mubr.f32.mxu0 %v7538_v14 }
 0x63b   :  { %4964 = vmatpush3.msra.mxu1 %v6248_v56  ;;  %4981 = vmatprep.mubr.msk.f32.mxu1 %vm5545_vm1, %v7538_v14 }
 0x63c   :  { %4965 = vmatprep.subr.mxu1 %v7538_v14  ;;  %2028 = vmatprep.subr.mxu0 %v1991_v44  ;;  %v2230_v44 = vld [vmem:[#allocation8 + $0xf0] sm:$0xff] }
 0x63d   :  { %4966 = vmatpush3.msra.mxu1 %v6254_v57  ;;  %2029 = vmatpush1.msra.mxu0 %v1990_v45  ;;  %v2228_v45 = vld [vmem:[#allocation8 + $0xe0] sm:$0xff] }
 0x63e   :  { %4967 = vmatprep.subr.mxu1 %v7538_v14  ;;  %2030 = vmatprep.subr.mxu0 %v1988_v61  ;;  %v2229_v61 = vld [vmem:[#allocation8 + $0xe8] sm:$0xff] }
 0x63f   :  { %4968 = vmatpush3.msra.mxu1 %v6260_v58  ;;  %2031 = vmatpush1.msra.mxu0 %v1987_v25  ;;  %v7572_v58 = vld [vmem:[#allocation30_spill] sm:$0xff]  ;;  %v2227_v25 = vld [vmem:[#allocation8 + $0xd8] sm:$0xff] }
 0x640   :  { %4969 = vmatprep.subr.mxu1 %v7538_v14  ;;  %2032 = vmatprep.subr.mxu0 %v1985_v47  ;;  %v2225_v47 = vld [vmem:[#allocation8 + $0xc8] sm:$0xff] }
 0x641   :  { %4970 = vmatpush3.msra.mxu1 %v6266_v23  ;;  %2033 = vmatpush1.msra.mxu0 %v1984_v4  ;;  %v2226_v4 = vld [vmem:[#allocation8 + $0xd0] sm:$0xff] }
 0x642   :  { %4971 = vmatprep.subr.mxu1 %v7538_v14  ;;  %2034 = vmatprep.subr.mxu0 %v1982_v19  ;;  %v2224_v19 = vld [vmem:[#allocation8 + $0xc0] sm:$0xff] }
 0x643   :  { %4972 = vmatpush3.msra.mxu1 %v6272_v24  ;;  %2035 = vmatpush1.msra.mxu0 %v1981_v9  ;;  %v2222_v9 = vld [vmem:[#allocation8 + $0xb0] sm:$0xff] }
 0x644   :  { %4973 = vmatprep.subr.mxu1 %v7538_v14  ;;  %2036 = vmatprep.subr.mxu0 %v1979_v5  ;;  %v2223_v5 = vld [vmem:[#allocation8 + $0xb8] sm:$0xff] }
 0x645   :  { %4974 = vmatpush3.msra.mxu1 %v6278_v26  ;;  %2037 = vmatpush1.msra.mxu0 %v1978_v37  ;;  %v2219_v37 = vld [vmem:[#allocation8 + $0x98] sm:$0xff] }
 0x646   :  { %4975 = vmatprep.subr.mxu1 %v7538_v14  ;;  %2038 = vmatprep.subr.mxu0 %v1976_v43  ;;  %v2220_v43 = vld [vmem:[#allocation8 + $0xa0] sm:$0xff] }
 0x647   :  { %4976 = vmatpush3.msra.mxu1 %v6284_v27  ;;  %2039 = vmatpush1.msra.mxu0 %v1975_v31  ;;  %v2218_v31 = vld [vmem:[#allocation8 + $0x90] sm:$0xff] }
 0x648   :  { %4977 = vmatprep.subr.mxu1 %v7538_v14  ;;  %2040 = vmatprep.subr.mxu0 %v1973_v22  ;;  %v2216_v22 = vld [vmem:[#allocation8 + $0x80] sm:$0xff] }
 0x649   :  { %4978 = vmatpush3.msra.mxu1 %v7560_v0  ;;  %2041 = vmatpush1.msra.mxu0 %v1972_v50  ;;  %v7573_v0 = vld [vmem:[#allocation31_spill] sm:$0xff]  ;;  %v2217_v50 = vld [vmem:[#allocation8 + $0x88] sm:$0xff] }
 0x64a   :  { %4979 = vmatprep.subr.mxu1 %v7538_v14  ;;  %2042 = vmatprep.subr.mxu0 %v1970_v51  ;;  %v2215_v51 = vld [vmem:[#allocation8 + $0x78] sm:$0xff] }
 0x64b   :  { %4980 = vmatpush3.msra.mxu1 %v7563_v3  ;;  %2043 = vmatpush1.msra.mxu0 %v1969_v52  ;;  %v2213_v52 = vld [vmem:[#allocation8 + $0x68] sm:$0xff] }
 0x64c   :  { %4984 = vmatprep.subr.mxu1 %v2247_v2  ;;  %2044 = vmatprep.subr.mxu0 %v1967_v53  ;;  %v2214_v53 = vld [vmem:[#allocation8 + $0x70] sm:$0xff] }
 0x64d   :  { %2045 = vmatpush1.msra.mxu0 %v1966_v54  ;;  %v2212_v54 = vld [vmem:[#allocation8 + $0x60] sm:$0xff] }
 0x64e   :  { %2265 = vmatprep.subr.mxu0 %v2246_v55  ;;  %v2210_v55 = vld [vmem:[#allocation8 + $0x50] sm:$0xff] }
 0x6ec   :  { %v1853_v56 = vpop.f32.mrf.mxu0  ;;  %v1924_v57 = vpop.f32.mrf.mxu1 }
 0x6ed   :  { %v1934_v23 = vadd.f32 %v1853_v56, %v7572_v58  ;;  %v1955_v40 = vadd.f32 %v6387_v59, %v1924_v57  ;;  %v2242_v59 = vld [vmem:[#allocation8 + $0x150] sm:$0xff]  ;;  %v2211_v56 = vld [vmem:[#allocation8 + $0x58] sm:$0xff]  ;;  %v2209_v57 = vld [vmem:[#allocation8 + $0x48] sm:$0xff] }
 0x6ee   :  { %v4948_v24 = vpop.f32.mrf.mxu1  ;;  %v1855_v27 = vpop.f32.mrf.mxu0  ;;  %v2207_v58 = vld [vmem:[#allocation8 + $0x38] sm:$0xff] }
 0x6ef   :  { %v4353_v26 = vmul.f32 -1.442695, %v1934_v23  ;;  %v1941_v3 = vadd.f32 %v1855_v27, %v7573_v0  ;;  %v2208_v23 = vld [vmem:[#allocation8 + $0x40] sm:$0xff]  ;;  %v2206_v24 = vld [vmem:[#allocation8 + $0x30] sm:$0xff]  ;;  %v2205_v27 = vld [vmem:[#allocation8 + $0x28] sm:$0xff] }
 0x6f0   :  { %v2203_v0 = vld [vmem:[#allocation8 + $0x18] sm:$0xff] }
 0x6f1   :  { %5375 = vpow2.f32 %v4353_v26  ;;  %v4354_v29 = vmul.f32 -1.442695, %v1941_v3  ;;  %v2204_v26 = vld [vmem:[#allocation8 + $0x20] sm:$0xff]  ;;  %v2201_v3 = vld [vmem:[#allocation8 + $0x8] sm:$0xff] }
 0x6f3   :  { %5377 = vpow2.f32 %v4354_v29  ;;  %v2202_v29 = vld [vmem:[#allocation8 + $0x10] sm:$0xff] }
 0x6fe   :  { %v5376_v33 = vpop.eup %5375 }
 0x6ff   :  { %v1938_v38 = vadd.f32 1.0, %v5376_v33  ;;  %v2200_v33 = vld [vmem:[#allocation8] sm:$0xff] }
 0x700   :  { %v5378_v39 = vpop.eup %5377 }
 0x701   :  { %5379 = vrcp.f32 %v1938_v38  ;;  %v1945_v10 = vadd.f32 1.0, %v5378_v39  ;;  %v7576_v38 = vld [vmem:[#allocation16_spill] sm:$0xff]  ;;  %v7577_v39 = vld [vmem:[#allocation13_spill] sm:$0xff] }
 0x70e   :  { %v5380_v32 = vpop.eup %5379 }
 0x70f   :  { %v1956_v6 = vmul.f32 %v5380_v32, %v1955_v40  ;;  %v6551_v40 = vld [vmem:[#allocation10 + $0x170] sm:$0xff]  ;;  %v6554_v32 = vld [vmem:[#allocation10 + $0x168] sm:$0xff] }
 0x710   :  { %7578 = vst [vmem:[#allocation21_spill] sm:$0xff] %v6551_v40 }
 0x711   :  { %v1957_v8 = vadd.f32 %v1956_v6, %v7574_v7  ;;  %v6566_v6 = vld [vmem:[#allocation10 + $0x138] sm:$0xff]  ;;  %v6569_v7 = vld [vmem:[#allocation10 + $0x128] sm:$0xff] }
 0x713   :  { %5381 = vtanh.f32 %v1957_v8  ;;  %v6572_v8 = vld [vmem:[#allocation10 + $0x120] sm:$0xff] }
 0x714   :  { %5383 = vrcp.f32 %v1945_v10  ;;  %v6575_v10 = vld [vmem:[#allocation10 + $0x110] sm:$0xff] }
 0x720   :  { %v5382_v11 = vpop.eup %5381 }
 0x721   :  { %v1959_v12 = vsub.f32 %v6468_v28, %v5382_v11  ;;  %v5384_v13 = vpop.eup %5383 }
 0x723   :  { %v1960_v15 = vmul.f32 %v5384_v13, %v1959_v12  ;;  %v6581_v12 = vld [vmem:[#allocation10 + $0xf8] sm:$0xff]  ;;  %v6584_v13 = vld [vmem:[#allocation10 + $0xf0] sm:$0xff] }
 0x725   :  { %v6524_v16 = vadd.f32 %v5382_v11, %v1960_v15  ;;  %v6578_v11 = vld [vmem:[#allocation10 + $0x108] sm:$0xff]  ;;  %v6587_v15 = vld [vmem:[#allocation10 + $0xe0] sm:$0xff] }
 0x727   :  { %2079 = vmatmul.mubr.f32.vlgmr.msra.gmra.mxu0 %v6524_v16  ;;  %4982 = vmatmul.mubr.f32.vlgmr.msra.gmra.mxu1 %v6524_v16 }
 0x728   :  { %2266 = vmatpush1.msra.mxu0 %v2245_v17  ;;  %4985 = vmatpush3.msra.mxu1 %v2247_v2  ;;  %v2221_v2 = vld [vmem:[#allocation8 + $0xa8] sm:$0xff]  ;;  %v6590_v17 = vld [vmem:[#allocation10 + $0xd8] sm:$0xff] }
 0x729   :  { %2267 = vmatprep.subr.mxu0 %v2243_v18  ;;  %4986 = vmatprep.subr.mxu1 %v2244_v20  ;;  %v6593_v18 = vld [vmem:[#allocation10 + $0xc8] sm:$0xff] }
 0x72a   :  { %5016 = vmatprep.mubr.f32.mxu1 %v7575_v41  ;;  %2268 = vmatpush1.msra.mxu0 %v2242_v59  ;;  %v6599_v59 = vld [vmem:[#allocation10 + $0xb0] sm:$0xff] }
 0x72b   :  { %4987 = vmatpush3.msra.mxu1 %v2244_v20  ;;  %2269 = vmatprep.subr.mxu0 %v2240_v21  ;;  %v6596_v20 = vld [vmem:[#allocation10 + $0xc0] sm:$0xff]  ;;  %v6602_v21 = vld [vmem:[#allocation10 + $0xa8] sm:$0xff] }
 0x72c   :  { %4988 = vmatprep.subr.mxu1 %v2241_v30  ;;  %2270 = vmatpush1.msra.mxu0 %v2239_v36  ;;  %v6608_v36 = vld [vmem:[#allocation10 + $0x90] sm:$0xff] }
 0x72d   :  { %4989 = vmatpush3.msra.mxu1 %v2241_v30  ;;  %2271 = vmatprep.subr.mxu0 %v2237_v46  ;;  %v6605_v30 = vld [vmem:[#allocation10 + $0x98] sm:$0xff] }
 0x72e   :  { %4990 = vmatprep.subr.mxu1 %v2238_v60  ;;  %2272 = vmatpush1.msra.mxu0 %v2236_v1  ;;  %v6614_v46 = vld [vmem:[#allocation10 + $0x78] sm:$0xff]  ;;  %v6620_v1 = vld [vmem:[#allocation10 + $0x60] sm:$0xff] }
 0x72f   :  { %4991 = vmatpush3.msra.mxu1 %v2238_v60  ;;  %2273 = vmatprep.subr.mxu0 %v2234_v42  ;;  %v6617_v60 = vld [vmem:[#allocation10 + $0x68] sm:$0xff]  ;;  %v6623_v42 = vld [vmem:[#allocation10 + $0x50] sm:$0xff] }
 0x730   :  { %4992 = vmatprep.subr.mxu1 %v2235_v49  ;;  %2274 = vmatpush1.msra.mxu0 %v2233_v35  ;;  %v6629_v35 = vld [vmem:[#allocation10 + $0x38] sm:$0xff] }
 0x731   :  { %4993 = vmatpush3.msra.mxu1 %v2235_v49  ;;  %2275 = vmatprep.subr.mxu0 %v2231_v48  ;;  %v6626_v49 = vld [vmem:[#allocation10 + $0x48] sm:$0xff]  ;;  %v6632_v48 = vld [vmem:[#allocation10 + $0x30] sm:$0xff] }
 0x732   :  { %4994 = vmatprep.subr.mxu1 %v2232_v63  ;;  %2276 = vmatpush1.msra.mxu0 %v2230_v44  ;;  %v6637_v44 = vld [vmem:[#allocation10 + $0x18] sm:$0xff] }
 0x733   :  { %4995 = vmatpush3.msra.mxu1 %v2232_v63  ;;  %2277 = vmatprep.subr.mxu0 %v2228_v45  ;;  %v6635_v63 = vld [vmem:[#allocation10 + $0x20] sm:$0xff]  ;;  %7579 = vst [vmem:[#allocation22_spill] sm:$0xff] %v6637_v44  ;;  %v6639_v45 = vld [vmem:[#allocation10 + $0x8] sm:$0xff] }
 0x734   :  { %4996 = vmatprep.subr.mxu1 %v2229_v61  ;;  %2278 = vmatpush1.msra.mxu0 %v2227_v25  ;;  %7580 = vst [vmem:[#allocation23_spill] sm:$0xff] %v6639_v45  ;;  %v6646_v25 = vld [vmem:[#allocation10 + $0x178] sm:$0xff] }
 0x735   :  { %4997 = vmatpush3.msra.mxu1 %v2229_v61  ;;  %2279 = vmatprep.subr.mxu0 %v2225_v47  ;;  %v6642_v61 = vld [vmem:[#allocation10] sm:$0xff] }
 0x736   :  { %4998 = vmatprep.subr.mxu1 %v2226_v4  ;;  %2280 = vmatpush1.msra.mxu0 %v2224_v19  ;;  %7581 = vst [vmem:[#allocation24_spill] sm:$0xff] %v6642_v61  ;;  %v6648_v47 = vld [vmem:[#allocation10 + $0x160] sm:$0xff]  ;;  %v6658_v19 = vld [vmem:[#allocation10 + $0x130] sm:$0xff] }
 0x737   :  { %4999 = vmatpush3.msra.mxu1 %v2226_v4  ;;  %2281 = vmatprep.subr.mxu0 %v2222_v9  ;;  %v6653_v4 = vld [vmem:[#allocation10 + $0x148] sm:$0xff]  ;;  %v6662_v9 = vld [vmem:[#allocation10 + $0x118] sm:$0xff] }
 0x738   :  { %5000 = vmatprep.subr.mxu1 %v2223_v5  ;;  %2282 = vmatpush1.msra.mxu0 %v2221_v2  ;;  %v6670_v2 = vld [vmem:[#allocation10 + $0xe8] sm:$0xff] }
 0x739   :  { %5001 = vmatpush3.msra.mxu1 %v2223_v5  ;;  %2283 = vmatprep.subr.mxu0 %v2219_v37  ;;  %v6666_v5 = vld [vmem:[#allocation10 + $0x100] sm:$0xff]  ;;  %v6674_v37 = vld [vmem:[#allocation10 + $0xd0] sm:$0xff] }
 0x73a   :  { %5002 = vmatprep.subr.mxu1 %v2220_v43  ;;  %2284 = vmatpush1.msra.mxu0 %v2218_v31  ;;  %v6682_v31 = vld [vmem:[#allocation10 + $0xa0] sm:$0xff] }
 0x73b   :  { %5003 = vmatpush3.msra.mxu1 %v2220_v43  ;;  %2285 = vmatprep.subr.mxu0 %v2216_v22  ;;  %v6678_v43 = vld [vmem:[#allocation10 + $0xb8] sm:$0xff]  ;;  %v6686_v22 = vld [vmem:[#allocation10 + $0x88] sm:$0xff] }
 0x73c   :  { %5004 = vmatprep.subr.mxu1 %v2217_v50  ;;  %2286 = vmatpush1.msra.mxu0 %v2215_v51  ;;  %v6694_v51 = vld [vmem:[#allocation10 + $0x58] sm:$0xff] }
 0x73d   :  { %5005 = vmatpush3.msra.mxu1 %v2217_v50  ;;  %2287 = vmatprep.subr.mxu0 %v2213_v52  ;;  %v6690_v50 = vld [vmem:[#allocation10 + $0x70] sm:$0xff]  ;;  %v6698_v52 = vld [vmem:[#allocation10 + $0x40] sm:$0xff] }
 0x73e   :  { %5006 = vmatprep.subr.mxu1 %v2214_v53  ;;  %2288 = vmatpush1.msra.mxu0 %v2212_v54  ;;  %v6706_v54 = vld [vmem:[#allocation10 + $0x10] sm:$0xff] }
 0x73f   :  { %5007 = vmatpush3.msra.mxu1 %v2214_v53  ;;  %2289 = vmatprep.subr.mxu0 %v2210_v55  ;;  %v6702_v53 = vld [vmem:[#allocation10 + $0x28] sm:$0xff]  ;;  %7583 = vst [vmem:[#allocation20_spill] sm:$0xff] %v6706_v54 }
 0x740   :  { %5008 = vmatprep.subr.mxu1 %v2211_v56  ;;  %2290 = vmatpush1.msra.mxu0 %v2209_v57  ;;  %7582 = vst [vmem:[#allocation14_spill] sm:$0xff] %v6702_v53  ;;  %v7584_v57 = vld [vmem:[#allocation32_spill] sm:$0xff] }
 0x741   :  { %5009 = vmatpush3.msra.mxu1 %v2211_v56  ;;  %2291 = vmatprep.subr.mxu0 %v2207_v58 }
 0x742   :  { %5010 = vmatprep.subr.mxu1 %v2208_v23  ;;  %2292 = vmatpush1.msra.mxu0 %v2206_v24 }
 0x743   :  { %5011 = vmatpush3.msra.mxu1 %v2208_v23  ;;  %2293 = vmatprep.subr.mxu0 %v2204_v26 }
 0x744   :  { %5012 = vmatprep.subr.mxu1 %v2205_v27  ;;  %2294 = vmatpush1.msra.mxu0 %v2203_v0 }
 0x745   :  { %5013 = vmatpush3.msra.mxu1 %v2205_v27  ;;  %2295 = vmatprep.subr.mxu0 %v2201_v3  ;;  %v7585_v27 = vld [vmem:[#allocation33_spill] sm:$0xff] }
 0x746   :  { %5014 = vmatprep.subr.mxu1 %v2202_v29  ;;  %2296 = vmatpush1.msra.mxu0 %v2200_v33 }
 0x747   :  { %2329 = vmatprep.mubr.f32.mxu0 %v7538_v14  ;;  %5015 = vmatpush3.msra.mxu1 %v2202_v29 }
 0x748   :  { %2330 = vmatmul.mubr.f32.vlgmr.msra.gmra.mxu0 %v7575_v41  ;;  %5017 = vmatmul.mubr.f32.vlgmr.msra.gmra.mxu1 %v7576_v38  ;;  %v6611_v41 = vld [vmem:[#allocation10 + $0x80] sm:$0xff] }
 0x749   :  { %5019 = vmatprep.mubr.f32.mxu1 %v7577_v39  ;;  %2335 = vmatprep.mubr.f32.mxu0 %v7538_v14 }
 0x74a   :  { %5028 = vmatprep.subr.mxu1 %v7538_v14  ;;  %2557 = vmatprep.subr.mxu0 %v6551_v40 }
 0x74b   :  { %2558 = vmatpush1.msra.mxu0 %v6554_v32  ;;  %5029 = vmatpush3.msra.mxu1 %v6646_v25 }
 0x74c   :  { %2336 = vmatmul.mubr.f32.gmra.mxu0 %v7576_v38  ;;  %5020 = vmatmul.mubr.f32.gmra.mxu1 %v6311_v62  ;;  %v4358_v38 = vld [vmem:[%s7447_s4] ss:$0 sm:$0xff] }
 0x74d   :  { %5022 = vmatprep.mubr.f32.mxu1 %v6392_v34  ;;  %2341 = vmatprep.mubr.f32.mxu0 %v7538_v14 }
 0x74e   :  { %5030 = vmatprep.subr.mxu1 %v7538_v14 }
 0x74f   :  { %5031 = vmatpush3.msra.mxu1 %v6648_v47 }
 0x750   :  { %2342 = vmatmul.mubr.f32.gmra.mxu0 %v7577_v39  ;;  %5023 = vmatmul.mubr.f32.gmra.mxu1 %v6468_v28 }
 0x751   :  { %5025 = vmatprep.mubr.f32.mxu1 %v6524_v16  ;;  %2347 = vmatprep.mubr.f32.mxu0 %v7538_v14 }
 0x752   :  { %5032 = vmatprep.subr.mxu1 %v7538_v14 }
 0x753   :  { %5033 = vmatpush3.msra.mxu1 %v6653_v4 }
 0x754   :  { %2348 = vmatmul.mubr.f32.gmra.mxu0 %v6311_v62  ;;  %v6557_v62 = vld [vmem:[#allocation10 + $0x158] sm:$0xff]  ;;  %5034 = vmatprep.subr.mxu1 %v7538_v14 }
 0x755   :  { %2353 = vmatprep.mubr.f32.mxu0 %v7538_v14  ;;  %2559 = vmatprep.subr.mxu0 %v6557_v62 }
 0x756   :  { %5035 = vmatpush3.msra.mxu1 %v6658_v19 }
 0x757   :  { %5036 = vmatprep.subr.mxu1 %v7538_v14 }
 0x758   :  { %2354 = vmatmul.mubr.f32.gmra.mxu0 %v6392_v34  ;;  %v6560_v34 = vld [vmem:[#allocation10 + $0x150] sm:$0xff]  ;;  %5037 = vmatpush3.msra.mxu1 %v6662_v9 }
 0x759   :  { %2359 = vmatprep.mubr.f32.mxu0 %v7538_v14  ;;  %2560 = vmatpush1.msra.mxu0 %v6560_v34 }
 0x75a   :  { %5038 = vmatprep.subr.mxu1 %v7538_v14 }
 0x75b   :  { %5039 = vmatpush3.msra.mxu1 %v6666_v5 }
 0x75c   :  { %2360 = vmatmul.mubr.f32.gmra.mxu0 %v6468_v28  ;;  %v6563_v28 = vld [vmem:[#allocation10 + $0x140] sm:$0xff]  ;;  %5040 = vmatprep.subr.mxu1 %v7538_v14 }
 0x75d   :  { %2365 = vmatprep.mubr.f32.mxu0 %v7538_v14  ;;  %2561 = vmatprep.subr.mxu0 %v6563_v28 }
 0x75e   :  { %2562 = vmatpush1.msra.mxu0 %v6566_v6  ;;  %5041 = vmatpush3.msra.mxu1 %v6670_v2 }
 0x75f   :  { %2563 = vmatprep.subr.mxu0 %v6569_v7  ;;  %5042 = vmatprep.subr.mxu1 %v7538_v14 }
 0x760   :  { %2366 = vmatmul.mubr.f32.gmra.mxu0 %v6524_v16  ;;  %5043 = vmatpush3.msra.mxu1 %v6674_v37 }
 0x761   :  { %2371 = vmatprep.mubr.f32.mxu0 %v7538_v14  ;;  %2564 = vmatpush1.msra.mxu0 %v6572_v8 }
 0x762   :  { %2565 = vmatprep.subr.mxu0 %v6575_v10  ;;  %5044 = vmatprep.subr.mxu1 %v7538_v14 }
 0x763   :  { %2566 = vmatpush1.msra.mxu0 %v6578_v11  ;;  %5045 = vmatpush3.msra.mxu1 %v6678_v43 }
 0x764   :  { %2567 = vmatprep.subr.mxu0 %v6581_v12  ;;  %5046 = vmatprep.subr.mxu1 %v7538_v14 }
 0x765   :  { %2568 = vmatpush1.msra.mxu0 %v6584_v13  ;;  %5047 = vmatpush3.msra.mxu1 %v6682_v31 }
 0x766   :  { %2569 = vmatprep.subr.mxu0 %v6587_v15  ;;  %5048 = vmatprep.subr.mxu1 %v7538_v14 }
 0x767   :  { %2570 = vmatpush1.msra.mxu0 %v6590_v17  ;;  %5049 = vmatpush3.msra.mxu1 %v6686_v22 }
 0x768   :  { %2571 = vmatprep.subr.mxu0 %v6593_v18  ;;  %5050 = vmatprep.subr.mxu1 %v7538_v14 }
 0x769   :  { %2572 = vmatpush1.msra.mxu0 %v6596_v20  ;;  %5051 = vmatpush3.msra.mxu1 %v6690_v50 }
 0x76a   :  { %2573 = vmatprep.subr.mxu0 %v6599_v59  ;;  %5052 = vmatprep.subr.mxu1 %v7538_v14 }
 0x76b   :  { %2574 = vmatpush1.msra.mxu0 %v6602_v21  ;;  %5053 = vmatpush3.msra.mxu1 %v6694_v51 }
 0x76c   :  { %2575 = vmatprep.subr.mxu0 %v6605_v30  ;;  %5054 = vmatprep.subr.mxu1 %v7538_v14 }
 0x76d   :  { %2576 = vmatpush1.msra.mxu0 %v6608_v36  ;;  %5055 = vmatpush3.msra.mxu1 %v6698_v52 }
 0x76e   :  { %2577 = vmatprep.subr.mxu0 %v6611_v41  ;;  %5056 = vmatprep.subr.mxu1 %v7538_v14 }
 0x76f   :  { %2578 = vmatpush1.msra.mxu0 %v6614_v46  ;;  %5057 = vmatpush3.msra.mxu1 %v6702_v53 }
 0x770   :  { %2579 = vmatprep.subr.mxu0 %v6617_v60  ;;  %5058 = vmatprep.subr.mxu1 %v7538_v14 }
 0x771   :  { %2580 = vmatpush1.msra.mxu0 %v6620_v1  ;;  %5059 = vmatpush3.msra.mxu1 %v6706_v54 }
 0x772   :  { %2581 = vmatprep.subr.mxu0 %v6623_v42  ;;  %5063 = vmatprep.subr.mxu1 %v7538_v14 }
 0x773   :  { %2582 = vmatpush1.msra.mxu0 %v6626_v49 }
 0x774   :  { %2583 = vmatprep.subr.mxu0 %v6629_v35 }
 0x775   :  { %2584 = vmatpush1.msra.mxu0 %v6632_v48 }
 0x776   :  { %2585 = vmatprep.subr.mxu0 %v6635_v63 }
 0x777   :  { %2586 = vmatpush1.msra.mxu0 %v6637_v44 }
 0x778   :  { %2587 = vmatprep.subr.mxu0 %v6639_v45 }
 0x779   :  { %2588 = vmatpush1.msra.mxu0 %v6642_v61 }
 0x77a   :  { %2779 = vmatprep.subr.mxu0 %v6551_v40 }
 0x7e7   :  { %v2080_v55 = vpop.f32.mrf.mxu0  ;;  %v2151_v56 = vpop.f32.mrf.mxu1 }
 0x7e8   :  { %v2161_v58 = vadd.f32 %v2080_v55, %v7584_v57  ;;  %v2182_v40 = vadd.f32 %v4358_v38, %v2151_v56  ;;  %v7586_v55 = vld [vmem:[#allocation36_spill] sm:$0xff] }
 0x7e9   :  { %v4983_v23 = vpop.f32.mrf.mxu1  ;;  %v2082_v26 = vpop.f32.mrf.mxu0 }
 0x7ea   :  { %v4356_v24 = vmul.f32 -1.442695, %v2161_v58  ;;  %v2168_v0 = vadd.f32 %v2082_v26, %v7585_v27 }
 0x7ec   :  { %5385 = vpow2.f32 %v4356_v24  ;;  %v4357_v3 = vmul.f32 -1.442695, %v2168_v0 }
 0x7ee   :  { %5387 = vpow2.f32 %v4357_v3 }
 0x7f9   :  { %v5386_v29 = vpop.eup %5385 }
 0x7fa   :  { %v2165_v33 = vadd.f32 1.0, %v5386_v29 }
 0x7fb   :  { %v5388_v39 = vpop.eup %5387 }
 0x7fc   :  { %5389 = vrcp.f32 %v2165_v33  ;;  %v2172_v58 = vadd.f32 1.0, %v5388_v39 }
 0x809   :  { %v5390_v54 = vpop.eup %5389 }
 0x80a   :  { %v2183_v61 = vmul.f32 %v5390_v54, %v2182_v40  ;;  %v7588_v40 = vld [vmem:[#allocation20_spill] sm:$0xff]  ;;  %v2331_v54 = vpop.f32.mrf.mxu0 }
 0x80c   :  { %v2184_v57 = vadd.f32 %v2183_v61, %v7586_v55  ;;  %v7589_v61 = vld [vmem:[#allocation21_spill] sm:$0xff]  ;;  %v2333_v56 = vpop.f32.mrf.mxu0 }
 0x80e   :  { %5391 = vtanh.f32 %v2184_v57  ;;  %v6791_v3 = vpop.f32.mrf.mxu0  ;;  %v6803_v57 = vpop.f32.mrf.mxu1 }
 0x80f   :  { %5393 = vrcp.f32 %v2172_v58  ;;  %7590 = vst [vmem:[#allocation15_spill] sm:$0xff] %v6791_v3  ;;  %7596 = vst [vmem:[#allocation19_spill] sm:$0xff] %v6803_v57 }
 0x810   :  { %v6793_v29 = vpop.f32.mrf.mxu0 }
 0x811   :  { %7591 = vst [vmem:[#allocation17_spill] sm:$0xff] %v6793_v29 }
 0x812   :  { %v6795_v33 = vpop.f32.mrf.mxu0 }
 0x813   :  { %7592 = vst [vmem:[#allocation27_spill] sm:$0xff] %v6795_v33 }
 0x814   :  { %v6797_v38 = vpop.f32.mrf.mxu0 }
 0x815   :  { %7593 = vst [vmem:[#allocation25_spill] sm:$0xff] %v6797_v38 }
 0x816   :  { %v6799_v39 = vpop.f32.mrf.mxu0 }
 0x817   :  { %7594 = vst [vmem:[#allocation26_spill] sm:$0xff] %v6799_v39 }
 0x818   :  { %v6801_v55 = vpop.f32.mrf.mxu0 }
 0x819   :  { %7595 = vst [vmem:[#allocation35_spill] sm:$0xff] %v6801_v55  ;;  %v2248_v55 = vld [vmem:[%s7450_s7] sm:$0x7] }
 0x81a   :  { %v6805_v58 = vpop.f32.mrf.mxu0 }
 0x81b   :  { %v5392_v23 = vpop.eup %5391  ;;  %7597 = vst [vmem:[#allocation28_spill] sm:$0xff] %v6805_v58 }
 0x81c   :  { %v2186_v24 = vsub.f32 %v6524_v16, %v5392_v23  ;;  %v5394_v26 = vpop.eup %5393  ;;  %v7587_v16 = vld [vmem:[#allocation24_spill] sm:$0xff] }
 0x81e   :  { %v2187_v27 = vmul.f32 %v5394_v26, %v2186_v24  ;;  %v6807_v24 = vpop.f32.mrf.mxu0 }
 0x81f   :  { %7598 = vst [vmem:[#allocation29_spill] sm:$0xff] %v6807_v24  ;;  %v7607_v24 = vld [vmem:[#allocation18_spill] sm:$0xff] }
 0x820   :  { %v2188_v0 = vadd.f32 %v5392_v23, %v2187_v27  ;;  %v2444_v23 = vpop.f32.mrf.mxu1  ;;  %v6811_v27 = vpop.f32.mrf.mxu0 }
 0x821   :  { %7600 = vst [vmem:[#allocation30_spill] sm:$0xff] %v6811_v27 }
 0x822   :  { %2372 = vmatmul.mubr.f32.gmra.mxu0 %v2188_v0  ;;  %5026 = vmatmul.mubr.f32.gmra.mxu1 %v2188_v0  ;;  %v6809_v26 = vpop.f32.mrf.mxu1  ;;  %v6815_v33 = vpop.f32.mrf.mxu0 }
 0x823   :  { %2621 = vmatprep.mubr.f32.mxu0 %v7538_v14  ;;  %5060 = vmatprep.mubr.msk.f32.mxu1 %vm5545_vm1, %v7538_v14  ;;  %7599 = vst [vmem:[#allocation34_spill] sm:$0xff] %v6809_v26  ;;  %7602 = vst [vmem:[#allocation37_spill] sm:$0xff] %v6815_v33  ;;  %v7608_v26 = vsub.s32 0, %v7607_v24 }
 0x824   :  { %v6813_v0 = vpop.f32.mrf.mxu1  ;;  %v6819_v39 = vpop.f32.mrf.mxu0 }
 0x825   :  { %7601 = vst [vmem:[#allocation31_spill] sm:$0xff] %v6813_v0  ;;  %7604 = vst [vmem:[#allocation16_spill] sm:$0xff] %v6819_v39  ;;  %v6830_v29 = vrot.slane %v2248_v55, %v7608_v26 }
 0x826   :  { %2622 = vmatmul.mubr.f32.vlgmr.msra.gmra.mxu0 %v7538_v14  ;;  %5061 = vmatmul.mubr.f32.vlgmr.msra.gmra.mxu1 %v7538_v14  ;;  %v6817_v38 = vpop.f32.mrf.mxu1  ;;  %v6826_v57 = vpop.f32.mrf.mxu0 }
 0x827   :  { %2780 = vmatpush1.msra.mxu0 %v6554_v32  ;;  %5064 = vmatpush3.msra.mxu1 %v6646_v25  ;;  %7603 = vst [vmem:[#allocation38_spill] sm:$0xff] %v6817_v38  ;;  %7606 = vst [vmem:[#allocation32_spill] sm:$0xff] %v6826_v57  ;;  %v2332_v39 = vadd.f32 %v2331_v54, %v6830_v29  ;;  %v7614_v57 = vsub.s32 1, %v7607_v24  ;;  %v6849_v54 = vld [vmem:[%s7451_s8] ss:$0 sm:$0xff] }
 0x828   :  { %2781 = vmatprep.subr.mxu0 %v6557_v62  ;;  %5065 = vmatprep.subr.mxu1 %v7538_v14  ;;  %v6824_v58 = vpop.f32.mrf.mxu1  ;;  %7609 = vst [vmem:[#allocation33_spill] sm:$0xff] %v6830_v29 }
 0x829   :  { %2782 = vmatpush1.msra.mxu0 %v6560_v34  ;;  %5066 = vmatpush3.msra.mxu1 %v6648_v47  ;;  %7605 = vst [vmem:[#allocation13_spill] sm:$0xff] %v6824_v58  ;;  %v6843_v26 = vrot.slane %v2248_v55, %v7614_v57 }
 0x82a   :  { %2783 = vmatprep.subr.mxu0 %v6563_v28  ;;  %5067 = vmatprep.subr.mxu1 %v7538_v14 }
 0x82b   :  { %2784 = vmatpush1.msra.mxu0 %v6566_v6  ;;  %5068 = vmatpush3.msra.mxu1 %v6653_v4 }
 0x82c   :  { %2785 = vmatprep.subr.mxu0 %v6569_v7  ;;  %5069 = vmatprep.subr.mxu1 %v7538_v14 }
 0x82d   :  { %2786 = vmatpush1.msra.mxu0 %v6572_v8  ;;  %5070 = vmatpush3.msra.mxu1 %v6658_v19 }
 0x82e   :  { %2787 = vmatprep.subr.mxu0 %v6575_v10  ;;  %5071 = vmatprep.subr.mxu1 %v7538_v14 }
 0x82f   :  { %2788 = vmatpush1.msra.mxu0 %v6578_v11  ;;  %5072 = vmatpush3.msra.mxu1 %v6662_v9 }
 0x830   :  { %2789 = vmatprep.subr.mxu0 %v6581_v12  ;;  %5073 = vmatprep.subr.mxu1 %v7538_v14 }
 0x831   :  { %2790 = vmatpush1.msra.mxu0 %v6584_v13  ;;  %5074 = vmatpush3.msra.mxu1 %v6666_v5 }
 0x832   :  { %2791 = vmatprep.subr.mxu0 %v6587_v15  ;;  %5075 = vmatprep.subr.mxu1 %v7538_v14 }
 0x833   :  { %2792 = vmatpush1.msra.mxu0 %v6590_v17  ;;  %5076 = vmatpush3.msra.mxu1 %v6670_v2 }
 0x834   :  { %2793 = vmatprep.subr.mxu0 %v6593_v18  ;;  %5077 = vmatprep.subr.mxu1 %v7538_v14 }
 0x835   :  { %2794 = vmatpush1.msra.mxu0 %v6596_v20  ;;  %5078 = vmatpush3.msra.mxu1 %v6674_v37 }
 0x836   :  { %2795 = vmatprep.subr.mxu0 %v6599_v59  ;;  %5079 = vmatprep.subr.mxu1 %v7538_v14 }
 0x837   :  { %2796 = vmatpush1.msra.mxu0 %v6602_v21  ;;  %5080 = vmatpush3.msra.mxu1 %v6678_v43 }
 0x838   :  { %2797 = vmatprep.subr.mxu0 %v6605_v30  ;;  %5081 = vmatprep.subr.mxu1 %v7538_v14 }
 0x839   :  { %2798 = vmatpush1.msra.mxu0 %v6608_v36  ;;  %5082 = vmatpush3.msra.mxu1 %v6682_v31 }
 0x83a   :  { %2799 = vmatprep.subr.mxu0 %v6611_v41  ;;  %5083 = vmatprep.subr.mxu1 %v7538_v14 }
 0x83b   :  { %2800 = vmatpush1.msra.mxu0 %v6614_v46  ;;  %5084 = vmatpush3.msra.mxu1 %v6686_v22 }
 0x83c   :  { %2801 = vmatprep.subr.mxu0 %v6617_v60  ;;  %5085 = vmatprep.subr.mxu1 %v7538_v14 }
 0x83d   :  { %2802 = vmatpush1.msra.mxu0 %v6620_v1  ;;  %5086 = vmatpush3.msra.mxu1 %v6690_v50 }
 0x83e   :  { %2803 = vmatprep.subr.mxu0 %v6623_v42  ;;  %5087 = vmatprep.subr.mxu1 %v7538_v14 }
 0x83f   :  { %2804 = vmatpush1.msra.mxu0 %v6626_v49  ;;  %5088 = vmatpush3.msra.mxu1 %v6694_v51 }
 0x840   :  { %2805 = vmatprep.subr.mxu0 %v6629_v35  ;;  %5089 = vmatprep.subr.mxu1 %v7538_v14 }
 0x841   :  { %2806 = vmatpush1.msra.mxu0 %v6632_v48  ;;  %5090 = vmatpush3.msra.mxu1 %v6698_v52 }
 0x842   :  { %2807 = vmatprep.subr.mxu0 %v6635_v63  ;;  %5091 = vmatprep.subr.mxu1 %v7538_v14 }
 0x843   :  { %2808 = vmatpush1.msra.mxu0 %v6637_v44  ;;  %5092 = vmatpush3.msra.mxu1 %v6702_v53 }
 0x844   :  { %2809 = vmatprep.subr.mxu0 %v6639_v45  ;;  %5093 = vmatprep.subr.mxu1 %v7538_v14 }
 0x845   :  { %2810 = vmatpush1.msra.mxu0 %v7587_v16  ;;  %2843 = vmatprep.mubr.f32.mxu0 %v7538_v14 }
 0x846   :  { %5094 = vmatpush3.msra.mxu1 %v7588_v40  ;;  %5095 = vmatprep.mubr.msk.f32.mxu1 %vm5545_vm1, %v7538_v14 }
 0x847   :  { %3001 = vmatprep.subr.mxu0 %v7589_v61  ;;  %5098 = vmatprep.subr.mxu1 %v7538_v14 }
 0x8e2   :  { %v6832_v27 = vpop.f32.mrf.mxu0  ;;  %v6834_v0 = vpop.f32.mrf.mxu1 }
 0x8e3   :  { %7610 = vst [vmem:[#allocation36_spill] sm:$0xff] %v6832_v27  ;;  %7611 = vst [vmem:[#allocation18_spill] sm:$0xff] %v6834_v0  ;;  %v2334_v27 = vadd.f32 %v2333_v56, %v6843_v26 }
 0x8e4   :  { %v6836_v33 = vpop.f32.mrf.mxu0  ;;  %v6838_v38 = vpop.f32.mrf.mxu1 }
 0x8e5   :  { %7612 = vst [vmem:[#allocation39_spill] sm:$0xff] %v6836_v33  ;;  %7613 = vst [vmem:[#allocation40_spill] sm:$0xff] %v6838_v38 }
 0x8e6   :  { %v2623_v3 = vpop.f32.mrf.mxu0  ;;  %v2694_v61 = vpop.f32.mrf.mxu1 }
 0x8e7   :  { %v2701_v40 = vadd.f32 %v2623_v3, %v2332_v39  ;;  %v7615_v3 = vsub.s32 2, %v7607_v24  ;;  %v7619_v24 = vld [vmem:[#allocation24_spill] sm:$0xff] }
 0x8e8   :  { %v5062_v58 = vpop.f32.mrf.mxu1  ;;  %v2625_v45 = vpop.f32.mrf.mxu0 }
 0x8e9   :  { %v4359_v16 = vmul.f32 -1.442695, %v2701_v40  ;;  %v2708_v0 = vadd.f32 %v2625_v45, %v2334_v27  ;;  %v6854_v39 = vrot.slane %v2248_v55, %v7615_v3  ;;  %v7617_v55 = vld [vmem:[#allocation14_spill] sm:$0xff]  ;;  %v7622_v3 = vld [vmem:[#allocation15_spill] sm:$0xff] }
 0x8eb   :  { %5395 = vpow2.f32 %v4359_v16  ;;  %v4360_v53 = vmul.f32 -1.442695, %v2708_v0  ;;  %v2722_v16 = vadd.f32 %v6849_v54, %v2694_v61  ;;  %v2445_v45 = vadd.f32 %v2444_v23, %v6854_v39  ;;  %v7616_v61 = vld [vmem:[#allocation22_spill] sm:$0xff]  ;;  %v7618_v23 = vld [vmem:[#allocation23_spill] sm:$0xff] }
 0x8ed   :  { %5397 = vpow2.f32 %v4360_v53 }
 0x8f8   :  { %v5396_v33 = vpop.eup %5395 }
 0x8f9   :  { %v2705_v44 = vadd.f32 1.0, %v5396_v33 }
 0x8fa   :  { %v5398_v40 = vpop.eup %5397 }
 0x8fb   :  { %5399 = vrcp.f32 %v2705_v44  ;;  %v2712_v58 = vadd.f32 1.0, %v5398_v40  ;;  %v7621_v40 = vld [vmem:[#allocation21_spill] sm:$0xff] }
 0x908   :  { %v5400_v57 = vpop.eup %5399 }
 0x909   :  { %v2723_v56 = vmul.f32 %v5400_v57, %v2722_v16  ;;  %v7620_v16 = vld [vmem:[#allocation20_spill] sm:$0xff]  ;;  %v2338_v57 = vadd.f32 %v7622_v3, %v6830_v29  ;;  %v7624_v29 = vld [vmem:[#allocation19_spill] sm:$0xff] }
 0x90b   :  { %v2724_v33 = vadd.f32 %v2723_v56, %v2445_v45 }
 0x90d   :  { %5401 = vtanh.f32 %v2724_v33 }
 0x90e   :  { %5403 = vrcp.f32 %v2712_v58 }
 0x91a   :  { %v5402_v44 = vpop.eup %5401 }
 0x91b   :  { %v2726_v53 = vsub.f32 0.0, %v5402_v44  ;;  %v5404_v27 = vpop.eup %5403 }
 0x91d   :  { %v2727_v0 = vmul.f32 %v5404_v27, %v2726_v53  ;;  %v7623_v27 = vld [vmem:[#allocation17_spill] sm:$0xff] }
 0x91f   :  { %v6857_v38 = vadd.f32 %v5402_v44, %v2727_v0  ;;  %v2340_v0 = vadd.f32 %v7623_v27, %v6843_v26 }
 0x921   :  { %2844 = vmatmul.mubr.f32.vlgmr.msra.gmra.mxu0 %v6857_v38  ;;  %5096 = vmatmul.mubr.f32.vlgmr.msra.gmra.mxu1 %v6857_v38 }
 0x922   :  { %3002 = vmatpush1.msra.mxu0 %v6554_v32  ;;  %5099 = vmatpush3.msra.mxu1 %v6646_v25 }
 0x923   :  { %3003 = vmatprep.subr.mxu0 %v6557_v62  ;;  %5100 = vmatprep.subr.mxu1 %v7538_v14 }
 0x924   :  { %3004 = vmatpush1.msra.mxu0 %v6560_v34  ;;  %5101 = vmatpush3.msra.mxu1 %v6648_v47 }
 0x925   :  { %3005 = vmatprep.subr.mxu0 %v6563_v28  ;;  %5102 = vmatprep.subr.mxu1 %v7538_v14 }
 0x926   :  { %3006 = vmatpush1.msra.mxu0 %v6566_v6  ;;  %5103 = vmatpush3.msra.mxu1 %v6653_v4 }
 0x927   :  { %3007 = vmatprep.subr.mxu0 %v6569_v7  ;;  %5104 = vmatprep.subr.mxu1 %v7538_v14 }
 0x928   :  { %3008 = vmatpush1.msra.mxu0 %v6572_v8  ;;  %5105 = vmatpush3.msra.mxu1 %v6658_v19 }
 0x929   :  { %3009 = vmatprep.subr.mxu0 %v6575_v10  ;;  %5106 = vmatprep.subr.mxu1 %v7538_v14 }
 0x92a   :  { %3010 = vmatpush1.msra.mxu0 %v6578_v11  ;;  %5107 = vmatpush3.msra.mxu1 %v6662_v9 }
 0x92b   :  { %3011 = vmatprep.subr.mxu0 %v6581_v12  ;;  %5108 = vmatprep.subr.mxu1 %v7538_v14 }
 0x92c   :  { %3012 = vmatpush1.msra.mxu0 %v6584_v13  ;;  %5109 = vmatpush3.msra.mxu1 %v6666_v5 }
 0x92d   :  { %3013 = vmatprep.subr.mxu0 %v6587_v15  ;;  %5110 = vmatprep.subr.mxu1 %v7538_v14 }
 0x92e   :  { %3014 = vmatpush1.msra.mxu0 %v6590_v17  ;;  %5111 = vmatpush3.msra.mxu1 %v6670_v2 }
 0x92f   :  { %3015 = vmatprep.subr.mxu0 %v6593_v18  ;;  %5112 = vmatprep.subr.mxu1 %v7538_v14 }
 0x930   :  { %3016 = vmatpush1.msra.mxu0 %v6596_v20  ;;  %5113 = vmatpush3.msra.mxu1 %v6674_v37 }
 0x931   :  { %3017 = vmatprep.subr.mxu0 %v6599_v59  ;;  %5114 = vmatprep.subr.mxu1 %v7538_v14 }
 0x932   :  { %3018 = vmatpush1.msra.mxu0 %v6602_v21  ;;  %5115 = vmatpush3.msra.mxu1 %v6678_v43 }
 0x933   :  { %3019 = vmatprep.subr.mxu0 %v6605_v30  ;;  %5116 = vmatprep.subr.mxu1 %v7538_v14 }
 0x934   :  { %3020 = vmatpush1.msra.mxu0 %v6608_v36  ;;  %5117 = vmatpush3.msra.mxu1 %v6682_v31 }
 0x935   :  { %3021 = vmatprep.subr.mxu0 %v6611_v41  ;;  %5118 = vmatprep.subr.mxu1 %v7538_v14 }
 0x936   :  { %3022 = vmatpush1.msra.mxu0 %v6614_v46  ;;  %5119 = vmatpush3.msra.mxu1 %v6686_v22 }
 0x937   :  { %3023 = vmatprep.subr.mxu0 %v6617_v60  ;;  %5120 = vmatprep.subr.mxu1 %v7538_v14 }
 0x938   :  { %3024 = vmatpush1.msra.mxu0 %v6620_v1  ;;  %5121 = vmatpush3.msra.mxu1 %v6690_v50 }
 0x939   :  { %3025 = vmatprep.subr.mxu0 %v6623_v42  ;;  %5122 = vmatprep.subr.mxu1 %v7538_v14 }
 0x93a   :  { %3026 = vmatpush1.msra.mxu0 %v6626_v49  ;;  %5123 = vmatpush3.msra.mxu1 %v6694_v51 }
 0x93b   :  { %3027 = vmatprep.subr.mxu0 %v6629_v35  ;;  %5124 = vmatprep.subr.mxu1 %v7538_v14 }
 0x93c   :  { %3028 = vmatpush1.msra.mxu0 %v6632_v48  ;;  %5125 = vmatpush3.msra.mxu1 %v6698_v52 }
 0x93d   :  { %3029 = vmatprep.subr.mxu0 %v6635_v63  ;;  %5126 = vmatprep.subr.mxu1 %v7538_v14 }
 0x93e   :  { %3030 = vmatpush1.msra.mxu0 %v7616_v61  ;;  %5127 = vmatpush3.msra.mxu1 %v7617_v55 }
 0x93f   :  { %3031 = vmatprep.subr.mxu0 %v7618_v23  ;;  %5128 = vmatprep.subr.mxu1 %v7538_v14 }
 0x940   :  { %3032 = vmatpush1.msra.mxu0 %v7619_v24  ;;  %3065 = vmatprep.mubr.f32.mxu0 %v7538_v14 }
 0x941   :  { %5129 = vmatpush3.msra.mxu1 %v7620_v16  ;;  %5130 = vmatprep.mubr.msk.f32.mxu1 %vm5545_vm1, %v7538_v14 }
 0x942   :  { %3223 = vmatprep.subr.mxu0 %v7621_v40  ;;  %5133 = vmatprep.subr.mxu1 %v7538_v14 }
 0x9e1   :  { %v2845_v45 = vpop.f32.mrf.mxu0  ;;  %v2916_v56 = vpop.f32.mrf.mxu1 }
 0x9e2   :  { %v2923_v58 = vadd.f32 %v2845_v45, %v2338_v57  ;;  %v2944_v61 = vadd.f32 %v6849_v54, %v2916_v56  ;;  %v2450_v57 = vadd.f32 %v7624_v29, %v6854_v39  ;;  %v7058_v29 = vld [vmem:[#allocation10 + $0x108] sm:$0xff]  ;;  %v7072_v56 = vld [vmem:[#allocation10 + $0xd8] sm:$0xff] }
 0x9e3   :  { %v5097_v33 = vpop.f32.mrf.mxu1  ;;  %v2847_v53 = vpop.f32.mrf.mxu0 }
 0x9e4   :  { %v4362_v44 = vmul.f32 -1.442695, %v2923_v58  ;;  %v2930_v16 = vadd.f32 %v2847_v53, %v2340_v0  ;;  %v7074_v0 = vld [vmem:[#allocation10 + $0xe8] sm:$0xff] }
 0x9e6   :  { %5405 = vpow2.f32 %v4362_v44  ;;  %v4363_v24 = vmul.f32 -1.442695, %v2930_v16 }
 0x9e8   :  { %5407 = vpow2.f32 %v4363_v24  ;;  %v7068_v24 = vld [vmem:[#allocation10 + $0xe0] sm:$0xff] }
 0x9f3   :  { %v5406_v23 = vpop.eup %5405 }
 0x9f4   :  { %v2927_v55 = vadd.f32 1.0, %v5406_v23 }
 0x9f5   :  { %v5408_v40 = vpop.eup %5407 }
 0x9f6   :  { %5409 = vrcp.f32 %v2927_v55  ;;  %v2934_v33 = vadd.f32 1.0, %v5408_v40  ;;  %v7066_v55 = vld [vmem:[#allocation10 + $0x100] sm:$0xff]  ;;  %v7076_v40 = vld [vmem:[#allocation10 + $0xc8] sm:$0xff] }
 0xa03   :  { %v5410_v3 = vpop.eup %5409 }
 0xa04   :  { %v2945_v45 = vmul.f32 %v5410_v3, %v2944_v61  ;;  %v7064_v61 = vld [vmem:[#allocation10 + $0xf0] sm:$0xff]  ;;  %v7080_v3 = vld [vmem:[#allocation10 + $0xc0] sm:$0xff] }
 0xa06   :  { %v2946_v58 = vadd.f32 %v2945_v45, %v2450_v57  ;;  %v7082_v57 = vld [vmem:[#allocation10 + $0xd0] sm:$0xff] }
 0xa07   :  { %v7086_v45 = vld [vmem:[#allocation10 + $0xb0] sm:$0xff] }
 0xa08   :  { %5411 = vtanh.f32 %v2946_v58  ;;  %v7090_v58 = vld [vmem:[#allocation10 + $0xa8] sm:$0xff] }
 0xa09   :  { %5413 = vrcp.f32 %v2934_v33  ;;  %v7092_v33 = vld [vmem:[#allocation10 + $0xb8] sm:$0xff] }
 0xa15   :  { %v5412_v44 = vpop.eup %5411 }
 0xa16   :  { %v2948_v53 = vsub.f32 %v6857_v38, %v5412_v44  ;;  %v5414_v16 = vpop.eup %5413  ;;  %v7061_v38 = vld [vmem:[#allocation10 + $0xf8] sm:$0xff] }
 0xa18   :  { %v2949_v27 = vmul.f32 %v5414_v16, %v2948_v53  ;;  %v7100_v53 = vld [vmem:[#allocation10 + $0x90] sm:$0xff]  ;;  %v7102_v16 = vld [vmem:[#allocation10 + $0xa0] sm:$0xff] }
 0xa1a   :  { %v6936_v23 = vadd.f32 %v5412_v44, %v2949_v27  ;;  %v7096_v44 = vld [vmem:[#allocation10 + $0x98] sm:$0xff]  ;;  %v7106_v27 = vld [vmem:[#allocation10 + $0x80] sm:$0xff] }
 0xa1c   :  { %3066 = vmatmul.mubr.f32.vlgmr.msra.gmra.mxu0 %v6936_v23  ;;  %5131 = vmatmul.mubr.f32.vlgmr.msra.gmra.mxu1 %v6936_v23 }
 0xa1d   :  { %3224 = vmatpush1.msra.mxu0 %v6554_v32  ;;  %5134 = vmatpush3.msra.mxu1 %v6646_v25  ;;  %v7625_v32 = vld [vmem:[#allocation22_spill] sm:$0xff] }
 0xa1e   :  { %3225 = vmatprep.subr.mxu0 %v6557_v62  ;;  %5135 = vmatprep.subr.mxu1 %v7538_v14  ;;  %v7626_v62 = vld [vmem:[#allocation14_spill] sm:$0xff] }
 0xa1f   :  { %3226 = vmatpush1.msra.mxu0 %v6560_v34  ;;  %5136 = vmatpush3.msra.mxu1 %v6648_v47  ;;  %v7627_v34 = vld [vmem:[#allocation23_spill] sm:$0xff] }
 0xa20   :  { %3227 = vmatprep.subr.mxu0 %v6563_v28  ;;  %5137 = vmatprep.subr.mxu1 %v7538_v14  ;;  %v7628_v28 = vld [vmem:[#allocation24_spill] sm:$0xff] }
 0xa21   :  { %3228 = vmatpush1.msra.mxu0 %v6566_v6  ;;  %5138 = vmatpush3.msra.mxu1 %v6653_v4  ;;  %v7629_v6 = vld [vmem:[#allocation20_spill] sm:$0xff] }
 0xa22   :  { %3229 = vmatprep.subr.mxu0 %v6569_v7  ;;  %5139 = vmatprep.subr.mxu1 %v7538_v14  ;;  %v7630_v7 = vld [vmem:[#allocation33_spill] sm:$0xff] }
 0xa23   :  { %3230 = vmatpush1.msra.mxu0 %v6572_v8  ;;  %5140 = vmatpush3.msra.mxu1 %v6658_v19  ;;  %v7631_v8 = vld [vmem:[#allocation27_spill] sm:$0xff] }
 0xa24   :  { %3231 = vmatprep.subr.mxu0 %v6575_v10  ;;  %5141 = vmatprep.subr.mxu1 %v7538_v14  ;;  %v2344_v10 = vadd.f32 %v7631_v8, %v7630_v7  ;;  %v7130_v8 = vld [vmem:[#allocation10 + $0x48] sm:$0xff] }
 0xa25   :  { %3232 = vmatpush1.msra.mxu0 %v6578_v11  ;;  %5142 = vmatpush3.msra.mxu1 %v6662_v9 }
 0xa26   :  { %3233 = vmatprep.subr.mxu0 %v6581_v12  ;;  %5143 = vmatprep.subr.mxu1 %v7538_v14 }
 0xa27   :  { %3234 = vmatpush1.msra.mxu0 %v6584_v13  ;;  %5144 = vmatpush3.msra.mxu1 %v6666_v5 }
 0xa28   :  { %3235 = vmatprep.subr.mxu0 %v6587_v15  ;;  %5145 = vmatprep.subr.mxu1 %v7538_v14 }
 0xa29   :  { %3236 = vmatpush1.msra.mxu0 %v6590_v17  ;;  %5146 = vmatpush3.msra.mxu1 %v6670_v2 }
 0xa2a   :  { %3237 = vmatprep.subr.mxu0 %v6593_v18  ;;  %5147 = vmatprep.subr.mxu1 %v7538_v14 }
 0xa2b   :  { %3238 = vmatpush1.msra.mxu0 %v6596_v20  ;;  %5148 = vmatpush3.msra.mxu1 %v6674_v37  ;;  %v7632_v20 = vld [vmem:[#allocation25_spill] sm:$0xff] }
 0xa2c   :  { %3239 = vmatprep.subr.mxu0 %v6599_v59  ;;  %5149 = vmatprep.subr.mxu1 %v7538_v14  ;;  %v2346_v59 = vadd.f32 %v7632_v20, %v6843_v26  ;;  %v7156_v20 = vld [vmem:[#allocation10 + $0x8] sm:$0xff] }
 0xa2d   :  { %3240 = vmatpush1.msra.mxu0 %v6602_v21  ;;  %5150 = vmatpush3.msra.mxu1 %v6678_v43  ;;  %7637 = vst [vmem:[#allocation19_spill] sm:$0xff] %v7156_v20 }
 0xa2e   :  { %3241 = vmatprep.subr.mxu0 %v6605_v30  ;;  %5151 = vmatprep.subr.mxu1 %v7538_v14 }
 0xa2f   :  { %3242 = vmatpush1.msra.mxu0 %v6608_v36  ;;  %5152 = vmatpush3.msra.mxu1 %v6682_v31 }
 0xa30   :  { %3243 = vmatprep.subr.mxu0 %v6611_v41  ;;  %5153 = vmatprep.subr.mxu1 %v7538_v14 }
 0xa31   :  { %3244 = vmatpush1.msra.mxu0 %v6614_v46  ;;  %5154 = vmatpush3.msra.mxu1 %v6686_v22  ;;  %v7034_v22 = vld [vmem:[#allocation10 + $0x168] sm:$0xff] }
 0xa32   :  { %3245 = vmatprep.subr.mxu0 %v6617_v60  ;;  %5155 = vmatprep.subr.mxu1 %v7538_v14 }
 0xa33   :  { %3246 = vmatpush1.msra.mxu0 %v6620_v1  ;;  %5156 = vmatpush3.msra.mxu1 %v6690_v50  ;;  %v7049_v50 = vld [vmem:[#allocation10 + $0x128] sm:$0xff] }
 0xa34   :  { %3247 = vmatprep.subr.mxu0 %v6623_v42  ;;  %5157 = vmatprep.subr.mxu1 %v7538_v14  ;;  %v7633_v42 = vld [vmem:[#allocation31_spill] sm:$0xff] }
 0xa35   :  { %3248 = vmatpush1.msra.mxu0 %v6626_v49  ;;  %5158 = vmatpush3.msra.mxu1 %v6694_v51  ;;  %v2455_v49 = vadd.f32 %v7633_v42, %v6854_v39  ;;  %v7052_v51 = vld [vmem:[#allocation10 + $0x120] sm:$0xff] }
 0xa36   :  { %3249 = vmatprep.subr.mxu0 %v6629_v35  ;;  %5159 = vmatprep.subr.mxu1 %v7538_v14 }
 0xa37   :  { %3250 = vmatpush1.msra.mxu0 %v6632_v48  ;;  %5160 = vmatpush3.msra.mxu1 %v6698_v52  ;;  %v7055_v52 = vld [vmem:[#allocation10 + $0x110] sm:$0xff] }
 0xa38   :  { %3251 = vmatprep.subr.mxu0 %v6635_v63  ;;  %5161 = vmatprep.subr.mxu1 %v7538_v14 }
 0xa39   :  { %3252 = vmatpush1.msra.mxu0 %v7625_v32  ;;  %5162 = vmatpush3.msra.mxu1 %v7626_v62  ;;  %v7112_v32 = vld [vmem:[#allocation10 + $0x88] sm:$0xff] }
 0xa3a   :  { %3253 = vmatprep.subr.mxu0 %v7627_v34  ;;  %5163 = vmatprep.subr.mxu1 %v7538_v14  ;;  %v7116_v62 = vld [vmem:[#allocation10 + $0x68] sm:$0xff]  ;;  %v7120_v34 = vld [vmem:[#allocation10 + $0x60] sm:$0xff] }
 0xa3b   :  { %3254 = vmatpush1.msra.mxu0 %v7628_v28  ;;  %3287 = vmatprep.mubr.f32.mxu0 %v7538_v14  ;;  %v7122_v28 = vld [vmem:[#allocation10 + $0x70] sm:$0xff] }
 0xa3c   :  { %5164 = vmatpush3.msra.mxu1 %v7629_v6  ;;  %5165 = vmatprep.mubr.msk.f32.mxu1 %vm5545_vm1, %v7538_v14  ;;  %v7126_v6 = vld [vmem:[#allocation10 + $0x50] sm:$0xff] }
 0xa3d   :  { %5168 = vmatprep.subr.mxu1 %v7538_v14 }
 0xadc   :  { %v3067_v11 = vpop.f32.mrf.mxu0  ;;  %v3138_v12 = vpop.f32.mrf.mxu1 }
 0xadd   :  { %v3145_v13 = vadd.f32 %v3067_v11, %v2344_v10  ;;  %v3166_v60 = vadd.f32 %v6849_v54, %v3138_v12  ;;  %v7132_v10 = vld [vmem:[#allocation10 + $0x58] sm:$0xff]  ;;  %v7140_v12 = vld [vmem:[#allocation10 + $0x30] sm:$0xff] }
 0xade   :  { %v5132_v15 = vpop.f32.mrf.mxu1  ;;  %v3069_v18 = vpop.f32.mrf.mxu0  ;;  %v7136_v11 = vld [vmem:[#allocation10 + $0x38] sm:$0xff] }
 0xadf   :  { %v4365_v17 = vmul.f32 -1.442695, %v3145_v13  ;;  %v3152_v21 = vadd.f32 %v3069_v18, %v2346_v59  ;;  %v7142_v13 = vld [vmem:[#allocation10 + $0x40] sm:$0xff]  ;;  %v7152_v18 = vld [vmem:[#allocation10 + $0x28] sm:$0xff] }
 0xae0   :  { %v7146_v15 = vld [vmem:[#allocation10 + $0x20] sm:$0xff]  ;;  %7636 = vst [vmem:[#allocation17_spill] sm:$0xff] %v7152_v18 }
 0xae1   :  { %5415 = vpow2.f32 %v4365_v17  ;;  %v4366_v30 = vmul.f32 -1.442695, %v3152_v21  ;;  %v7150_v17 = vld [vmem:[#allocation10 + $0x18] sm:$0xff]  ;;  %v7160_v59 = vld [vmem:[#allocation10] sm:$0xff]  ;;  %v7162_v21 = vld [vmem:[#allocation10 + $0x10] sm:$0xff] }
 0xae2   :  { %7635 = vst [vmem:[#allocation15_spill] sm:$0xff] %v7150_v17  ;;  %7638 = vst [vmem:[#allocation22_spill] sm:$0xff] %v7160_v59 }
 0xae3   :  { %5417 = vpow2.f32 %v4366_v30  ;;  %7639 = vst [vmem:[#allocation14_spill] sm:$0xff] %v7162_v21  ;;  %v7640_v30 = vld [vmem:[#allocation26_spill] sm:$0xff] }
 0xaee   :  { %v5416_v36 = vpop.eup %5415 }
 0xaef   :  { %v3149_v41 = vadd.f32 1.0, %v5416_v36  ;;  %v2350_v36 = vadd.f32 %v7640_v30, %v7630_v7  ;;  %v7642_v7 = vld [vmem:[#allocation34_spill] sm:$0xff] }
 0xaf0   :  { %v5418_v46 = vpop.eup %5417 }
 0xaf1   :  { %5419 = vrcp.f32 %v3149_v41  ;;  %v3156_v63 = vadd.f32 1.0, %v5418_v46 }
 0xafe   :  { %v5420_v1 = vpop.eup %5419 }
 0xaff   :  { %v3167_v35 = vmul.f32 %v5420_v1, %v3166_v60 }
 0xb01   :  { %v3168_v48 = vadd.f32 %v3167_v35, %v2455_v49  ;;  %v7641_v35 = vld [vmem:[#allocation35_spill] sm:$0xff] }
 0xb03   :  { %5421 = vtanh.f32 %v3168_v48  ;;  %v2352_v48 = vadd.f32 %v7641_v35, %v6843_v26 }
 0xb04   :  { %5423 = vrcp.f32 %v3156_v63 }
 0xb10   :  { %v5422_v5 = vpop.eup %5421 }
 0xb11   :  { %v3170_v2 = vsub.f32 %v6936_v23, %v5422_v5  ;;  %v5424_v37 = vpop.eup %5423  ;;  %v7110_v23 = vld [vmem:[#allocation10 + $0x78] sm:$0xff] }
 0xb13   :  { %v3171_v43 = vmul.f32 %v5424_v37, %v3170_v2 }
 0xb15   :  { %v7014_v31 = vadd.f32 %v5422_v5, %v3171_v43 }
 0xb17   :  { %3288 = vmatmul.mubr.f32.vlgmr.msra.gmra.mxu0 %v7014_v31  ;;  %5166 = vmatmul.mubr.f32.vlgmr.msra.gmra.mxu1 %v7014_v31 }
 0xb18   :  { %5169 = vmatpush3.msra.mxu1 %v6646_v25  ;;  %3509 = vmatprep.mubr.f32.mxu0 %v7538_v14  ;;  %v7031_v25 = vld [vmem:[#allocation10 + $0x170] sm:$0xff] }
 0xb19   :  { %5170 = vmatprep.subr.mxu1 %v7538_v14  ;;  %5200 = vmatprep.mubr.msk.f32.mxu1 %vm5545_vm1, %v7538_v14  ;;  %7634 = vst [vmem:[#allocation21_spill] sm:$0xff] %v7031_v25 }
 0xb1a   :  { %5171 = vmatpush3.msra.mxu1 %v6648_v47  ;;  %3445 = vmatprep.subr.mxu0 %v7031_v25  ;;  %v7037_v47 = vld [vmem:[#allocation10 + $0x158] sm:$0xff] }
 0xb1b   :  { %5172 = vmatprep.subr.mxu1 %v7538_v14  ;;  %3446 = vmatpush1.msra.mxu0 %v7034_v22 }
 0xb1c   :  { %5173 = vmatpush3.msra.mxu1 %v6653_v4  ;;  %3447 = vmatprep.subr.mxu0 %v7037_v47  ;;  %v7040_v4 = vld [vmem:[#allocation10 + $0x150] sm:$0xff] }
 0xb1d   :  { %5174 = vmatprep.subr.mxu1 %v7538_v14  ;;  %3448 = vmatpush1.msra.mxu0 %v7040_v4 }
 0xb1e   :  { %5175 = vmatpush3.msra.mxu1 %v6658_v19  ;;  %v7043_v19 = vld [vmem:[#allocation10 + $0x140] sm:$0xff] }
 0xb1f   :  { %5176 = vmatprep.subr.mxu1 %v7538_v14  ;;  %3449 = vmatprep.subr.mxu0 %v7043_v19 }
 0xb20   :  { %5177 = vmatpush3.msra.mxu1 %v6662_v9  ;;  %v7046_v9 = vld [vmem:[#allocation10 + $0x138] sm:$0xff] }
 0xb21   :  { %5178 = vmatprep.subr.mxu1 %v7538_v14  ;;  %3450 = vmatpush1.msra.mxu0 %v7046_v9 }
 0xb22   :  { %3451 = vmatprep.subr.mxu0 %v7049_v50  ;;  %5179 = vmatpush3.msra.mxu1 %v7066_v55 }
 0xb23   :  { %3452 = vmatpush1.msra.mxu0 %v7052_v51  ;;  %5180 = vmatprep.subr.mxu1 %v7538_v14 }
 0xb24   :  { %3453 = vmatprep.subr.mxu0 %v7055_v52  ;;  %5181 = vmatpush3.msra.mxu1 %v7074_v0 }
 0xb25   :  { %3454 = vmatpush1.msra.mxu0 %v7058_v29  ;;  %5182 = vmatprep.subr.mxu1 %v7538_v14 }
 0xb26   :  { %3455 = vmatprep.subr.mxu0 %v7061_v38  ;;  %5183 = vmatpush3.msra.mxu1 %v7082_v57 }
 0xb27   :  { %3456 = vmatpush1.msra.mxu0 %v7064_v61  ;;  %5184 = vmatprep.subr.mxu1 %v7538_v14 }
 0xb28   :  { %3457 = vmatprep.subr.mxu0 %v7068_v24  ;;  %5185 = vmatpush3.msra.mxu1 %v7092_v33 }
 0xb29   :  { %3458 = vmatpush1.msra.mxu0 %v7072_v56  ;;  %5186 = vmatprep.subr.mxu1 %v7538_v14 }
 0xb2a   :  { %3459 = vmatprep.subr.mxu0 %v7076_v40  ;;  %5187 = vmatpush3.msra.mxu1 %v7102_v16 }
 0xb2b   :  { %3460 = vmatpush1.msra.mxu0 %v7080_v3  ;;  %5188 = vmatprep.subr.mxu1 %v7538_v14 }
 0xb2c   :  { %3461 = vmatprep.subr.mxu0 %v7086_v45  ;;  %5189 = vmatpush3.msra.mxu1 %v7112_v32 }
 0xb2d   :  { %3462 = vmatpush1.msra.mxu0 %v7090_v58  ;;  %5190 = vmatprep.subr.mxu1 %v7538_v14 }
 0xb2e   :  { %3463 = vmatprep.subr.mxu0 %v7096_v44  ;;  %5191 = vmatpush3.msra.mxu1 %v7122_v28 }
 0xb2f   :  { %3464 = vmatpush1.msra.mxu0 %v7100_v53  ;;  %5192 = vmatprep.subr.mxu1 %v7538_v14 }
 0xb30   :  { %3465 = vmatprep.subr.mxu0 %v7106_v27  ;;  %5193 = vmatpush3.msra.mxu1 %v7132_v10 }
 0xb31   :  { %3466 = vmatpush1.msra.mxu0 %v7110_v23  ;;  %5194 = vmatprep.subr.mxu1 %v7538_v14 }
 0xb32   :  { %3467 = vmatprep.subr.mxu0 %v7116_v62  ;;  %5195 = vmatpush3.msra.mxu1 %v7142_v13 }
 0xb33   :  { %3468 = vmatpush1.msra.mxu0 %v7120_v34  ;;  %5196 = vmatprep.subr.mxu1 %v7538_v14 }
 0xb34   :  { %3469 = vmatprep.subr.mxu0 %v7126_v6  ;;  %5197 = vmatpush3.msra.mxu1 %v7152_v18 }
 0xb35   :  { %3470 = vmatpush1.msra.mxu0 %v7130_v8  ;;  %5198 = vmatprep.subr.mxu1 %v7538_v14 }
 0xb36   :  { %3471 = vmatprep.subr.mxu0 %v7136_v11  ;;  %5199 = vmatpush3.msra.mxu1 %v7162_v21 }
 0xb37   :  { %3472 = vmatpush1.msra.mxu0 %v7140_v12  ;;  %5203 = vmatprep.subr.mxu1 %v7538_v14 }
 0xb38   :  { %3473 = vmatprep.subr.mxu0 %v7146_v15 }
 0xb39   :  { %3474 = vmatpush1.msra.mxu0 %v7150_v17 }
 0xb3a   :  { %3475 = vmatprep.subr.mxu0 %v7156_v20 }
 0xb3b   :  { %3476 = vmatpush1.msra.mxu0 %v7160_v59 }
 0xb3c   :  { %3667 = vmatprep.subr.mxu0 %v7031_v25 }
 0xbd7   :  { %v3289_v41 = vpop.f32.mrf.mxu0  ;;  %v3360_v46 = vpop.f32.mrf.mxu1 }
 0xbd8   :  { %v3367_v60 = vadd.f32 %v3289_v41, %v2350_v36  ;;  %v3388_v21 = vadd.f32 %v6849_v54, %v3360_v46  ;;  %v2460_v36 = vadd.f32 %v7642_v7, %v6854_v39  ;;  %v7219_v54 = vld [vmem:[#allocation10 + $0x178] sm:$0xff]  ;;  %v7223_v7 = vld [vmem:[#allocation10 + $0x160] sm:$0xff] }
 0xbd9   :  { %v5167_v1 = vpop.f32.mrf.mxu1  ;;  %v3291_v49 = vpop.f32.mrf.mxu0  ;;  %v7235_v46 = vld [vmem:[#allocation10 + $0x118] sm:$0xff] }
 0xbda   :  { %v4368_v42 = vmul.f32 -1.442695, %v3367_v60  ;;  %v3374_v63 = vadd.f32 %v3291_v49, %v2352_v48 }
 0xbdc   :  { %5425 = vpow2.f32 %v4368_v42  ;;  %v4369_v5 = vmul.f32 -1.442695, %v3374_v63 }
 0xbde   :  { %5427 = vpow2.f32 %v4369_v5  ;;  %v7643_v5 = vld [vmem:[#allocation14_spill] sm:$0xff] }
 0xbe9   :  { %v5426_v2 = vpop.eup %5425 }
 0xbea   :  { %v3371_v37 = vadd.f32 1.0, %v5426_v2  ;;  %v7644_v2 = vld [vmem:[#allocation33_spill] sm:$0xff] }
 0xbeb   :  { %v5428_v43 = vpop.eup %5427 }
 0xbec   :  { %5429 = vrcp.f32 %v3371_v37  ;;  %v3378_v1 = vadd.f32 1.0, %v5428_v43  ;;  %v7645_v37 = vld [vmem:[#allocation28_spill] sm:$0xff] }
 0xbed   :  { %v2356_v43 = vadd.f32 %v7645_v37, %v7644_v2  ;;  %v7268_v37 = vld [vmem:[%s7451_s8] ss:$0 sm:$0xff] }
 0xbf9   :  { %v5430_v30 = vpop.eup %5429 }
 0xbfa   :  { %v3389_v41 = vmul.f32 %v5430_v30, %v3388_v21  ;;  %v7231_v21 = vld [vmem:[#allocation10 + $0x130] sm:$0xff] }
 0xbfc   :  { %v3390_v60 = vadd.f32 %v3389_v41, %v2460_v36 }
 0xbfe   :  { %5431 = vtanh.f32 %v3390_v60 }
 0xbff   :  { %5433 = vrcp.f32 %v3378_v1 }
 0xc0b   :  { %v5432_v42 = vpop.eup %5431 }
 0xc0c   :  { %v3392_v49 = vsub.f32 %v7014_v31, %v5432_v42  ;;  %v5434_v35 = vpop.eup %5433  ;;  %v7227_v31 = vld [vmem:[#allocation10 + $0x148] sm:$0xff] }
 0xc0e   :  { %v3393_v48 = vmul.f32 %v5434_v35, %v3392_v49  ;;  %v7646_v49 = vld [vmem:[#allocation29_spill] sm:$0xff] }
 0xc0f   :  { %v2358_v35 = vadd.f32 %v7646_v49, %v6843_v26 }
 0xc10   :  { %v7180_v63 = vadd.f32 %v5432_v42, %v3393_v48 }
 0xc12   :  { %3510 = vmatmul.mubr.f32.vlgmr.msra.gmra.mxu0 %v7180_v63  ;;  %5201 = vmatmul.mubr.f32.vlgmr.msra.gmra.mxu1 %v7180_v63 }
 0xc13   :  { %3668 = vmatpush1.msra.mxu0 %v7034_v22  ;;  %3731 = vmatprep.mubr.f32.mxu0 %v7538_v14 }
 0xc14   :  { %3669 = vmatprep.subr.mxu0 %v7037_v47  ;;  %5235 = vmatprep.mubr.msk.f32.mxu1 %vm5545_vm1, %v7538_v14 }
 0xc15   :  { %3670 = vmatpush1.msra.mxu0 %v7040_v4  ;;  %5204 = vmatpush3.msra.mxu1 %v7219_v54 }
 0xc16   :  { %3671 = vmatprep.subr.mxu0 %v7043_v19  ;;  %5205 = vmatprep.subr.mxu1 %v7538_v14 }
 0xc17   :  { %3672 = vmatpush1.msra.mxu0 %v7046_v9  ;;  %5206 = vmatpush3.msra.mxu1 %v7223_v7 }
 0xc18   :  { %3673 = vmatprep.subr.mxu0 %v7049_v50  ;;  %5207 = vmatprep.subr.mxu1 %v7538_v14 }
 0xc19   :  { %3674 = vmatpush1.msra.mxu0 %v7052_v51  ;;  %5208 = vmatpush3.msra.mxu1 %v7227_v31 }
 0xc1a   :  { %3675 = vmatprep.subr.mxu0 %v7055_v52  ;;  %5209 = vmatprep.subr.mxu1 %v7538_v14 }
 0xc1b   :  { %3676 = vmatpush1.msra.mxu0 %v7058_v29  ;;  %5210 = vmatpush3.msra.mxu1 %v7231_v21 }
 0xc1c   :  { %3677 = vmatprep.subr.mxu0 %v7061_v38  ;;  %5211 = vmatprep.subr.mxu1 %v7538_v14 }
 0xc1d   :  { %3678 = vmatpush1.msra.mxu0 %v7064_v61  ;;  %5212 = vmatpush3.msra.mxu1 %v7235_v46 }
 0xc1e   :  { %3679 = vmatprep.subr.mxu0 %v7068_v24  ;;  %5213 = vmatprep.subr.mxu1 %v7538_v14 }
 0xc1f   :  { %3680 = vmatpush1.msra.mxu0 %v7072_v56  ;;  %5214 = vmatpush3.msra.mxu1 %v7066_v55 }
 0xc20   :  { %3681 = vmatprep.subr.mxu0 %v7076_v40  ;;  %5215 = vmatprep.subr.mxu1 %v7538_v14 }
 0xc21   :  { %3682 = vmatpush1.msra.mxu0 %v7080_v3  ;;  %5216 = vmatpush3.msra.mxu1 %v7074_v0 }
 0xc22   :  { %3683 = vmatprep.subr.mxu0 %v7086_v45  ;;  %5217 = vmatprep.subr.mxu1 %v7538_v14 }
 0xc23   :  { %3684 = vmatpush1.msra.mxu0 %v7090_v58  ;;  %5218 = vmatpush3.msra.mxu1 %v7082_v57 }
 0xc24   :  { %3685 = vmatprep.subr.mxu0 %v7096_v44  ;;  %5219 = vmatprep.subr.mxu1 %v7538_v14 }
 0xc25   :  { %3686 = vmatpush1.msra.mxu0 %v7100_v53  ;;  %5220 = vmatpush3.msra.mxu1 %v7092_v33 }
 0xc26   :  { %3687 = vmatprep.subr.mxu0 %v7106_v27  ;;  %5221 = vmatprep.subr.mxu1 %v7538_v14 }
 0xc27   :  { %3688 = vmatpush1.msra.mxu0 %v7110_v23  ;;  %5222 = vmatpush3.msra.mxu1 %v7102_v16 }
 0xc28   :  { %3689 = vmatprep.subr.mxu0 %v7116_v62  ;;  %5223 = vmatprep.subr.mxu1 %v7538_v14 }
 0xc29   :  { %3690 = vmatpush1.msra.mxu0 %v7120_v34  ;;  %5224 = vmatpush3.msra.mxu1 %v7112_v32 }
 0xc2a   :  { %3691 = vmatprep.subr.mxu0 %v7126_v6  ;;  %5225 = vmatprep.subr.mxu1 %v7538_v14 }
 0xc2b   :  { %3692 = vmatpush1.msra.mxu0 %v7130_v8  ;;  %5226 = vmatpush3.msra.mxu1 %v7122_v28 }
 0xc2c   :  { %3693 = vmatprep.subr.mxu0 %v7136_v11  ;;  %5227 = vmatprep.subr.mxu1 %v7538_v14 }
 0xc2d   :  { %3694 = vmatpush1.msra.mxu0 %v7140_v12  ;;  %5228 = vmatpush3.msra.mxu1 %v7132_v10 }
 0xc2e   :  { %3695 = vmatprep.subr.mxu0 %v7146_v15  ;;  %5229 = vmatprep.subr.mxu1 %v7538_v14 }
 0xc2f   :  { %3696 = vmatpush1.msra.mxu0 %v7150_v17  ;;  %5230 = vmatpush3.msra.mxu1 %v7142_v13 }
 0xc30   :  { %3697 = vmatprep.subr.mxu0 %v7156_v20  ;;  %5231 = vmatprep.subr.mxu1 %v7538_v14 }
 0xc31   :  { %3698 = vmatpush1.msra.mxu0 %v7160_v59  ;;  %5232 = vmatpush3.msra.mxu1 %v7152_v18 }
 0xc32   :  { %3889 = vmatprep.subr.mxu0 %v7031_v25  ;;  %5233 = vmatprep.subr.mxu1 %v7538_v14 }
 0xc33   :  { %5234 = vmatpush3.msra.mxu1 %v7643_v5 }
 0xc34   :  { %5238 = vmatprep.subr.mxu1 %v7538_v14 }
 0xcd2   :  { %v3511_v30 = vpop.f32.mrf.mxu0  ;;  %v3582_v36 = vpop.f32.mrf.mxu1 }
 0xcd3   :  { %v3589_v41 = vadd.f32 %v3511_v30, %v2356_v43  ;;  %v3610_v43 = vadd.f32 %v7268_v37, %v3582_v36  ;;  %v7650_v36 = vld [vmem:[#allocation21_spill] sm:$0xff] }
 0xcd4   :  { %v5202_v60 = vpop.f32.mrf.mxu1  ;;  %v3513_v42 = vpop.f32.mrf.mxu0 }
 0xcd5   :  { %v4371_v1 = vmul.f32 -1.442695, %v3589_v41  ;;  %v3596_v48 = vadd.f32 %v3513_v42, %v2358_v35  ;;  %v7647_v41 = vld [vmem:[#allocation13_spill] sm:$0xff] }
 0xcd6   :  { %v2465_v60 = vadd.f32 %v7647_v41, %v6854_v39 }
 0xcd7   :  { %5435 = vpow2.f32 %v4371_v1  ;;  %v4372_v25 = vmul.f32 -1.442695, %v3596_v48 }
 0xcd9   :  { %5437 = vpow2.f32 %v4372_v25 }
 0xce4   :  { %v5436_v59 = vpop.eup %5435 }
 0xce5   :  { %v3593_v20 = vadd.f32 1.0, %v5436_v59 }
 0xce6   :  { %v5438_v2 = vpop.eup %5437 }
 0xce7   :  { %5439 = vrcp.f32 %v3593_v20  ;;  %v3600_v42 = vadd.f32 1.0, %v5438_v2  ;;  %v7649_v2 = vld [vmem:[#allocation22_spill] sm:$0xff] }
 0xcf4   :  { %v5440_v30 = vpop.eup %5439 }
 0xcf5   :  { %v3611_v1 = vmul.f32 %v5440_v30, %v3610_v43  ;;  %v7651_v43 = vld [vmem:[#allocation33_spill] sm:$0xff]  ;;  %v7652_v30 = vld [vmem:[#allocation30_spill] sm:$0xff] }
 0xcf6   :  { %v2362_v41 = vadd.f32 %v7652_v30, %v7651_v43  ;;  %v7654_v43 = vld [vmem:[#allocation38_spill] sm:$0xff] }
 0xcf7   :  { %v3612_v49 = vadd.f32 %v3611_v1, %v2465_v60 }
 0xcf9   :  { %5441 = vtanh.f32 %v3612_v49 }
 0xcfa   :  { %5443 = vrcp.f32 %v3600_v42 }
 0xd06   :  { %v5442_v59 = vpop.eup %5441 }
 0xd07   :  { %v3614_v25 = vsub.f32 %v7180_v63, %v5442_v59  ;;  %v5444_v20 = vpop.eup %5443  ;;  %v7648_v63 = vld [vmem:[#allocation19_spill] sm:$0xff] }
 0xd09   :  { %v3615_v35 = vmul.f32 %v5444_v20, %v3614_v25  ;;  %v7653_v20 = vld [vmem:[#allocation37_spill] sm:$0xff] }
 0xd0b   :  { %v7274_v48 = vadd.f32 %v5442_v59, %v3615_v35  ;;  %v2364_v35 = vadd.f32 %v7653_v20, %v6843_v26 }
 0xd0d   :  { %3732 = vmatmul.mubr.f32.vlgmr.msra.gmra.mxu0 %v7274_v48  ;;  %5236 = vmatmul.mubr.f32.vlgmr.msra.gmra.mxu1 %v7274_v48 }
 0xd0e   :  { %3890 = vmatpush1.msra.mxu0 %v7034_v22  ;;  %5239 = vmatpush3.msra.mxu1 %v7219_v54 }
 0xd0f   :  { %3891 = vmatprep.subr.mxu0 %v7037_v47  ;;  %5240 = vmatprep.subr.mxu1 %v7538_v14 }
 0xd10   :  { %3892 = vmatpush1.msra.mxu0 %v7040_v4  ;;  %5241 = vmatpush3.msra.mxu1 %v7223_v7 }
 0xd11   :  { %3893 = vmatprep.subr.mxu0 %v7043_v19  ;;  %5242 = vmatprep.subr.mxu1 %v7538_v14 }
 0xd12   :  { %3894 = vmatpush1.msra.mxu0 %v7046_v9  ;;  %5243 = vmatpush3.msra.mxu1 %v7227_v31 }
 0xd13   :  { %3895 = vmatprep.subr.mxu0 %v7049_v50  ;;  %5244 = vmatprep.subr.mxu1 %v7538_v14 }
 0xd14   :  { %3896 = vmatpush1.msra.mxu0 %v7052_v51  ;;  %5245 = vmatpush3.msra.mxu1 %v7231_v21 }
 0xd15   :  { %3897 = vmatprep.subr.mxu0 %v7055_v52  ;;  %5246 = vmatprep.subr.mxu1 %v7538_v14 }
 0xd16   :  { %3898 = vmatpush1.msra.mxu0 %v7058_v29  ;;  %5247 = vmatpush3.msra.mxu1 %v7235_v46 }
 0xd17   :  { %3899 = vmatprep.subr.mxu0 %v7061_v38  ;;  %5248 = vmatprep.subr.mxu1 %v7538_v14 }
 0xd18   :  { %3900 = vmatpush1.msra.mxu0 %v7064_v61  ;;  %5249 = vmatpush3.msra.mxu1 %v7066_v55 }
 0xd19   :  { %3901 = vmatprep.subr.mxu0 %v7068_v24  ;;  %5250 = vmatprep.subr.mxu1 %v7538_v14 }
 0xd1a   :  { %3902 = vmatpush1.msra.mxu0 %v7072_v56  ;;  %5251 = vmatpush3.msra.mxu1 %v7074_v0 }
 0xd1b   :  { %3903 = vmatprep.subr.mxu0 %v7076_v40  ;;  %5252 = vmatprep.subr.mxu1 %v7538_v14 }
 0xd1c   :  { %3904 = vmatpush1.msra.mxu0 %v7080_v3  ;;  %5253 = vmatpush3.msra.mxu1 %v7082_v57 }
 0xd1d   :  { %3905 = vmatprep.subr.mxu0 %v7086_v45  ;;  %5254 = vmatprep.subr.mxu1 %v7538_v14 }
 0xd1e   :  { %3906 = vmatpush1.msra.mxu0 %v7090_v58  ;;  %5255 = vmatpush3.msra.mxu1 %v7092_v33 }
 0xd1f   :  { %3907 = vmatprep.subr.mxu0 %v7096_v44  ;;  %5256 = vmatprep.subr.mxu1 %v7538_v14 }
 0xd20   :  { %3908 = vmatpush1.msra.mxu0 %v7100_v53  ;;  %5257 = vmatpush3.msra.mxu1 %v7102_v16 }
 0xd21   :  { %3909 = vmatprep.subr.mxu0 %v7106_v27  ;;  %5258 = vmatprep.subr.mxu1 %v7538_v14 }
 0xd22   :  { %3910 = vmatpush1.msra.mxu0 %v7110_v23  ;;  %5259 = vmatpush3.msra.mxu1 %v7112_v32 }
 0xd23   :  { %3911 = vmatprep.subr.mxu0 %v7116_v62  ;;  %5260 = vmatprep.subr.mxu1 %v7538_v14 }
 0xd24   :  { %3912 = vmatpush1.msra.mxu0 %v7120_v34  ;;  %5261 = vmatpush3.msra.mxu1 %v7122_v28 }
 0xd25   :  { %3913 = vmatprep.subr.mxu0 %v7126_v6  ;;  %5262 = vmatprep.subr.mxu1 %v7538_v14 }
 0xd26   :  { %3914 = vmatpush1.msra.mxu0 %v7130_v8  ;;  %5263 = vmatpush3.msra.mxu1 %v7132_v10 }
 0xd27   :  { %3915 = vmatprep.subr.mxu0 %v7136_v11  ;;  %5264 = vmatprep.subr.mxu1 %v7538_v14 }
 0xd28   :  { %3916 = vmatpush1.msra.mxu0 %v7140_v12  ;;  %5265 = vmatpush3.msra.mxu1 %v7142_v13 }
 0xd29   :  { %3917 = vmatprep.subr.mxu0 %v7146_v15  ;;  %5266 = vmatprep.subr.mxu1 %v7538_v14 }
 0xd2a   :  { %3918 = vmatpush1.msra.mxu0 %v7150_v17  ;;  %5267 = vmatpush3.msra.mxu1 %v7152_v18 }
 0xd2b   :  { %3919 = vmatprep.subr.mxu0 %v7648_v63  ;;  %5268 = vmatprep.subr.mxu1 %v7538_v14 }
 0xd2c   :  { %3920 = vmatpush1.msra.mxu0 %v7649_v2  ;;  %3953 = vmatprep.mubr.f32.mxu0 %v7538_v14 }
 0xd2d   :  { %5269 = vmatpush3.msra.mxu1 %v7643_v5  ;;  %5270 = vmatprep.mubr.msk.f32.mxu1 %vm5545_vm1, %v7538_v14 }
 0xd2e   :  { %4111 = vmatprep.subr.mxu0 %v7650_v36  ;;  %5273 = vmatprep.subr.mxu1 %v7538_v14 }
 0xdcd   :  { %v3733_v60 = vpop.f32.mrf.mxu0  ;;  %v3804_v1 = vpop.f32.mrf.mxu1 }
 0xdce   :  { %v3811_v49 = vadd.f32 %v3733_v60, %v2362_v41  ;;  %v3832_v17 = vadd.f32 %v7268_v37, %v3804_v1  ;;  %v2470_v41 = vadd.f32 %v7654_v43, %v6854_v39 }
 0xdcf   :  { %v5237_v42 = vpop.f32.mrf.mxu1  ;;  %v3735_v25 = vpop.f32.mrf.mxu0 }
 0xdd0   :  { %v4374_v59 = vmul.f32 -1.442695, %v3811_v49  ;;  %v3818_v5 = vadd.f32 %v3735_v25, %v2364_v35 }
 0xdd2   :  { %5445 = vpow2.f32 %v4374_v59  ;;  %v4375_v2 = vmul.f32 -1.442695, %v3818_v5 }
 0xdd4   :  { %5447 = vpow2.f32 %v4375_v2 }
 0xddf   :  { %v5446_v63 = vpop.eup %5445 }
 0xde0   :  { %v3815_v18 = vadd.f32 1.0, %v5446_v63 }
 0xde1   :  { %v5448_v36 = vpop.eup %5447 }
 0xde2   :  { %5449 = vrcp.f32 %v3815_v18  ;;  %v3822_v42 = vadd.f32 1.0, %v5448_v36  ;;  %v7666_v36 = vld [vmem:[#allocation18_spill] sm:$0xff] }
 0xdef   :  { %v5450_v30 = vpop.eup %5449 }
 0xdf0   :  { %v3833_v60 = vmul.f32 %v5450_v30, %v3832_v17  ;;  %v2480_v30 = vadd.f32 %v7666_v36, %v6854_v39 }
 0xdf2   :  { %v3834_v49 = vadd.f32 %v3833_v60, %v2470_v41 }
 0xdf4   :  { %5451 = vtanh.f32 %v3834_v49 }
 0xdf5   :  { %5453 = vrcp.f32 %v3822_v42 }
 0xe01   :  { %v5452_v59 = vpop.eup %5451 }
 0xe02   :  { %v3836_v25 = vsub.f32 %v7274_v48, %v5452_v59  ;;  %v5454_v5 = vpop.eup %5453 }
 0xe04   :  { %v3837_v20 = vmul.f32 %v5454_v5, %v3836_v25  ;;  %v4383_v5 = vld [vmem:[%s7452_s9] ss:$0 sm:$0xff] }
 0xe06   :  { %v7353_v63 = vadd.f32 %v5452_v59, %v3837_v20 }
 0xe08   :  { %3954 = vmatmul.mubr.f32.vlgmr.msra.gmra.mxu0 %v7353_v63  ;;  %5271 = vmatmul.mubr.f32.vlgmr.msra.gmra.mxu1 %v7353_v63 }
 0xe09   :  { %4112 = vmatpush1.msra.mxu0 %v7034_v22  ;;  %5274 = vmatpush3.msra.mxu1 %v7219_v54  ;;  %v7655_v22 = vld [vmem:[#allocation15_spill] sm:$0xff] }
 0xe0a   :  { %4113 = vmatprep.subr.mxu0 %v7037_v47  ;;  %5275 = vmatprep.subr.mxu1 %v7538_v14  ;;  %v7656_v47 = vld [vmem:[#allocation17_spill] sm:$0xff] }
 0xe0b   :  { %4114 = vmatpush1.msra.mxu0 %v7040_v4  ;;  %5276 = vmatpush3.msra.mxu1 %v7223_v7  ;;  %v7657_v4 = vld [vmem:[#allocation19_spill] sm:$0xff] }
 0xe0c   :  { %4115 = vmatprep.subr.mxu0 %v7043_v19  ;;  %5277 = vmatprep.subr.mxu1 %v7538_v14  ;;  %v7658_v19 = vld [vmem:[#allocation22_spill] sm:$0xff]  ;;  %v7665_v7 = vld [vmem:[#allocation39_spill] sm:$0xff] }
 0xe0d   :  { %4116 = vmatpush1.msra.mxu0 %v7046_v9  ;;  %5278 = vmatpush3.msra.mxu1 %v7227_v31  ;;  %v7659_v9 = vld [vmem:[#allocation14_spill] sm:$0xff]  ;;  %v2376_v31 = vadd.f32 %v7665_v7, %v6843_v26 }
 0xe0e   :  { %4117 = vmatprep.subr.mxu0 %v7049_v50  ;;  %5279 = vmatprep.subr.mxu1 %v7538_v14  ;;  %v7660_v50 = vld [vmem:[#allocation33_spill] sm:$0xff] }
 0xe0f   :  { %4118 = vmatpush1.msra.mxu0 %v7052_v51  ;;  %5280 = vmatpush3.msra.mxu1 %v7231_v21  ;;  %v7661_v51 = vld [vmem:[#allocation16_spill] sm:$0xff] }
 0xe10   :  { %4119 = vmatprep.subr.mxu0 %v7055_v52  ;;  %5281 = vmatprep.subr.mxu1 %v7538_v14  ;;  %v2368_v52 = vadd.f32 %v7661_v51, %v7660_v50 }
 0xe11   :  { %4120 = vmatpush1.msra.mxu0 %v7058_v29  ;;  %5282 = vmatpush3.msra.mxu1 %v7235_v46 }
 0xe12   :  { %4121 = vmatprep.subr.mxu0 %v7061_v38  ;;  %5283 = vmatprep.subr.mxu1 %v7538_v14 }
 0xe13   :  { %4122 = vmatpush1.msra.mxu0 %v7064_v61  ;;  %5284 = vmatpush3.msra.mxu1 %v7066_v55 }
 0xe14   :  { %4123 = vmatprep.subr.mxu0 %v7068_v24  ;;  %5285 = vmatprep.subr.mxu1 %v7538_v14 }
 0xe15   :  { %4124 = vmatpush1.msra.mxu0 %v7072_v56  ;;  %5286 = vmatpush3.msra.mxu1 %v7074_v0  ;;  %v7662_v0 = vld [vmem:[#allocation32_spill] sm:$0xff] }
 0xe16   :  { %4125 = vmatprep.subr.mxu0 %v7076_v40  ;;  %5287 = vmatprep.subr.mxu1 %v7538_v14  ;;  %v2370_v40 = vadd.f32 %v7662_v0, %v6843_v26 }
 0xe17   :  { %4126 = vmatpush1.msra.mxu0 %v7080_v3  ;;  %5288 = vmatpush3.msra.mxu1 %v7082_v57 }
 0xe18   :  { %4127 = vmatprep.subr.mxu0 %v7086_v45  ;;  %5289 = vmatprep.subr.mxu1 %v7538_v14 }
 0xe19   :  { %4128 = vmatpush1.msra.mxu0 %v7090_v58  ;;  %5290 = vmatpush3.msra.mxu1 %v7092_v33 }
 0xe1a   :  { %4129 = vmatprep.subr.mxu0 %v7096_v44  ;;  %5291 = vmatprep.subr.mxu1 %v7538_v14 }
 0xe1b   :  { %4130 = vmatpush1.msra.mxu0 %v7100_v53  ;;  %5292 = vmatpush3.msra.mxu1 %v7102_v16  ;;  %v7663_v53 = vld [vmem:[#allocation40_spill] sm:$0xff] }
 0xe1c   :  { %4131 = vmatprep.subr.mxu0 %v7106_v27  ;;  %5293 = vmatprep.subr.mxu1 %v7538_v14  ;;  %v2475_v16 = vadd.f32 %v7663_v53, %v6854_v39 }
 0xe1d   :  { %4132 = vmatpush1.msra.mxu0 %v7110_v23  ;;  %5294 = vmatpush3.msra.mxu1 %v7112_v32 }
 0xe1e   :  { %4133 = vmatprep.subr.mxu0 %v7116_v62  ;;  %5295 = vmatprep.subr.mxu1 %v7538_v14 }
 0xe1f   :  { %4134 = vmatpush1.msra.mxu0 %v7120_v34  ;;  %5296 = vmatpush3.msra.mxu1 %v7122_v28 }
 0xe20   :  { %4135 = vmatprep.subr.mxu0 %v7126_v6  ;;  %5297 = vmatprep.subr.mxu1 %v7538_v14 }
 0xe21   :  { %4136 = vmatpush1.msra.mxu0 %v7130_v8  ;;  %5298 = vmatpush3.msra.mxu1 %v7132_v10  ;;  %v7664_v10 = vld [vmem:[#allocation36_spill] sm:$0xff] }
 0xe22   :  { %4137 = vmatprep.subr.mxu0 %v7136_v11  ;;  %5299 = vmatprep.subr.mxu1 %v7538_v14  ;;  %v2374_v11 = vadd.f32 %v7664_v10, %v7660_v50 }
 0xe23   :  { %4138 = vmatpush1.msra.mxu0 %v7140_v12  ;;  %5300 = vmatpush3.msra.mxu1 %v7142_v13 }
 0xe24   :  { %4139 = vmatprep.subr.mxu0 %v7146_v15  ;;  %5301 = vmatprep.subr.mxu1 %v7538_v14 }
 0xe25   :  { %4140 = vmatpush1.msra.mxu0 %v7655_v22  ;;  %5302 = vmatpush3.msra.mxu1 %v7656_v47 }
 0xe26   :  { %4141 = vmatprep.subr.mxu0 %v7657_v4  ;;  %5303 = vmatprep.subr.mxu1 %v7538_v14 }
 0xe27   :  { %4142 = vmatpush1.msra.mxu0 %v7658_v19  ;;  %4175 = vmatprep.mubr.f32.mxu0 %v7538_v14 }
 0xe28   :  { %5304 = vmatpush3.msra.mxu1 %v7659_v9  ;;  %5305 = vmatprep.mubr.msk.f32.mxu1 %vm5545_vm1, %v7538_v14 }
 0xec8   :  { %v3955_v29 = vpop.f32.mrf.mxu0  ;;  %v4026_v38 = vpop.f32.mrf.mxu1 }
 0xec9   :  { %v4033_v61 = vadd.f32 %v3955_v29, %v2368_v52  ;;  %v4054_v33 = vadd.f32 %v7268_v37, %v4026_v38 }
 0xeca   :  { %v5272_v55 = vpop.f32.mrf.mxu1  ;;  %v3957_v56 = vpop.f32.mrf.mxu0 }
 0xecb   :  { %v4377_v24 = vmul.f32 -1.442695, %v4033_v61  ;;  %v4040_v3 = vadd.f32 %v3957_v56, %v2370_v40 }
 0xecd   :  { %5455 = vpow2.f32 %v4377_v24  ;;  %v4378_v57 = vmul.f32 -1.442695, %v4040_v3 }
 0xecf   :  { %5457 = vpow2.f32 %v4378_v57 }
 0xeda   :  { %v5456_v45 = vpop.eup %5455 }
 0xedb   :  { %v4037_v58 = vadd.f32 1.0, %v5456_v45 }
 0xedc   :  { %v5458_v14 = vpop.eup %5457 }
 0xedd   :  { %5459 = vrcp.f32 %v4037_v58  ;;  %v4044_v32 = vadd.f32 1.0, %v5458_v14 }
 0xeea   :  { %v5460_v44 = vpop.eup %5459 }
 0xeeb   :  { %v4055_v27 = vmul.f32 %v5460_v44, %v4054_v33 }
 0xeed   :  { %v4056_v23 = vadd.f32 %v4055_v27, %v2475_v16 }
 0xeef   :  { %5461 = vtanh.f32 %v4056_v23 }
 0xef0   :  { %5463 = vrcp.f32 %v4044_v32 }
 0xefc   :  { %v5462_v62 = vpop.eup %5461 }
 0xefd   :  { %v4058_v34 = vsub.f32 %v7353_v63, %v5462_v62  ;;  %v5464_v28 = vpop.eup %5463 }
 0xeff   :  { %v4059_v6 = vmul.f32 %v5464_v28, %v4058_v34 }
 0xf01   :  { %v4060_v8 = vadd.f32 %v5462_v62, %v4059_v6 }
 0xf03   :  { %4176 = vmatmul.mubr.f32.vlgmr.msra.gmra.mxu0 %v4060_v8  ;;  %5306 = vmatmul.mubr.f32.vlgmr.msra.gmra.mxu1 %v4060_v8 }
 0xfc3   :  { %v4177_v12 = vpop.f32.mrf.mxu0  ;;  %v4248_v13 = vpop.f32.mrf.mxu1 }
 0xfc4   :  { %v4255_v15 = vadd.f32 %v4177_v12, %v2374_v11  ;;  %v4276_v1 = vadd.f32 %v7268_v37, %v4248_v13  ;;  %v4384_v37 = vld [vmem:[#allocation5] ss:$0 sm:$0xff] }
 0xfc5   :  { %v5307_v17 = vpop.f32.mrf.mxu1  ;;  %v4179_v54 = vpop.f32.mrf.mxu0 }
 0xfc6   :  { %v4380_v18 = vmul.f32 -1.442695, %v4255_v15  ;;  %v4262_v21 = vadd.f32 %v4179_v54, %v2376_v31 }
 0xfc8   :  { %5465 = vpow2.f32 %v4380_v18  ;;  %v4381_v46 = vmul.f32 -1.442695, %v4262_v21 }
 0xfca   :  { %5467 = vpow2.f32 %v4381_v46 }
 0xfd5   :  { %v5466_v48 = vpop.eup %5465 }
 0xfd6   :  { %v4259_v2 = vadd.f32 1.0, %v5466_v48 }
 0xfd7   :  { %v5468_v43 = vpop.eup %5467 }
 0xfd8   :  { %5469 = vrcp.f32 %v4259_v2  ;;  %v4266_v49 = vadd.f32 1.0, %v5468_v43 }
 0xfe5   :  { %v5470_v35 = vpop.eup %5469 }
 0xfe6   :  { %v4277_v41 = vmul.f32 %v5470_v35, %v4276_v1 }
 0xfe8   :  { %v4278_v60 = vadd.f32 %v4277_v41, %v2480_v30 }
 0xfea   :  { %5471 = vtanh.f32 %v4278_v60 }
 0xfeb   :  { %5473 = vrcp.f32 %v4266_v49 }
 0xff7   :  { %v5472_v42 = vpop.eup %5471 }
 0xff8   :  { %v4280_v26 = vsub.f32 %v4060_v8, %v5472_v42  ;;  %v5474_v59 = vpop.eup %5473 }
 0xffa   :  { %v4281_v25 = vmul.f32 %v5474_v59, %v4280_v26 }
 0xffc   :  { %v4282_v20 = vadd.f32 %v5472_v42, %v4281_v25 }
 0xffe   :  { %v4292_v63 = vmul.f32 %v4383_v5, %v4282_v20 }
0x1000   :  { %4293 = vadd.xlane.f32.xlu0 %v4292_v63 }
0x1089   :  { %v4294_v22 = vpop.xlane.xlu0 %4293 }
0x108a   :  { %v4302_v47 = vadd.f32 %v4384_v37, %v4294_v22 }
0x108c   :  { %v4303_v39 = vmax.f32 %v4302_v47, 0.0 }
0x108e   :  { %4305 = vst.msk [vmem:[%s7454_s11] sm:$0xff] %vm4304_vm2, %v4303_v39 }
0x108f   :  { %4310 = vsyncpa [#allocation7], 1 }
0x1090   :  { %4311 = vsyncpa [#allocation9], 1 }

</bundles_post_ra>
